<compile_context>
chip_gen: v6e
topology: v6e:2x2x1
jax: 0.10.0
libtpu: 0.0.40
codegen_flags: <defaults>
</compile_context>

<pallas_src>
import functools

import jax
import jax.numpy as jnp
from jax import lax
from jax.experimental import pallas as pl
from jax.experimental.pallas import tpu as pltpu

EPS = 1e-5


def _vmem_capacity():
    try:
        return int(pltpu.get_tpu_info().vmem_capacity_bytes)
    except Exception:
        return 128 * 1024 * 1024


_VMEM_CAP = _vmem_capacity()
# ~70% of physical VMEM (v5e/v6e: ~89 MiB, v7x: ~44 MiB), capped at 100 MiB.
VMEM_LIMIT = min(int(_VMEM_CAP * 0.70), 100 * 1024 * 1024)


# --------------------------------------------------------------------------
# Tiling heuristics
# --------------------------------------------------------------------------
def _pick_row_band(Ho, Wo, pool):
    """Rows per MXU matmul: target M = RB*Wo ~ 256 (full 256-wide MXU push on
    v6e/v7x), RB divides Ho, RB even when a 2x2 pool epilogue is fused."""
    m_cap = max(1, 256 // max(Wo, 1))
    rb = 2 if pool else 1
    for d in range(1, Ho + 1):
        if Ho % d == 0 and d <= m_cap and (not pool or d % 2 == 0):
            rb = max(rb, d)
    return min(rb, Ho)


def _pick_cout_tile(cout, *, kk_cin, m, in_bytes, pad_bytes, out_pix):
    """Largest lane-dense Cout tile whose *total* per-step VMEM footprint
    (double-buffered bf16 weights + inputs + pad scratch + bf16 outputs + f32
    accumulator + 2 MiB margin) fits under VMEM_LIMIT."""
    cands = [cout] + [t for t in (512, 256, 128) if t < cout and cout % t == 0]
    for t in cands:
        w_b = 2 * kk_cin * t * 2          # double-buffered bf16 weight slab
        out_b = 2 * out_pix * t * 2       # double-buffered bf16 output block(s)
        acc_b = m * t * 4                 # f32 accumulator scratch
        if in_bytes + pad_bytes + w_b + out_b + acc_b + (2 << 20) <= VMEM_LIMIT:
            return t
    return min(cout, 128)                 # minimal lane-dense tile (< 2.5 MiB bf16)


# --------------------------------------------------------------------------
# Pallas kernel: KxK stride-1 "same" conv with fused scale/shift/ReLU, optional
# fused 2x2 max-pool, optional fused skip-concat (two inputs), optional fused
# 1x1 projection (outconv) epilogue.
# --------------------------------------------------------------------------
def _conv_kernel(*refs, K, pad, relu, RB, pool, two_in, proj, fold, Cup):
    i = 0
    if two_in:
        up_ref, skip_ref = refs[i], refs[i + 1]
        i += 2
    else:
        x_ref = refs[i]
        i += 1
    w_ref, sc_ref, sh_ref = refs[i], refs[i + 1], refs[i + 2]
    i += 3
    if proj:
        pw_ref, pb_ref = refs[i], refs[i + 1]
        i += 2
    o_ref = refs[i]
    i += 1
    p_ref = refs[i] if pool else None
    i += 1 if pool else 0
    xpad_ref, acc_ref = refs[i], refs[i + 1]

    Hp, Wp, Cin = xpad_ref.shape          # Cin = total (up + skip) channels
    H, W = Hp - 2 * pad, Wp - 2 * pad
    Ho, Wo = H, W                         # stride-1, "same" padding
    Ct = acc_ref.shape[-1]

    c = pl.program_id(1)                  # Cout-tile axis ("arbitrary")

    # Build the zero-padded input once per batch element (c == 0 only): zero the
    # 1-pixel border, copy the interior.  For up-blocks the skip concat happens
    # here, in VMEM, instead of as an HBM tensor.
    @pl.when(c == 0)
    def _():
        z_row = jnp.zeros((pad, Wp, Cin), xpad_ref.dtype)
        z_col = jnp.zeros((Hp, pad, Cin), xpad_ref.dtype)
        xpad_ref[0:pad, :, :] = z_row
        xpad_ref[Hp - pad:Hp, :, :] = z_row
        xpad_ref[:, 0:pad, :] = z_col
        xpad_ref[:, Wp - pad:Wp, :] = z_col
        if two_in:
            xpad_ref[pl.ds(pad, H), pl.ds(pad, W), 0:Cup] = up_ref[...]
            xpad_ref[pl.ds(pad, H), pl.ds(pad, W), Cup:Cin] = skip_ref[...]
        else:
            xpad_ref[pl.ds(pad, H), pl.ds(pad, W), :] = x_ref[...]

    # Per-channel epilogue constants hoisted out of the band loop.
    sc = sc_ref[0]
    sh = sh_ref[0]
    if proj:
        pw = pw_ref[...]
        pb = pb_ref[0]

    nb = Ho // RB

    def band(bi, carry):
        r0 = bi * RB
        if RB % 8 == 0:
            r0 = pl.multiple_of(r0, 8)
        for dy in range(K):               # static unroll over row taps
            rows = pl.ds(r0 + dy, RB)
            if fold:                      # small Cin: fold column taps into depth
                parts = [xpad_ref[rows, pl.ds(dx, Wo), :] for dx in range(K)]
                lhs = parts[0] if K == 1 else jnp.concatenate(parts, axis=-1)
                lhs = lhs.reshape(RB * Wo, K * Cin)
                contrib = jnp.dot(lhs, w_ref[dy],
                                  preferred_element_type=jnp.float32)
            else:                         # Cin >= 128: direct per-tap dots
                contrib = None
                for dx in range(K):
                    lhs = xpad_ref[rows, pl.ds(dx, Wo), :].reshape(RB * Wo, Cin)
                    d = jnp.dot(lhs, w_ref[dy, dx],
                                preferred_element_type=jnp.float32)
                    contrib = d if contrib is None else contrib + d
            if dy == 0:
                acc_ref[...] = contrib
            else:
                acc_ref[...] += contrib

        y = acc_ref[...] * sc + sh        # f32 epilogue (bias / folded BN)
        if relu:
            y = jnp.maximum(y, 0.0)

        if proj:                          # fused 1x1 outconv: only nclass stored
            d = jnp.dot(y.astype(jnp.bfloat16), pw,
                        preferred_element_type=jnp.float32) + pb
            o_ref[pl.ds(r0, RB), :, :] = d.reshape(RB, Wo, -1).astype(o_ref.dtype)
        else:
            y3 = y.reshape(RB, Wo, Ct).astype(o_ref.dtype)
            o_ref[pl.ds(r0, RB), :, :] = y3
            if pool:                      # fused 2x2 max-pool epilogue
                rp = jnp.max(y3.reshape(RB // 2, 2, Wo, Ct), axis=1)
                pv = jnp.max(rp.reshape(RB // 2, Wo // 2, 2, Ct), axis=2)
                p_ref[pl.ds(r0 // 2, RB // 2), :, :] = pv.astype(p_ref.dtype)
        return carry

    lax.fori_loop(0, nb, band, 0, unroll=(nb if nb <= 8 else 4))


# --------------------------------------------------------------------------
# Pallas kernel: ConvTranspose2d(k=4, s=2, p=1) as an exact polyphase
# decomposition.  One grid step handles one output-row parity (py) and computes
# BOTH column parities, writing (H, W, 2*Cout) with the last dim ordered
# (px, co) so that the (N, H, 2, W, 2*Cout) output is depth-to-space'd by a
# free contiguous reshape.
# --------------------------------------------------------------------------
def _deconv_kernel(x_ref, w_ref, sh_ref, o_ref, xpad_ref, acc_ref, *, RB):
    H, W, Cin = x_ref.shape
    C2 = o_ref.shape[-1]
    Cout = C2 // 2
    py = pl.program_id(1)                 # output row parity ("arbitrary" axis)

    @pl.when(py == 0)                     # 1-padded input built once per n
    def _():
        z_row = jnp.zeros((1, W + 2, Cin), xpad_ref.dtype)
        z_col = jnp.zeros((H + 2, 1, Cin), xpad_ref.dtype)
        xpad_ref[0:1, :, :] = z_row
        xpad_ref[H + 1:H + 2, :, :] = z_row
        xpad_ref[:, 0:1, :] = z_col
        xpad_ref[:, W + 1:W + 2, :] = z_col
        xpad_ref[pl.ds(1, H), pl.ds(1, W), :] = x_ref[...]

    sh = sh_ref[0]
    nb = H // RB

    def band(bi, carry):
        r0 = bi * RB
        if RB % 8 == 0:
            r0 = pl.multiple_of(r0, 8)
        for dy in range(2):               # 2 row taps per parity
            rows = pl.ds(r0 + dy + py, RB)
            s0 = xpad_ref[rows, pl.ds(0, W), :].reshape(RB * W, Cin)
            s1 = xpad_ref[rows, pl.ds(1, W), :].reshape(RB * W, Cin)
            s2 = xpad_ref[rows, pl.ds(2, W), :].reshape(RB * W, Cin)
            a0 = (jnp.dot(s0, w_ref[dy, 0, 0], preferred_element_type=jnp.float32)
                  + jnp.dot(s1, w_ref[dy, 0, 1], preferred_element_type=jnp.float32))
            a1 = (jnp.dot(s1, w_ref[dy, 1, 0], preferred_element_type=jnp.float32)
                  + jnp.dot(s2, w_ref[dy, 1, 1], preferred_element_type=jnp.float32))
            if dy == 0:
                acc_ref[0] = a0
                acc_ref[1] = a1
            else:
                acc_ref[0] += a0
                acc_ref[1] += a1
        y0 = acc_ref[0] + sh
        y1 = acc_ref[1] + sh
        out = jnp.concatenate([y0, y1], axis=-1)          # (RB*W, 2*Cout), px-major
        o_ref[pl.ds(r0, RB), :, :] = out.reshape(RB, W, C2).astype(o_ref.dtype)
        return carry

    lax.fori_loop(0, nb, band, 0, unroll=(nb if nb <= 8 else 4))


# --------------------------------------------------------------------------
# Wrappers around pallas_call
# --------------------------------------------------------------------------
def conv2d_pallas(x, lp, *, pool=False, skip=None, proj=None):
    """3x3 stride-1 'same' conv (NHWC, bf16 in / bf16 out) with fused bias/BN
    scale-shift (+ReLU).  Optional fused: 2x2 max-pool second output, skip-concat
    second input, 1x1 projection (outconv) epilogue replacing the main output."""
    N, H, W, Cin = x.shape
    K = lp["k"]
    pad = (K - 1) // 2
    assert pad >= 1
    Cskip = 0 if skip is None else skip.shape[-1]
    Cin_t = Cin + Cskip
    fold = lp["fold"]
    Cout = lp["w"].shape[-1]
    Ho, Wo = H, W
    assert not (pool and proj is not None)
    if pool:
        assert Ho % 2 == 0 and Wo % 2 == 0

    RB = _pick_row_band(Ho, Wo, pool)
    M = RB * Wo
    Hp, Wp = H + 2 * pad, W + 2 * pad

    ncl = None if proj is None else proj["w"].shape[-1]
    in_bytes = 2 * H * W * Cin_t * 2                       # double-buffered bf16 inputs
    pad_bytes = Hp * Wp * Cin_t * 2                        # bf16 pad scratch
    out_pix = Ho * Wo + (Ho * Wo // 4 if pool else 0)
    if proj is not None:
        tC = Cout                                          # full Cmid needed for proj
    else:
        tC = _pick_cout_tile(Cout, kk_cin=K * K * Cin_t, m=M,
                             in_bytes=in_bytes, pad_bytes=pad_bytes, out_pix=out_pix)
    NC = Cout // tC

    kernel = functools.partial(
        _conv_kernel, K=K, pad=pad, relu=lp["relu"], RB=RB, pool=pool,
        two_in=skip is not None, proj=proj is not None, fold=fold, Cup=Cin)

    in_specs = [pl.BlockSpec((None, H, W, Cin), lambda n, c: (n, 0, 0, 0))]
    inputs = [x]
    if skip is not None:
        in_specs.append(pl.BlockSpec((None, H, W, Cskip), lambda n, c: (n, 0, 0, 0)))
        inputs.append(skip)
    if fold:
        in_specs.append(pl.BlockSpec((K, K * Cin_t, tC), lambda n, c: (0, 0, c)))
    else:
        in_specs.append(pl.BlockSpec((K, K, Cin_t, tC), lambda n, c: (0, 0, 0, c)))
    inputs.append(lp["w"])
    in_specs += [pl.BlockSpec((1, tC), lambda n, c: (0, c)),
                 pl.BlockSpec((1, tC), lambda n, c: (0, c))]
    inputs += [lp["scale"], lp["shift"]]
    if proj is not None:
        in_specs += [pl.BlockSpec((Cout, ncl), lambda n, c: (0, 0)),
                     pl.BlockSpec((1, ncl), lambda n, c: (0, 0))]
        inputs += [proj["w"], proj["b"]]

    if proj is not None:
        out_shape = jax.ShapeDtypeStruct((N, Ho, Wo, ncl), jnp.float32)
        out_specs = pl.BlockSpec((None, Ho, Wo, ncl), lambda n, c: (n, 0, 0, 0))
    else:
        o_shape = jax.ShapeDtypeStruct((N, Ho, Wo, Cout), jnp.bfloat16)
        o_spec = pl.BlockSpec((None, Ho, Wo, tC), lambda n, c: (n, 0, 0, c))
        if pool:
            p_shape = jax.ShapeDtypeStruct((N, Ho // 2, Wo // 2, Cout), jnp.bfloat16)
            p_spec = pl.BlockSpec((None, Ho // 2, Wo // 2, tC),
                                  lambda n, c: (n, 0, 0, c))
            out_shape, out_specs = (o_shape, p_shape), (o_spec, p_spec)
        else:
            out_shape, out_specs = o_shape, o_spec

    scratch = [pltpu.VMEM((Hp, Wp, Cin_t), jnp.bfloat16),
               pltpu.VMEM((M, tC), jnp.float32)]

    return pl.pallas_call(
        kernel,
        out_shape=out_shape,
        grid=(N, NC),
        in_specs=in_specs,
        out_specs=out_specs,
        scratch_shapes=scratch,
        compiler_params=pltpu.CompilerParams(
            # Cout-tile axis must be "arbitrary": the pad scratch is built at c==0.
            dimension_semantics=("parallel", "arbitrary"),
            vmem_limit_bytes=VMEM_LIMIT),
    )(*inputs)


def conv_transpose2d_pallas(x, lp):
    """ConvTranspose2d(k=4, s=2, p=1) polyphase kernel; depth-to-space is a free
    contiguous reshape of the (N, H, 2, W, 2*Cout) kernel output."""
    N, H, W, Cin = x.shape
    wp = lp["w"]                          # (2py, 2dy, 2px, 2dx, Cin, Cout) bf16
    Cout = wp.shape[-1]
    RB = _pick_row_band(H, W, False)
    M = RB * W

    kernel = functools.partial(_deconv_kernel, RB=RB)
    y = pl.pallas_call(
        kernel,
        out_shape=jax.ShapeDtypeStruct((N, H, 2, W, 2 * Cout), jnp.bfloat16),
        grid=(N, 2),
        in_specs=[
            pl.BlockSpec((None, H, W, Cin), lambda n, p: (n, 0, 0, 0)),
            pl.BlockSpec((None, 2, 2, 2, Cin, Cout),
                         lambda n, p: (p, 0, 0, 0, 0, 0)),
            pl.BlockSpec((1, Cout), lambda n, p: (0, 0)),
        ],
        out_specs=pl.BlockSpec((None, H, None, W, 2 * Cout),
                               lambda n, p: (n, 0, p, 0, 0)),
        scratch_shapes=[pltpu.VMEM((H + 2, W + 2, Cin), jnp.bfloat16),
                        pltpu.VMEM((2, M, Cout), jnp.float32)],
        compiler_params=pltpu.CompilerParams(
            dimension_semantics=("parallel", "arbitrary"),
            vmem_limit_bytes=VMEM_LIMIT),
    )(x, wp, lp["shift"])
    # (N, H, 2, W, 2, Cout) -> (N, 2H, 2W, Cout): contiguous merge, no data movement.
    return y.reshape(N, 2 * H, 2 * W, Cout)


# --------------------------------------------------------------------------
# Deterministic parameter construction (shapes per UNet.__init__)
# --------------------------------------------------------------------------
def build_params(key):
    filters = [64, 128, 256, 512, 1024]
    in_ch, nclass = 3, 2
    cnt = [0]

    def nk():
        cnt[0] += 1
        return jax.random.fold_in(key, cnt[0])

    def conv_layer(cin, cout, k, bn, relu):
        kw, kb = jax.random.split(nk())
        w = jax.random.normal(kw, (cout, cin, k, k), jnp.float32) \
            * (2.0 / (cin * k * k)) ** 0.5
        b = jax.random.normal(kb, (cout,), jnp.float32) * 0.01
        fold = cin < 128
        wt = jnp.transpose(w, (2, 3, 1, 0))               # (kh, kw, cin, cout)
        if fold:                                          # column taps folded into depth
            wt = wt.reshape(k, k * cin, cout)
        wt = wt.astype(jnp.bfloat16)
        if bn:  # eval-mode BatchNorm fold (gamma=1, beta=0, mean=0, var=1)
            s = 1.0 / (1.0 + EPS) ** 0.5
            scale = jnp.full((cout,), s, jnp.float32)
            shift = b * s
        else:
            scale = jnp.ones((cout,), jnp.float32)
            shift = b
        return dict(w=wt, scale=scale.reshape(1, cout), shift=shift.reshape(1, cout),
                    k=k, relu=relu, fold=fold)

    def deconv_layer(cin, cout, k=4):
        kw, kb = jax.random.split(nk())
        w = jax.random.normal(kw, (cin, cout, k, k), jnp.float32) \
            * (2.0 / (cin * k * k)) ** 0.5
        b = jax.random.normal(kb, (cout,), jnp.float32) * 0.01
        # Polyphase weights: WP[py, dy, px, dx, ci, co] = w[ci, co, 3-2dy-py, 3-2dx-px]
        wp = jnp.stack([
            jnp.stack([
                jnp.stack([
                    jnp.stack([w[:, :, 3 - 2 * dy - py, 3 - 2 * dx - px]
                               for dx in range(2)], axis=0)
                    for px in range(2)], axis=0)
                for dy in range(2)], axis=0)
            for py in range(2)], axis=0)                  # (2, 2, 2, 2, cin, cout)
        return dict(w=wp.astype(jnp.bfloat16), shift=b.reshape(1, cout))

    def outconv_layer(cin, cout):
        kw, kb = jax.random.split(nk())
        w = jax.random.normal(kw, (cout, cin, 1, 1), jnp.float32) * (2.0 / cin) ** 0.5
        b = jax.random.normal(kb, (cout,), jnp.float32) * 0.01
        return dict(w=jnp.transpose(w[:, :, 0, 0], (1, 0)).astype(jnp.bfloat16),
                    b=b.reshape(1, cout))

    def unetconv2(cin, cout, bn):
        return [conv_layer(cin, cout, 3, bn, True),
                conv_layer(cout, cout, 3, bn, True)]

    p = {
        "conv1":  unetconv2(in_ch,      filters[0], True),
        "conv2":  unetconv2(filters[0], filters[1], True),
        "conv3":  unetconv2(filters[1], filters[2], True),
        "conv4":  unetconv2(filters[2], filters[3], True),
        "center": unetconv2(filters[3], filters[4], True),
        "up4": {"up": deconv_layer(filters[4], filters[3]),
                "conv": unetconv2(filters[4], filters[3], False)},
        "up3": {"up": deconv_layer(filters[3], filters[2]),
                "conv": unetconv2(filters[3], filters[2], False)},
        "up2": {"up": deconv_layer(filters[2], filters[1]),
                "conv": unetconv2(filters[2], filters[1], False)},
        "up1": {"up": deconv_layer(filters[1], filters[0]),
                "conv": unetconv2(filters[1], filters[0], False)},
        "outconv": outconv_layer(filters[0], nclass),
        "nclass": nclass,
    }
    return p


# --------------------------------------------------------------------------
# Forward pass
# --------------------------------------------------------------------------
def _apply_unetconv2(x, layers, pool=False, skip=None):
    x = conv2d_pallas(x, layers[0], skip=skip)
    return conv2d_pallas(x, layers[1], pool=pool)


def _apply_up(low, skip, up_p):
    up = conv_transpose2d_pallas(low, up_p["up"])
    # concat([upsampled, skip]) is fused into the first conv's pad scratch.
    return _apply_unetconv2(up, up_p["conv"], skip=skip)


def unet_forward(params, x_nchw):
    x = jnp.transpose(x_nchw, (0, 2, 3, 1)).astype(jnp.bfloat16)   # NCHW -> NHWC bf16
    c1, m1 = _apply_unetconv2(x,  params["conv1"], pool=True)
    c2, m2 = _apply_unetconv2(m1, params["conv2"], pool=True)
    c3, m3 = _apply_unetconv2(m2, params["conv3"], pool=True)
    c4, m4 = _apply_unetconv2(m3, params["conv4"], pool=True)
    center = _apply_unetconv2(m4, params["center"])
    u4 = _apply_up(center, c4, params["up4"])
    u3 = _apply_up(u4, c3, params["up3"])
    u2 = _apply_up(u3, c2, params["up2"])
    # Last up block: the 1x1 outconv is fused into the second conv's epilogue,
    # so u1 is never materialized in HBM.
    up1 = conv_transpose2d_pallas(u2, params["up1"]["up"])
    t1 = conv2d_pallas(up1, params["up1"]["conv"][0], skip=c1)
    d1 = conv2d_pallas(t1, params["up1"]["conv"][1], proj=params["outconv"])
    return jnp.transpose(d1, (0, 3, 1, 2)).astype(jnp.float32)     # NHWC -> NCHW


# --------------------------------------------------------------------------
if __name__ == "__main__":
    key = jax.random.PRNGKey(0)
    pkey, xkey = jax.random.split(key)
    params = build_params(pkey)
    x = jax.random.normal(xkey, (2, 3, 16, 16), jnp.float32)   # NCHW, like PyTorch
    out = unet_forward(params, x)
    out = jax.block_until_ready(out)
    assert out.shape == (2, 2, 16, 16), out.shape
    assert bool(jnp.all(jnp.isfinite(out)))
    print("KERNEL_OK")
</pallas_src>

<mosaic_0001>
module attributes {stable_mosaic.version = 11 : i64} {
  func.func @_conv_kernel(%arg0: i32, %arg1: i32, %arg2: memref<1x16x16x3xbf16, #tpu.memory_space<vmem>>, %arg3: memref<3x9x64xbf16, #tpu.memory_space<vmem>>, %arg4: memref<1x64xf32, #tpu.memory_space<vmem>>, %arg5: memref<1x64xf32, #tpu.memory_space<vmem>>, %arg6: memref<1x16x16x64xbf16, #tpu.memory_space<vmem>>, %arg7: memref<18x18x3xbf16, #tpu.memory_space<vmem>>, %arg8: memref<256x64xf32, #tpu.memory_space<vmem>>) attributes {dimension_semantics = [#tpu.dimension_semantics<parallel>, #tpu.dimension_semantics<arbitrary>], iteration_bounds = array<i64: 2, 1>, scalar_prefetch = 0 : i64, scratch_operands = 2 : i64, tpu.core_type = #tpu.core_type<tc>, window_params = [{transform_indices = @transform_0, window_bounds = array<i64: 1, 16, 16, 3>}, {transform_indices = @transform_1, window_bounds = array<i64: 3, 9, 64>}, {transform_indices = @transform_2, window_bounds = array<i64: 1, 64>}, {transform_indices = @transform_3, window_bounds = array<i64: 1, 64>}, {transform_indices = @transform_4, window_bounds = array<i64: 1, 16, 16, 64>}]} {
    %c0_i32 = arith.constant 0 : i32
    %0 = arith.cmpi eq, %arg1, %c0_i32 : i32
    %1 = arith.extui %0 : i1 to i32
    %c0_i32_0 = arith.constant 0 : i32
    %2 = arith.cmpi ne, %1, %c0_i32_0 : i32
    scf.if %2 {
      %cst_50 = arith.constant 0.000000e+00 : bf16
      %67 = vector.broadcast %cst_50 : bf16 to vector<1x18x3xbf16>
      %cst_51 = arith.constant 0.000000e+00 : bf16
      %68 = vector.broadcast %cst_51 : bf16 to vector<18x1x3xbf16>
      %c0_52 = arith.constant 0 : index
      %c0_53 = arith.constant 0 : index
      %c0_54 = arith.constant 0 : index
      %69 = vector.load %arg7[%c0_52, %c0_53, %c0_54] : memref<18x18x3xbf16, #tpu.memory_space<vmem>>, vector<1x18x3xbf16>
      tpu.vector_store %arg7[%c0_52, %c0_53, %c0_54], %67 {strides = array<i32>} : memref<18x18x3xbf16, #tpu.memory_space<vmem>>, vector<1x18x3xbf16>,
      %c17 = arith.constant 17 : index
      %c0_55 = arith.constant 0 : index
      %c0_56 = arith.constant 0 : index
      %70 = vector.load %arg7[%c17, %c0_55, %c0_56] : memref<18x18x3xbf16, #tpu.memory_space<vmem>>, vector<1x18x3xbf16>
      tpu.vector_store %arg7[%c17, %c0_55, %c0_56], %67 {strides = array<i32>} : memref<18x18x3xbf16, #tpu.memory_space<vmem>>, vector<1x18x3xbf16>,
      %c0_57 = arith.constant 0 : index
      %c0_58 = arith.constant 0 : index
      %c0_59 = arith.constant 0 : index
      %71 = vector.load %arg7[%c0_57, %c0_58, %c0_59] : memref<18x18x3xbf16, #tpu.memory_space<vmem>>, vector<18x1x3xbf16>
      tpu.vector_store %arg7[%c0_57, %c0_58, %c0_59], %68 {strides = array<i32>} : memref<18x18x3xbf16, #tpu.memory_space<vmem>>, vector<18x1x3xbf16>,
      %c0_60 = arith.constant 0 : index
      %c17_61 = arith.constant 17 : index
      %c0_62 = arith.constant 0 : index
      %72 = vector.load %arg7[%c0_60, %c17_61, %c0_62] : memref<18x18x3xbf16, #tpu.memory_space<vmem>>, vector<18x1x3xbf16>
      tpu.vector_store %arg7[%c0_60, %c17_61, %c0_62], %68 {strides = array<i32>} : memref<18x18x3xbf16, #tpu.memory_space<vmem>>, vector<18x1x3xbf16>,
      %c0_63 = arith.constant 0 : index
      %c0_64 = arith.constant 0 : index
      %c0_65 = arith.constant 0 : index
      %c0_66 = arith.constant 0 : index
      %73 = vector.load %arg2[%c0_63, %c0_64, %c0_65, %c0_66] : memref<1x16x16x3xbf16, #tpu.memory_space<vmem>>, vector<1x16x16x3xbf16>
      %74 = vector.shape_cast %73 : vector<1x16x16x3xbf16> to vector<16x16x3xbf16>
      %c1_67 = arith.constant 1 : index
      %c1_68 = arith.constant 1 : index
      %c0_69 = arith.constant 0 : index
      %75 = vector.load %arg7[%c1_67, %c1_68, %c0_69] : memref<18x18x3xbf16, #tpu.memory_space<vmem>>, vector<16x16x3xbf16>
      tpu.vector_store %arg7[%c1_67, %c1_68, %c0_69], %74 {strides = array<i32>} : memref<18x18x3xbf16, #tpu.memory_space<vmem>>, vector<16x16x3xbf16>,
    } else {
    }
    %c0 = arith.constant 0 : index
    %c0_1 = arith.constant 0 : index
    %3 = vector.load %arg4[%c0, %c0_1] : memref<1x64xf32, #tpu.memory_space<vmem>>, vector<1x64xf32>
    %4 = vector.shape_cast %3 : vector<1x64xf32> to vector<64xf32>
    %c0_2 = arith.constant 0 : index
    %c0_3 = arith.constant 0 : index
    %5 = vector.load %arg5[%c0_2, %c0_3] : memref<1x64xf32, #tpu.memory_space<vmem>>, vector<1x64xf32>
    %6 = vector.shape_cast %5 : vector<1x64xf32> to vector<64xf32>
    %c0_i32_4 = arith.constant 0 : i32
    %c16_i32 = arith.constant 16 : i32
    %7 = arith.muli %c0_i32_4, %c16_i32 : i32
    %8 = tpu.assume_multiple %7, 8 : i32
    %c0_i32_5 = arith.constant 0 : i32
    %9 = arith.addi %8, %c0_i32_5 : i32
    %10 = arith.index_cast %9 : i32 to index
    %c0_6 = arith.constant 0 : index
    %c0_7 = arith.constant 0 : index
    %11 = vector.load %arg7[%10, %c0_6, %c0_7] : memref<18x18x3xbf16, #tpu.memory_space<vmem>>, vector<16x16x3xbf16>
    %12 = arith.index_cast %9 : i32 to index
    %c1 = arith.constant 1 : index
    %c0_8 = arith.constant 0 : index
    %13 = vector.load %arg7[%12, %c1, %c0_8] : memref<18x18x3xbf16, #tpu.memory_space<vmem>>, vector<16x16x3xbf16>
    %14 = arith.index_cast %9 : i32 to index
    %c2 = arith.constant 2 : index
    %c0_9 = arith.constant 0 : index
    %15 = vector.load %arg7[%14, %c2, %c0_9] : memref<18x18x3xbf16, #tpu.memory_space<vmem>>, vector<16x16x3xbf16>
    %16 = tpu.concatenate %11, %13, %15 in 2 : vector<16x16x3xbf16>, vector<16x16x3xbf16>, vector<16x16x3xbf16> -> vector<16x16x9xbf16>
    %17 = vector.shape_cast %16 : vector<16x16x9xbf16> to vector<256x9xbf16>
    %c0_10 = arith.constant 0 : index
    %c0_11 = arith.constant 0 : index
    %c0_12 = arith.constant 0 : index
    %18 = vector.load %arg3[%c0_10, %c0_11, %c0_12] : memref<3x9x64xbf16, #tpu.memory_space<vmem>>, vector<1x9x64xbf16>
    %19 = vector.shape_cast %18 : vector<1x9x64xbf16> to vector<9x64xbf16>
    %cst = arith.constant dense<0.000000e+00> : vector<256x64xf32>
    %20 = tpu.matmul %17, %19, %cst {dimension_numbers = #tpu.dot_dimension_numbers<[1], [0], [0], [1], [0, 0, 1, 1], [], []>} : vector<256x9xbf16>, vector<9x64xbf16>, vector<256x64xf32> -> vector<256x64xf32>
    %c0_13 = arith.constant 0 : index
    %c0_14 = arith.constant 0 : index
    %21 = vector.load %arg8[%c0_13, %c0_14] : memref<256x64xf32, #tpu.memory_space<vmem>>, vector<256x64xf32>
    tpu.vector_store %arg8[%c0_13, %c0_14], %20 {strides = array<i32>} : memref<256x64xf32, #tpu.memory_space<vmem>>, vector<256x64xf32>,
    %c1_i32 = arith.constant 1 : i32
    %22 = arith.addi %8, %c1_i32 : i32
    %23 = arith.index_cast %22 : i32 to index
    %c0_15 = arith.constant 0 : index
    %c0_16 = arith.constant 0 : index
    %24 = vector.load %arg7[%23, %c0_15, %c0_16] : memref<18x18x3xbf16, #tpu.memory_space<vmem>>, vector<16x16x3xbf16>
    %25 = arith.index_cast %22 : i32 to index
    %c1_17 = arith.constant 1 : index
    %c0_18 = arith.constant 0 : index
    %26 = vector.load %arg7[%25, %c1_17, %c0_18] : memref<18x18x3xbf16, #tpu.memory_space<vmem>>, vector<16x16x3xbf16>
    %27 = arith.index_cast %22 : i32 to index
    %c2_19 = arith.constant 2 : index
    %c0_20 = arith.constant 0 : index
    %28 = vector.load %arg7[%27, %c2_19, %c0_20] : memref<18x18x3xbf16, #tpu.memory_space<vmem>>, vector<16x16x3xbf16>
    %29 = tpu.concatenate %24, %26, %28 in 2 : vector<16x16x3xbf16>, vector<16x16x3xbf16>, vector<16x16x3xbf16> -> vector<16x16x9xbf16>
    %30 = vector.shape_cast %29 : vector<16x16x9xbf16> to vector<256x9xbf16>
    %c1_21 = arith.constant 1 : index
    %c0_22 = arith.constant 0 : index
    %c0_23 = arith.constant 0 : index
    %31 = vector.load %arg3[%c1_21, %c0_22, %c0_23] : memref<3x9x64xbf16, #tpu.memory_space<vmem>>, vector<1x9x64xbf16>
    %32 = vector.shape_cast %31 : vector<1x9x64xbf16> to vector<9x64xbf16>
    %cst_24 = arith.constant dense<0.000000e+00> : vector<256x64xf32>
    %33 = tpu.matmul %30, %32, %cst_24 {dimension_numbers = #tpu.dot_dimension_numbers<[1], [0], [0], [1], [0, 0, 1, 1], [], []>} : vector<256x9xbf16>, vector<9x64xbf16>, vector<256x64xf32> -> vector<256x64xf32>
    %c0_25 = arith.constant 0 : index
    %c0_26 = arith.constant 0 : index
    %34 = vector.load %arg8[%c0_25, %c0_26] : memref<256x64xf32, #tpu.memory_space<vmem>>, vector<256x64xf32>
    %35 = arith.addf %34, %33 : vector<256x64xf32>
    %c0_27 = arith.constant 0 : index
    %c0_28 = arith.constant 0 : index
    %36 = vector.load %arg8[%c0_27, %c0_28] : memref<256x64xf32, #tpu.memory_space<vmem>>, vector<256x64xf32>
    tpu.vector_store %arg8[%c0_27, %c0_28], %35 {strides = array<i32>} : memref<256x64xf32, #tpu.memory_space<vmem>>, vector<256x64xf32>,
    %c2_i32 = arith.constant 2 : i32
    %37 = arith.addi %8, %c2_i32 : i32
    %38 = arith.index_cast %37 : i32 to index
    %c0_29 = arith.constant 0 : index
    %c0_30 = arith.constant 0 : index
    %39 = vector.load %arg7[%38, %c0_29, %c0_30] : memref<18x18x3xbf16, #tpu.memory_space<vmem>>, vector<16x16x3xbf16>
    %40 = arith.index_cast %37 : i32 to index
    %c1_31 = arith.constant 1 : index
    %c0_32 = arith.constant 0 : index
    %41 = vector.load %arg7[%40, %c1_31, %c0_32] : memref<18x18x3xbf16, #tpu.memory_space<vmem>>, vector<16x16x3xbf16>
    %42 = arith.index_cast %37 : i32 to index
    %c2_33 = arith.constant 2 : index
    %c0_34 = arith.constant 0 : index
    %43 = vector.load %arg7[%42, %c2_33, %c0_34] : memref<18x18x3xbf16, #tpu.memory_space<vmem>>, vector<16x16x3xbf16>
    %44 = tpu.concatenate %39, %41, %43 in 2 : vector<16x16x3xbf16>, vector<16x16x3xbf16>, vector<16x16x3xbf16> -> vector<16x16x9xbf16>
    %45 = vector.shape_cast %44 : vector<16x16x9xbf16> to vector<256x9xbf16>
    %c2_35 = arith.constant 2 : index
    %c0_36 = arith.constant 0 : index
    %c0_37 = arith.constant 0 : index
    %46 = vector.load %arg3[%c2_35, %c0_36, %c0_37] : memref<3x9x64xbf16, #tpu.memory_space<vmem>>, vector<1x9x64xbf16>
    %47 = vector.shape_cast %46 : vector<1x9x64xbf16> to vector<9x64xbf16>
    %cst_38 = arith.constant dense<0.000000e+00> : vector<256x64xf32>
    %48 = tpu.matmul %45, %47, %cst_38 {dimension_numbers = #tpu.dot_dimension_numbers<[1], [0], [0], [1], [0, 0, 1, 1], [], []>} : vector<256x9xbf16>, vector<9x64xbf16>, vector<256x64xf32> -> vector<256x64xf32>
    %c0_39 = arith.constant 0 : index
    %c0_40 = arith.constant 0 : index
    %49 = vector.load %arg8[%c0_39, %c0_40] : memref<256x64xf32, #tpu.memory_space<vmem>>, vector<256x64xf32>
    %50 = arith.addf %49, %48 : vector<256x64xf32>
    %c0_41 = arith.constant 0 : index
    %c0_42 = arith.constant 0 : index
    %51 = vector.load %arg8[%c0_41, %c0_42] : memref<256x64xf32, #tpu.memory_space<vmem>>, vector<256x64xf32>
    tpu.vector_store %arg8[%c0_41, %c0_42], %50 {strides = array<i32>} : memref<256x64xf32, #tpu.memory_space<vmem>>, vector<256x64xf32>,
    %c0_43 = arith.constant 0 : index
    %c0_44 = arith.constant 0 : index
    %52 = vector.load %arg8[%c0_43, %c0_44] : memref<256x64xf32, #tpu.memory_space<vmem>>, vector<256x64xf32>
    %53 = vector.shape_cast %4 : vector<64xf32> to vector<1x64xf32>
    %54 = vector.broadcast %53 : vector<1x64xf32> to vector<256x64xf32>
    %55 = arith.mulf %52, %54 : vector<256x64xf32>
    %56 = vector.shape_cast %6 : vector<64xf32> to vector<1x64xf32>
    %57 = vector.broadcast %56 : vector<1x64xf32> to vector<256x64xf32>
    %58 = arith.addf %55, %57 : vector<256x64xf32>
    %cst_45 = arith.constant 0.000000e+00 : f32
    %59 = vector.broadcast %cst_45 : f32 to vector<256x64xf32>
    %60 = arith.maximumf %58, %59 : vector<256x64xf32>
    %61 = vector.shape_cast %60 : vector<256x64xf32> to vector<16x16x64xf32>
    %62 = arith.truncf %61 : vector<16x16x64xf32> to vector<16x16x64xbf16>
    %c0_46 = arith.constant 0 : index
    %63 = arith.index_cast %8 : i32 to index
    %c0_47 = arith.constant 0 : index
    %c0_48 = arith.constant 0 : index
    %64 = vector.load %arg6[%c0_46, %63, %c0_47, %c0_48] : memref<1x16x16x64xbf16, #tpu.memory_space<vmem>>, vector<1x16x16x64xbf16>
    %65 = vector.shape_cast %64 : vector<1x16x16x64xbf16> to vector<16x16x64xbf16>
    %66 = vector.shape_cast %62 : vector<16x16x64xbf16> to vector<1x16x16x64xbf16>
    tpu.vector_store %arg6[%c0_46, %63, %c0_47, %c0_48], %66 {strides = array<i32>} : memref<1x16x16x64xbf16, #tpu.memory_space<vmem>>, vector<1x16x16x64xbf16>,
    %c1_i32_49 = arith.constant 1 : i32
    return
  }
  func.func @transform_0(%arg0: i32, %arg1: i32) -> (i32, i32, i32, i32) {
    %c0_i32 = arith.constant 0 : i32
    %c0_i32_0 = arith.constant 0 : i32
    %c0_i32_1 = arith.constant 0 : i32
    %c0_i32_2 = arith.constant 0 : i32
    return %arg0, %c0_i32, %c0_i32_0, %c0_i32_1 : i32, i32, i32, i32
  }
  func.func @transform_1(%arg0: i32, %arg1: i32) -> (i32, i32, i32) {
    %c0_i32 = arith.constant 0 : i32
    %c0_i32_0 = arith.constant 0 : i32
    %c0_i32_1 = arith.constant 0 : i32
    return %c0_i32, %c0_i32_0, %arg1 : i32, i32, i32
  }
  func.func @transform_2(%arg0: i32, %arg1: i32) -> (i32, i32) {
    %c0_i32 = arith.constant 0 : i32
    %c0_i32_0 = arith.constant 0 : i32
    return %c0_i32, %arg1 : i32, i32
  }
  func.func @transform_3(%arg0: i32, %arg1: i32) -> (i32, i32) {
    %c0_i32 = arith.constant 0 : i32
    %c0_i32_0 = arith.constant 0 : i32
    return %c0_i32, %arg1 : i32, i32
  }
  func.func @transform_4(%arg0: i32, %arg1: i32) -> (i32, i32, i32, i32) {
    %c0_i32 = arith.constant 0 : i32
    %c0_i32_0 = arith.constant 0 : i32
    %c0_i32_1 = arith.constant 0 : i32
    return %arg0, %c0_i32, %c0_i32_0, %arg1 : i32, i32, i32, i32
  }
}

</mosaic_0001>

<bundles_post_ra>
// kernel: tpu_custom_call.1
= control target key start
LH: loop header
LB: loop body
LE: loop exit
PB: predicated region body
PF: predicated region fallthrough
CT: control target
= control target key end

     0   :  { %9 = vsyncpa [#allocation5], 0  ;;  %s6249_s0 = inlined_call_operand.vmem [shape: bf16[2,16,16,3], index: 0, kind: input, shape index: {}]   ;;  %s6250_s1 = inlined_call_operand.vmem [shape: bf16[3,9,64], index: 1, kind: input, shape index: {}]   ;;  %s6251_s2 = inlined_call_operand.vmem [shape: f32[1,64], index: 2, kind: input, shape index: {}]   ;;  %s6252_s3 = inlined_call_operand.vmem [shape: f32[1,64], index: 3, kind: input, shape index: {}]   ;;  %s6253_s4 = inlined_call_operand.hbm [shape: bf16[2,16,16,64], index: 4, kind: output, shape index: {}]  }
   0x1   :  { %11 = vsyncpa [#allocation5 + $0x1], 0  ;;  %s4719_s15 = smov 0   ;;  %s4721_s16 = smov 0  }
   0x2   :  { %s4723_s17 = smov 0   ;;  %s4725_s18 = smov 0  }
   0x3   :  { %s4727_s19 = smov 0   ;;  %s4729_s20 = smov 0  }
   0x4 LB: > { %s3965_s21 = sadd.s32 4294967295, %s4685_s20   ;;  %s3966_s22 = sadd.s32 4294967294, %s4685_s20   ;;  %s4685_s20 = sphi %s4729_s20, %s17_s20   ;;  %s4681_s19 = sphi %s4727_s19, %s6304_s19   ;;  %s4677_s18 = sphi %s4725_s18, %s6303_s18   ;;  %s4673_s17 = sphi %s4723_s17, %s6302_s17   ;;  %s4669_s16 = sphi %s4721_s16, %s6301_s16   ;;  %s4665_s15 = sphi %s4719_s15, %s6300_s15  }
   0x5   : > { %s29_s23 = sadd.s32 1, %s4681_s19  ;;  %s142_s24 = sadd.s32 1, %s4673_s17 }
   0x6   : > { %p31_p0 = scmp.ge.s32.totalorder %s29_s23, 2  ;;  %p152_p1 = scmp.ne.s32.totalorder %s4673_s17, %s4669_s16 }
   0x7   : > { %p153_p2 = scmp.eq.s32.totalorder %s3965_s21, 1  ;;  %p158_p3 = scmp.ne.s32.totalorder %s4669_s16, %s4665_s15 }
   0x8   : > { %s6306_s23 = smov (%p31_p0, %s29_s23), 0  ;;  %p159_p5 = scmp.eq.s32.totalorder %s3966_s22, 1 }
   0x9   : > { %p4759_p4 = por %p153_p2, %p152_p1  ;;  %s137_s26 = ssub.s32 %s4681_s19, %s6306_s23 }
   0xa   : > { %p3972_p6 = scmp.ge.s32.totalorder %s4685_s20, 1  ;;  %p140_p7 = scmp.eq.s32.totalorder %s137_s26, 0 }
   0xb   : > { %p4766_p8 = por %p159_p5, %p158_p3  ;;  %p204_p9 = scmp.lt.s32.totalorder %s4685_s20, 3 }
   0xc   : > { %s4772_s28 = scalar_select %p140_p7, %s4673_s17, %s142_s24  }
   0xd   : > { %p205_p10 = pnand %p3972_p6, %p204_p9 }
   0xf   : > { %208 = sbr.rel (%p205_p10) target bundleno = 645 (0x285), region = 36 }
  0x14   : > { %vm260_vm0 = vcmask 19456   ;;  %vm263_vm1 = vcmask 16384   ;;  %vm270_vm2 = vsmask.f32 256  ;;  %v4687_v0 = vmov 0   ;;  %p240_p11 = scmp.lt.s32.totalorder %s4677_s18, 1 }
  0x15   : > { %261 = vst.msk [vmem:[#allocation2] sm:$0xf] %vm260_vm0, %v4687_v0  ;;  %262 = vst.msk [vmem:[#allocation2 + $0x4] sm:$0xf] %vm260_vm0, %v4687_v0  ;;  %vm326_vm4 = vsmask.f32 7938 }
  0x16   : > { %264 = vst.msk [vmem:[#allocation2 + $0x8] sm:$0x1] %vm263_vm1, %v4687_v0  ;;  %vm4777_vm3 = vmand %vm263_vm1, %vm270_vm2  ;;  %v302_v2 = vld [vmem:[#allocation2 + $0x78] sm:$0x1]  ;;  %v358_v5 = vld [vmem:[#allocation2 + $0x80] sm:$0x1] }
  0x17   : > { %266 = vst.msk [vmem:[#allocation2 + $0xcc] sm:$0xf] %vm260_vm0, %v4687_v0  ;;  %267 = vst.msk [vmem:[#allocation2 + $0xd0] sm:$0xf] %vm260_vm0, %v4687_v0  ;;  %v303_v4 = vsel %vm4777_vm3, 0, %v302_v2  ;;  %s241_s29 = scalar_select %p240_p11, %s4677_s18, 1 }
  0x18   : > { %268 = vst.msk [vmem:[#allocation2 + $0xd4] sm:$0x1] %vm263_vm1, %v4687_v0  ;;  %vm4785_vm5 = vmand %vm263_vm1, %vm326_vm4  ;;  %v296_v7 = vld [vmem:[#allocation2 + $0x60] sm:$0x1]  ;;  %v352_v8 = vld [vmem:[#allocation2 + $0x68] sm:$0x1] }
  0x19   : > { %304 = vst [vmem:[#allocation2 + $0x78] sm:$0x1] %v303_v4  ;;  %v359_v6 = vsel %vm4785_vm5, 0, %v358_v5  ;;  %v297_v9 = vsel %vm4777_vm3, 0, %v296_v7  ;;  %v353_v10 = vsel %vm4785_vm5, 0, %v352_v8  ;;  %s4214_s30 = sshll.u32 %s241_s29, 7  ;;  %vm4822_vm8 = vmand %vm260_vm0, %vm326_vm4 }
  0x1a   : > { %360 = vst [vmem:[#allocation2 + $0x80] sm:$0x1] %v359_v6  ;;  %v305_v11 = vld [vmem:[#allocation2 + $0x84] sm:$0x1]  ;;  %v361_v12 = vld [vmem:[#allocation2 + $0x8c] sm:$0x1]  ;;  %s4805_s7 = scalar_lea.vmem %s6249_s0, %s4214_s30 }
  0x1b   : > { %298 = vst [vmem:[#allocation2 + $0x60] sm:$0x1] %v297_v9  ;;  %354 = vst [vmem:[#allocation2 + $0x68] sm:$0x1] %v353_v10  ;;  %v306_v13 = vsel %vm4777_vm3, 0, %v305_v11  ;;  %v362_v14 = vsel %vm4785_vm5, 0, %v361_v12 }
  0x1c   : > { %v299_v15 = vld [vmem:[#allocation2 + $0x6c] sm:$0x1]  ;;  %vm414_vm6 = vsmask.f32 4368  ;;  %307 = vst [vmem:[#allocation2 + $0x84] sm:$0x1] %v306_v13 }
  0x1d   : > { %363 = vst [vmem:[#allocation2 + $0x8c] sm:$0x1] %v362_v14  ;;  %v300_v16 = vsel %vm4777_vm3, 0, %v299_v15  ;;  %v400_v17 = vld [vmem:[%s4805_s7 + $0x48] sm:$0xf]  ;;  %vm1321_vm7 = vcmask 1046528   ;;  %vm4828_vm9 = vmor %vm270_vm2, %vm414_vm6 }
  0x1e   : > { %v401_v18 = vld [vmem:[%s4805_s7 + $0x4c] sm:$0xf]  ;;  %v396_v19 = vld [vmem:[%s4805_s7 + $0x38] sm:$0xf]  ;;  %301 = vst [vmem:[#allocation2 + $0x6c] sm:$0x1] %v300_v16 }
  0x1f   : > { %v328_v20 = vld [vmem:[#allocation2 + $0x8] sm:$0x1]  ;;  %v4812_v21 = vld [vmem:[#allocation2 + $0x4] sm:$0xf]  ;;  %v904_v22 = vld [vmem:[#allocation2] sm:$0xe] }
  0x20   : > { %v329_v23 = vsel %vm4785_vm5, 0, %v328_v20  ;;  %v4008_v24 = vcombine.low %v904_v22, %v4812_v21  ;;  %v272_v25 = vld [vmem:[#allocation2] sm:$0x1]  ;;  %v570_v26 = vshrl.u32 %v400_v17, 16  ;;  %v573_v27 = vshll.u32 %v400_v17, 16  ;;  %s4688_s8 = smov 6  }
  0x21   : > { %330 = vst [vmem:[#allocation2 + $0x8] sm:$0x1] %v329_v23  ;;  %v273_v28 = vsel %vm4777_vm3, 0, %v272_v25  ;;  %v578_v29 = vshrl.u32 %v401_v18, 16  ;;  %v581_v30 = vshll.u32 %v401_v18, 16  ;;  %v536_v31 = vshrl.u32 %v396_v19, 16 }
  0x22   : > { %v1322_v32 = vrot.slane %v4008_v24, 1  ;;  %274 = vst [vmem:[#allocation2] sm:$0x1] %v273_v28  ;;  %v572_v33 = vrot.slane %v570_v26, 7  ;;  %v802_v34 = vld [vmem:[#allocation2 + $0x78] sm:$0xf] }
  0x23   : > { %v397_v35 = vld [vmem:[%s4805_s7 + $0x3c] sm:$0xf]  ;;  %v580_v37 = vrot.slane %v578_v29, 7  ;;  %v806_v38 = vld [vmem:[#allocation2 + $0x80] sm:$0x1]  ;;  %v538_v39 = vrot.slane %v536_v31, 7 }
  0x24   : > { %v539_v40 = vshll.u32 %v396_v19, 16  ;;  %v544_v41 = vshrl.u32 %v397_v35, 16  ;;  %v575_v43 = vor.u32 %v573_v27, %v572_v33  ;;  %v576_v44 = vrot.slane %v572_v33, 4  ;;  %v788_v46 = vld [vmem:[#allocation2 + $0x60] sm:$0xf]  ;;  %s4689_s9 = smov 3  }
  0x25   : > { %v547_v45 = vshll.u32 %v397_v35, 16  ;;  %v402_v47 = vld [vmem:[%s4805_s7 + $0x50] sm:$0xf]  ;;  %v583_v48 = vor.u32 %v581_v30, %v580_v37  ;;  %v585_v49 = vrot.slane %v580_v37, 4  ;;  %v542_v51 = vrot.slane %v538_v39, 4  ;;  %s237_s26 = sand.u32 1, %s4669_s16  }
  0x26   : > { %v541_v50 = vor.u32 %v539_v40, %v538_v39  ;;  %v403_v52 = vld [vmem:[%s4805_s7 + $0x54] sm:$0xf]  ;;  %v803_v53 = vsel %vm4822_vm8, %v575_v43, %v802_v34  ;;  %v546_v54 = vrot.slane %v544_v41, 7  ;;  %v587_v55 = vshrl.u32 %v402_v47, 16  ;;  %v792_v61 = vld [vmem:[#allocation2 + $0x68] sm:$0x1] }
  0x27   : > { %v590_v56 = vshll.u32 %v402_v47, 16  ;;  %v355_v57 = vld [vmem:[#allocation2 + $0x74] sm:$0x1]  ;;  %v584_v58 = vsel %vm4828_vm9, %v576_v44, %v583_v48  ;;  %804 = vst [vmem:[#allocation2 + $0x78] sm:$0xf] %v803_v53  ;;  %v807_v59 = vsel %vm4777_vm3, %v585_v49, %v806_v38  ;;  %v595_v62 = vshrl.u32 %v403_v52, 16 }
  0x28   : > { %v789_v60 = vsel %vm4822_vm8, %v541_v50, %v788_v46  ;;  %v398_v63 = vld [vmem:[%s4805_s7 + $0x40] sm:$0xf]  ;;  %v4843_v0 = vld [vmem:[#allocation2 + $0x8] ss:$0 sps:$4 sm:$0x11]   ;;  %v549_v2 = vor.u32 %v547_v45, %v546_v54  ;;  %v551_v4 = vrot.slane %v546_v54, 4 }
  0x29   : > { %805 = vst.msk [vmem:[#allocation2 + $0x7c] sm:$0xf] %vm260_vm0, %v584_v58  ;;  %808 = vst [vmem:[#allocation2 + $0x80] sm:$0x1] %v807_v59  ;;  %v589_v5 = vrot.slane %v587_v55, 7  ;;  %v597_v6 = vrot.slane %v595_v62, 7 }
  0x2a   : > { %790 = vst [vmem:[#allocation2 + $0x60] sm:$0xf] %v789_v60  ;;  %v598_v7 = vshll.u32 %v403_v52, 16  ;;  %v356_v8 = vsel %vm4785_vm5, 0, %v355_v57  ;;  %v399_v9 = vld [vmem:[%s4805_s7 + $0x44] sm:$0xf]  ;;  %v550_v11 = vsel %vm4828_vm9, %v542_v51, %v549_v2  ;;  %v793_v12 = vsel %vm4777_vm3, %v551_v4, %v792_v61 }
  0x2b   : > { %v1323_v10 = vrot.slane %v4843_v0, 1  ;;  %v809_v13 = vld [vmem:[#allocation2 + $0x84] sm:$0xf]  ;;  %v813_v14 = vld [vmem:[#allocation2 + $0x8c] sm:$0x1]  ;;  %v592_v15 = vor.u32 %v590_v56, %v589_v5  ;;  %v593_v16 = vrot.slane %v589_v5, 4 }
  0x2c   : > { %357 = vst [vmem:[#allocation2 + $0x74] sm:$0x1] %v356_v8  ;;  %791 = vst.msk [vmem:[#allocation2 + $0x64] sm:$0xf] %vm260_vm0, %v550_v11  ;;  %v600_v17 = vor.u32 %v598_v7, %v597_v6  ;;  %v602_v18 = vrot.slane %v597_v6, 4  ;;  %v553_v20 = vshrl.u32 %v398_v63, 16 }
  0x2d   : > { %794 = vst [vmem:[#allocation2 + $0x68] sm:$0x1] %v793_v12  ;;  %v1324_v19 = vsel %vm1321_vm7, %v1322_v32, %v1323_v10  ;;  %v556_v22 = vshll.u32 %v398_v63, 16  ;;  %v561_v23 = vshrl.u32 %v399_v9, 16  ;;  %v810_v25 = vsel %vm4822_vm8, %v592_v15, %v809_v13  ;;  %v795_v28 = vld [vmem:[#allocation2 + $0x6c] sm:$0xf] }
  0x2e   : > { %1370 = vrot.lane.b32.xlu0 %v1324_v19, %s4688_s8  ;;  %v601_v24 = vsel %vm4828_vm9, %v593_v16, %v600_v17  ;;  %v814_v26 = vsel %vm4777_vm3, %v602_v18, %v813_v14  ;;  %v564_v27 = vshll.u32 %v399_v9, 16  ;;  %v308_v29 = vld [vmem:[#allocation2 + $0x90] sm:$0x1]  ;;  %v914_v30 = vld [vmem:[#allocation2 + $0x78] sm:$0xe]  ;;  %v555_v31 = vrot.slane %v553_v20, 7 }
  0x2f   : > { %811 = vst [vmem:[#allocation2 + $0x84] sm:$0xf] %v810_v25  ;;  %812 = vst.msk [vmem:[#allocation2 + $0x88] sm:$0xf] %vm260_vm0, %v601_v24  ;;  %v563_v32 = vrot.slane %v561_v23, 7  ;;  %v309_v47 = vsel %vm4777_vm3, 0, %v308_v29 }
  0x30   : > { %815 = vst [vmem:[#allocation2 + $0x8c] sm:$0x1] %v814_v26  ;;  %v364_v33 = vld [vmem:[#allocation2 + $0x98] sm:$0x1]  ;;  %v4864_v34 = vld [vmem:[#allocation2 + $0x7c] sm:$0xf]  ;;  %v558_v41 = vor.u32 %v556_v22, %v555_v31 }
  0x31   : > { %v404_v35 = vld [vmem:[%s4805_s7 + $0x58] sm:$0xf]  ;;  %v405_v37 = vld [vmem:[%s4805_s7 + $0x5c] sm:$0xf]  ;;  %v4018_v39 = vcombine.low %v914_v30, %v4864_v34  ;;  %v912_v40 = vld [vmem:[#allocation2 + $0x60] sm:$0xe]  ;;  %v566_v44 = vor.u32 %v564_v27, %v563_v32 }
  0x32   : > { %v4868_v38 = vld [vmem:[#allocation2 + $0x80] ss:$0 sps:$4 sm:$0x11]   ;;  %v559_v43 = vrot.slane %v555_v31, 4  ;;  %v568_v45 = vrot.slane %v563_v32, 4  ;;  %v365_v48 = vsel %vm4785_vm5, 0, %v364_v33  ;;  %v796_v52 = vsel %vm4822_vm8, %v558_v41, %v795_v28 }
  0x33   : > { %v799_v46 = vld [vmem:[#allocation2 + $0x74] sm:$0x1]  ;;  %v1352_v49 = vrot.slane %v4018_v39, 1  ;;  %v1353_v50 = vrot.slane %v4868_v38, 1  ;;  %v873_v51 = vld [vmem:[#allocation2 + $0x64] sm:$0xf] }
  0x34   : > { %310 = vst [vmem:[#allocation2 + $0x90] sm:$0x1] %v309_v47  ;;  %366 = vst [vmem:[#allocation2 + $0x98] sm:$0x1] %v365_v48  ;;  %v856_v53 = vld [vmem:[#allocation2] sm:$0xf]  ;;  %v4016_v55 = vcombine.low %v912_v40, %v873_v51  ;;  %v567_v56 = vsel %vm4828_vm9, %v559_v43, %v566_v44  ;;  %v800_v57 = vsel %vm4777_vm3, %v568_v45, %v799_v46 }
  0x35   : > { %v4878_v54 = vld [vmem:[#allocation2 + $0x68] ss:$0 sps:$4 sm:$0x11]   ;;  %797 = vst [vmem:[#allocation2 + $0x6c] sm:$0xf] %v796_v52  ;;  %v1354_v58 = vsel %vm1321_vm7, %v1352_v49, %v1353_v50  ;;  %v604_v60 = vshrl.u32 %v404_v35, 16  ;;  %v4891_v5 = vcombine.low %v856_v53, %v4812_v21 }
  0x36   : > { %v872_v59 = vld [vmem:[#allocation2 + $0x60] sm:$0xf]  ;;  %798 = vst.msk [vmem:[#allocation2 + $0x70] sm:$0xf] %vm260_vm0, %v567_v56  ;;  %801 = vst [vmem:[#allocation2 + $0x74] sm:$0x1] %v800_v57  ;;  %1390 = vrot.lane.b32.xlu0 %v1354_v58, %s4688_s8 }
  0x37   : > { %v607_v61 = vshll.u32 %v404_v35, 16  ;;  %v612_v62 = vshrl.u32 %v405_v37, 16  ;;  %v1346_v63 = vrot.slane %v4016_v55, 1  ;;  %v1347_v2 = vrot.slane %v4878_v54, 1  ;;  %v4888_v4 = vld [vmem:[#allocation2 + $0x88] sm:$0xf] }
  0x38   : > { %v915_v6 = vld [vmem:[#allocation2 + $0x84] sm:$0xe]  ;;  %v606_v7 = vrot.slane %v604_v60, 7  ;;  %v4894_v10 = vcombine.low %v872_v59, %v873_v51  ;;  %v4896_v11 = vld [vmem:[#allocation2 + $0x8c] ss:$0 sps:$4 sm:$0x11]  }
  0x39   : > { %v614_v8 = vrot.slane %v612_v62, 7  ;;  %v1348_v9 = vsel %vm1321_vm7, %v1346_v63, %v1347_v2  ;;  %v4019_v12 = vcombine.low %v915_v6, %v4888_v4  ;;  %v615_v13 = vshll.u32 %v405_v37, 16  ;;  %v275_v17 = vld [vmem:[#allocation2 + $0xc] sm:$0x1]  ;;  %v331_v18 = vld [vmem:[#allocation2 + $0x14] sm:$0x1] }
  0x3a   : > { %1386 = vrot.lane.b32.xlu1 %v1348_v9, %s4688_s8  ;;  %v609_v14 = vor.u32 %v607_v61, %v606_v7  ;;  %v610_v15 = vrot.slane %v606_v7, 4  ;;  %v1050_v21 = vshrl.u32 %v4891_v5, 16  ;;  %v1356_v20 = vrot.slane %v4896_v11, 1  ;;  %v382_v25 = vld [vmem:[%s4805_s7] sm:$0xf]  ;;  %s3973_s5 = sshll.u32 %s237_s26, 7 }
  0x3b   : > { %v619_v16 = vrot.slane %v614_v8, 4  ;;  %v1355_v19 = vrot.slane %v4019_v12, 1  ;;  %v617_v22 = vor.u32 %v615_v13, %v614_v8  ;;  %v816_v23 = vld [vmem:[#allocation2 + $0x90] sm:$0xf]  ;;  %v820_v24 = vld [vmem:[#allocation2 + $0x98] sm:$0x1] }
  0x3c   : > { %v874_v26 = vld [vmem:[#allocation2 + $0x6c] sm:$0xf]  ;;  %v817_v28 = vsel %vm4822_vm8, %v609_v14, %v816_v23  ;;  %v1052_v30 = vshll.u32 %v4891_v5, 16  ;;  %v1057_v31 = vshll.u32 %v4843_v0, 16  ;;  %v383_v32 = vld [vmem:[%s4805_s7 + $0x4] sm:$0xf] }
  0x3d   : > { %v913_v27 = vld [vmem:[#allocation2 + $0x6c] sm:$0xe]  ;;  %v821_v29 = vsel %vm4777_vm3, %v619_v16, %v820_v24  ;;  %v1357_v33 = vsel %vm1321_vm7, %v1355_v19, %v1356_v20  ;;  %v875_v35 = vld [vmem:[#allocation2 + $0x70] sm:$0xf]  ;;  %v618_v37 = vsel %vm4828_vm9, %v610_v15, %v617_v22  ;;  %818 = vst [vmem:[#allocation2 + $0x90] sm:$0xf] %v817_v28 }
  0x3e   : > { %822 = vst [vmem:[#allocation2 + $0x98] sm:$0x1] %v821_v29  ;;  %v1148_v39 = vshll.u32 %v4894_v10, 16  ;;  %1392 = vrot.lane.b32.xlu0 %v1357_v33, %s4688_s8  ;;  %v4915_v40 = vcombine.low %v874_v26, %v875_v35  ;;  %v4917_v41 = vld [vmem:[#allocation2 + $0x74] ss:$0 sps:$4 sm:$0x11]   ;;  %v4017_v43 = vcombine.low %v913_v27, %v875_v35 }
  0x3f   : > { %819 = vst.msk [vmem:[#allocation2 + $0x94] sm:$0xf] %vm260_vm0, %v618_v37  ;;  %vm1048_vm10 = vsmask.f32 7424  ;;  %v1054_v0 = vrot.slane %v1052_v30, 1  ;;  %v1059_v44 = vrot.slane %v1057_v31, 1 }
  0x40   : > { %v1153_v45 = vshll.u32 %v4878_v54, 16  ;;  %v276_v46 = vsel %vm4777_vm3, 0, %v275_v17  ;;  %v332_v47 = vsel %vm4785_vm5, 0, %v331_v18  ;;  %v1349_v48 = vrot.slane %v4017_v43, 1  ;;  %v876_v52 = vld [vmem:[#allocation2 + $0x78] sm:$0xf] }
  0x41   : > { %v1350_v49 = vrot.slane %v4917_v41, 1  ;;  %v1055_v50 = vor.u32 %v1054_v0, %v1050_v21  ;;  %277 = vst [vmem:[#allocation2 + $0xc] sm:$0x1] %v276_v46  ;;  %333 = vst [vmem:[#allocation2 + $0x14] sm:$0x1] %v332_v47  ;;  %v417_v51 = vshrl.u32 %v382_v25, 16  ;;  %v4931_v2 = vcombine.low %v876_v52, %v4864_v34 }
  0x42   : > { %v1146_v53 = vshrl.u32 %v4894_v10, 16  ;;  %v1150_v55 = vrot.slane %v1148_v39, 1  ;;  %v420_v56 = vshll.u32 %v382_v25, 16  ;;  %v425_v57 = vshrl.u32 %v383_v32, 16  ;;  %v878_v54 = vld [vmem:[#allocation2 + $0x84] sm:$0xf] }
  0x43   : > { %v1351_v58 = vsel %vm1321_vm7, %v1349_v48, %v1350_v49  ;;  %v419_v59 = vrot.slane %v417_v51, 7  ;;  %v428_v60 = vshll.u32 %v383_v32, 16  ;;  %v1155_v61 = vrot.slane %v1153_v45, 1  ;;  %v311_v32 = vld [vmem:[#allocation2 + $0x9c] sm:$0x1]  ;;  %s6022_s6 = scalar_lea.vmem [#allocation4], %s3973_s5 }
  0x44   : > { %1388 = vrot.lane.b32.xlu1 %v1351_v58, %s4688_s8  ;;  %v427_v62 = vrot.slane %v425_v57, 7  ;;  %v1160_v63 = vshll.u32 %v4915_v40, 16  ;;  %v880_v6 = vld [vmem:[#allocation2 + $0x90] sm:$0xf]  ;;  %v1060_v8 = vsel %vm1048_vm10, %v1055_v50, %v1059_v44  ;;  %v4935_v12 = vcombine.low %v878_v54, %v4888_v4  ;;  %v367_v33 = vld [vmem:[#allocation2 + $0xa4] sm:$0x1] }
  0x45   : > { %v916_v7 = vld [vmem:[#allocation2 + $0x90] sm:$0xe]  ;;  %v422_v9 = vor.u32 %v420_v56, %v419_v59  ;;  %v4479_v14 = vld [vmem:[#allocation2 + $0x98] ss:$0 sps:$4 sm:$0x11]   ;;  %v1151_v15 = vor.u32 %v1150_v55, %v1146_v53  ;;  %v423_v16 = vrot.slane %v419_v59, 4 }
  0x46   : > { %v881_v13 = vld [vmem:[#allocation2 + $0x94] sm:$0xf]  ;;  %v430_v21 = vor.u32 %v428_v60, %v427_v62  ;;  %v432_v18 = vrot.slane %v427_v62, 4  ;;  %v1158_v19 = vshrl.u32 %v4915_v40, 16  ;;  %v1162_v20 = vrot.slane %v1160_v63, 1  ;;  %s4691_s13 = smov [#allocation4]  }
  0x47   : > { %v4020_v17 = vcombine.low %v916_v7, %v881_v13  ;;  %v1359_v34 = vrot.slane %v4479_v14, 1  ;;  %v1165_v24 = vshll.u32 %v4917_v41, 16  ;;  %v4942_v25 = vcombine.low %v880_v6, %v881_v13  ;;  %v406_v43 = vld [vmem:[%s4805_s7 + $0x60] sm:$0xf]  ;;  %v407_v50 = vld [vmem:[%s4805_s7 + $0x64] sm:$0xf] }
  0x48   : > { %1241 = vrot.lane.b32.xlu1 %v1060_v8, %s4689_s9  ;;  %v431_v22 = vsel %vm4828_vm9, %v423_v16, %v430_v21  ;;  %v739_v23 = vld [vmem:[#allocation2 + $0xc] sm:$0xf]  ;;  %v743_v4 = vld [vmem:[#allocation2 + $0x14] sm:$0x1]  ;;  %v1156_v29 = vsel %vm1048_vm10, %v1151_v15, %v1155_v61  ;;  %v1184_v30 = vshll.u32 %v4935_v12, 16  ;;  %v1189_v31 = vshll.u32 %v4896_v11, 16 }
  0x49   : > { %v1358_v26 = vrot.slane %v4020_v17, 1  ;;  %v740_v27 = vsel %vm4822_vm8, %v422_v9, %v739_v23  ;;  %742 = vst.msk [vmem:[#allocation2 + $0x10] sm:$0xf] %vm260_vm0, %v431_v22  ;;  %v744_v28 = vsel %vm4777_vm3, %v432_v18, %v743_v4  ;;  %v1170_v37 = vshrl.u32 %v4931_v2, 16  ;;  %v278_v55 = vld [vmem:[#allocation2 + $0x18] sm:$0x1] }
  0x4a   : > { %741 = vst [vmem:[#allocation2 + $0xc] sm:$0xf] %v740_v27  ;;  %745 = vst [vmem:[#allocation2 + $0x14] sm:$0x1] %v744_v28  ;;  %v1172_v39 = vshll.u32 %v4931_v2, 16  ;;  %v1177_v41 = vshll.u32 %v4868_v38, 16  ;;  %v1163_v0 = vor.u32 %v1162_v20, %v1158_v19 }
  0x4b   : > { %v1360_v35 = vsel %vm1321_vm7, %v1358_v26, %v1359_v34  ;;  %v1167_v44 = vrot.slane %v1165_v24, 1  ;;  %v1182_v45 = vshrl.u32 %v4935_v12, 16  ;;  %v1186_v46 = vrot.slane %v1184_v30, 1  ;;  %v334_v59 = vld [vmem:[#allocation2 + $0x20] sm:$0x1]  ;;  %s4613_s14 = sshll.u32 %s4691_s13, 4  ;;  %s4614_s14 = int_to_ptr.vmem [resolvable:$false] %s4613_s14 }
  0x4c   : > { %1394 = vrot.lane.b32.xlu0 %v1360_v35, %s4688_s8  ;;  %v1174_v11 = vrot.slane %v1172_v39, 1  ;;  %v1179_v47 = vrot.slane %v1177_v41, 1  ;;  %v1196_v48 = vshll.u32 %v4942_v25, 16  ;;  %v1201_v49 = vshll.u32 %v4479_v14, 16  ;;  %v384_v19 = vld [vmem:[%s4805_s7 + $0x8] sm:$0xf] }
  0x4d   : > { %v1194_v51 = vshrl.u32 %v4942_v25, 16  ;;  %v312_v52 = vsel %vm4777_vm3, 0, %v311_v32  ;;  %v368_v38 = vsel %vm4785_vm5, 0, %v367_v33  ;;  %v621_v53 = vshrl.u32 %v406_v43, 16  ;;  %v385_v4 = vld [vmem:[%s4805_s7 + $0xc] sm:$0xf] }
  0x4e   : > { %v1191_v56 = vrot.slane %v1189_v31, 1  ;;  %v1175_v57 = vor.u32 %v1174_v11, %v1170_v37  ;;  %v1198_v54 = vrot.slane %v1196_v48, 1  ;;  %313 = vst [vmem:[#allocation2 + $0x9c] sm:$0x1] %v312_v52  ;;  %369 = vst [vmem:[#allocation2 + $0xa4] sm:$0x1] %v368_v38  ;;  %v1168_v9 = vsel %vm1048_vm10, %v1163_v0, %v1167_v44 }
  0x4f   : > { %v624_v58 = vshll.u32 %v406_v43, 16  ;;  %v1203_v61 = vrot.slane %v1201_v49, 1  ;;  %v623_v62 = vrot.slane %v621_v53, 7  ;;  %v629_v63 = vshrl.u32 %v407_v50, 16  ;;  %v337_v30 = vld [vmem:[#allocation2 + $0x2c] sm:$0x1] }
  0x50   : > { %1257 = vrot.lane.b32.xlu0 %v1156_v29, %s4689_s9  ;;  %v859_v60 = vld [vmem:[#allocation2 + $0x10] sm:$0xf]  ;;  %v632_v6 = vshll.u32 %v407_v50, 16  ;;  %v1187_v13 = vor.u32 %v1186_v46, %v1182_v45  ;;  %v1180_v14 = vsel %vm1048_vm10, %v1175_v57, %v1179_v47  ;;  %v1199_v17 = vor.u32 %v1198_v54, %v1194_v51  ;;  %v281_v29 = vld [vmem:[#allocation2 + $0x24] sm:$0x1]  ;;  %s4615_s21 = scalar_lea.vmem %s4614_s14, 4096 }
  0x51   : > { %v905_v7 = vld [vmem:[#allocation2 + $0xc] sm:$0xe]  ;;  %v4481_v15 = vld [vmem:[#allocation2 + $0x14] ss:$0 sps:$4 sm:$0x11]   ;;  %v626_v18 = vor.u32 %v624_v58, %v623_v62  ;;  %v627_v20 = vrot.slane %v623_v62, 4 }
  0x52   : > { %v858_v8 = vld [vmem:[#allocation2 + $0xc] sm:$0xf]  ;;  %v4009_v16 = vcombine.low %v905_v7, %v859_v60  ;;  %v631_v34 = vrot.slane %v629_v63, 7  ;;  %v279_v22 = vsel %vm4777_vm3, 0, %v278_v55  ;;  %v335_v23 = vsel %vm4785_vm5, 0, %v334_v59 }
  0x53   : > { %v4969_v21 = vcombine.low %v858_v8, %v859_v60  ;;  %v1326_v26 = vrot.slane %v4481_v15, 1  ;;  %280 = vst [vmem:[#allocation2 + $0x18] sm:$0x1] %v279_v22  ;;  %336 = vst [vmem:[#allocation2 + $0x20] sm:$0x1] %v335_v23  ;;  %v1069_v31 = vshll.u32 %v4481_v15, 16  ;;  %v1192_v41 = vsel %vm1048_vm10, %v1187_v13, %v1191_v56 }
  0x54   : > { %v1325_v24 = vrot.slane %v4009_v16, 1  ;;  %1259 = vrot.lane.b32.xlu0 %v1168_v9, %s4689_s9  ;;  %v634_v32 = vor.u32 %v632_v6, %v631_v34  ;;  %v636_v33 = vrot.slane %v631_v34, 4  ;;  %v434_v35 = vshrl.u32 %v384_v19, 16  ;;  %v386_v37 = vld [vmem:[%s4805_s7 + $0x10] sm:$0xf] }
  0x55   : > { %v1062_v27 = vshrl.u32 %v4969_v21, 16  ;;  %v1064_v28 = vshll.u32 %v4969_v21, 16  ;;  %v823_v0 = vld [vmem:[#allocation2 + $0x9c] sm:$0xf]  ;;  %v827_v44 = vld [vmem:[#allocation2 + $0xa4] sm:$0x1]  ;;  %v1204_v55 = vsel %vm1048_vm10, %v1199_v17, %v1203_v61 }
  0x56   : > { %v1327_v39 = vsel %vm1321_vm7, %v1325_v24, %v1326_v26  ;;  %v437_v45 = vshll.u32 %v384_v19, 16  ;;  %v1071_v46 = vrot.slane %v1069_v31, 1  ;;  %v635_v11 = vsel %vm4828_vm9, %v627_v20, %v634_v32  ;;  %v387_v49 = vld [vmem:[%s4805_s7 + $0x14] sm:$0xf]  ;;  %v314_v53 = vld [vmem:[#allocation2 + $0xa8] sm:$0x1] }
  0x57   : > { %v1066_v43 = vrot.slane %v1064_v28, 1  ;;  %1372 = vrot.lane.b32.xlu1 %v1327_v39, %s4688_s8  ;;  %v824_v47 = vsel %vm4822_vm8, %v626_v18, %v823_v0  ;;  %v828_v48 = vsel %vm4777_vm3, %v636_v33, %v827_v44  ;;  %826 = vst.msk [vmem:[#allocation2 + $0xa0] sm:$0xf] %vm260_vm0, %v635_v11  ;;  %v436_v51 = vrot.slane %v434_v35, 7  ;;  %v370_v58 = vld [vmem:[#allocation2 + $0xb0] sm:$0x1] }
  0x58   : > { %1261 = vrot.lane.b32.xlu0 %v1180_v14, %s4689_s9  ;;  %825 = vst [vmem:[#allocation2 + $0x9c] sm:$0xf] %v824_v47  ;;  %829 = vst [vmem:[#allocation2 + $0xa4] sm:$0x1] %v828_v48  ;;  %v442_v52 = vshrl.u32 %v385_v4, 16  ;;  %v445_v38 = vshll.u32 %v385_v4, 16 }
  0x59   : > { %v1067_v50 = vor.u32 %v1066_v43, %v1062_v27  ;;  %v282_v56 = vsel %vm4777_vm3, 0, %v281_v29  ;;  %v338_v57 = vsel %vm4785_vm5, 0, %v337_v30  ;;  %v451_v54 = vshrl.u32 %v386_v37, 16  ;;  %v408_v6 = vld [vmem:[%s4805_s7 + $0x68] sm:$0xf] }
  0x5a   : > { %v439_v59 = vor.u32 %v437_v45, %v436_v51  ;;  %v440_v60 = vrot.slane %v436_v51, 4  ;;  %v444_v62 = vrot.slane %v442_v52, 7  ;;  %283 = vst [vmem:[#allocation2 + $0x24] sm:$0x1] %v282_v56  ;;  %339 = vst [vmem:[#allocation2 + $0x2c] sm:$0x1] %v338_v57 }
  0x5b   : > { %v454_v63 = vshll.u32 %v386_v37, 16  ;;  %1263 = vrot.lane.b32.xlu1 %v1192_v41, %s4689_s9  ;;  %v1072_v7 = vsel %vm1048_vm10, %v1067_v50, %v1071_v46  ;;  %v746_v61 = vld [vmem:[#allocation2 + $0x18] sm:$0xf]  ;;  %v750_v8 = vld [vmem:[#allocation2 + $0x20] sm:$0x1]  ;;  %v453_v9 = vrot.slane %v451_v54, 7 }
  0x5c   : > { %v459_v13 = vshrl.u32 %v387_v49, 16  ;;  %1265 = vrot.lane.b32.xlu0 %v1204_v55, %s4689_s9  ;;  %v447_v14 = vor.u32 %v445_v38, %v444_v62  ;;  %v449_v15 = vrot.slane %v444_v62, 4  ;;  %v747_v16 = vsel %vm4822_vm8, %v439_v59, %v746_v61  ;;  %v409_v11 = vld [vmem:[%s4805_s7 + $0x6c] sm:$0xf]  ;;  %v317_v51 = vld [vmem:[#allocation2 + $0xb4] sm:$0x1] }
  0x5d   : > { %v462_v17 = vshll.u32 %v387_v49, 16  ;;  %748 = vst [vmem:[#allocation2 + $0x18] sm:$0xf] %v747_v16  ;;  %v457_v18 = vrot.slane %v453_v9, 4  ;;  %v315_v20 = vsel %vm4777_vm3, 0, %v314_v53  ;;  %v371_v23 = vsel %vm4785_vm5, 0, %v370_v58 }
  0x5e   : > { %v461_v19 = vrot.slane %v459_v13, 7  ;;  %v448_v34 = vsel %vm4828_vm9, %v440_v60, %v447_v14  ;;  %v751_v22 = vsel %vm4777_vm3, %v449_v15, %v750_v8  ;;  %316 = vst [vmem:[#allocation2 + $0xa8] sm:$0x1] %v315_v20  ;;  %v638_v4 = vshrl.u32 %v408_v6, 16  ;;  %v883_v26 = vld [vmem:[#allocation2 + $0xa0] sm:$0xf] }
  0x5f   : > { %1243 = vrot.lane.b32.xlu1 %v1072_v7, %s4689_s9  ;;  %v882_v24 = vld [vmem:[#allocation2 + $0x9c] sm:$0xf]  ;;  %749 = vst.msk [vmem:[#allocation2 + $0x1c] sm:$0xf] %vm260_vm0, %v448_v34  ;;  %752 = vst [vmem:[#allocation2 + $0x20] sm:$0x1] %v751_v22  ;;  %v456_v27 = vor.u32 %v454_v63, %v453_v9 }
  0x60   : > { %v464_v28 = vor.u32 %v462_v17, %v461_v19  ;;  %372 = vst [vmem:[#allocation2 + $0xb0] sm:$0x1] %v371_v23  ;;  %v5014_v29 = vcombine.low %v882_v24, %v883_v26  ;;  %v4485_v30 = vld [vmem:[#allocation2 + $0xa4] ss:$0 sps:$4 sm:$0x11]   ;;  %v466_v32 = vrot.slane %v461_v19, 4 }
  0x61   : > { %v917_v31 = vld [vmem:[#allocation2 + $0x9c] sm:$0xe]  ;;  %v753_v37 = vld [vmem:[#allocation2 + $0x24] sm:$0xf]  ;;  %v757_v39 = vld [vmem:[#allocation2 + $0x2c] sm:$0x1] }
  0x62   : > { %v4021_v33 = vcombine.low %v917_v31, %v883_v26  ;;  %v465_v35 = vsel %vm4828_vm9, %v457_v18, %v464_v28  ;;  %v640_v41 = vrot.slane %v638_v4, 7  ;;  %v641_v43 = vshll.u32 %v408_v6, 16  ;;  %v373_v52 = vld [vmem:[#allocation2 + $0xbc] sm:$0x1]  ;;  %v410_v59 = vld [vmem:[%s4805_s7 + $0x70] sm:$0xf] }
  0x63   : > { %v1206_v0 = vshrl.u32 %v5014_v29, 16  ;;  %v1208_v44 = vshll.u32 %v5014_v29, 16  ;;  %v1213_v45 = vshll.u32 %v4485_v30, 16  ;;  %v1362_v46 = vrot.slane %v4485_v30, 1  ;;  %756 = vst.msk [vmem:[#allocation2 + $0x28] sm:$0xf] %vm260_vm0, %v465_v35 }
  0x64   : > { %v1361_v47 = vrot.slane %v4021_v33, 1  ;;  %v754_v48 = vsel %vm4822_vm8, %v456_v27, %v753_v37  ;;  %v758_v49 = vsel %vm4777_vm3, %v466_v32, %v757_v39  ;;  %v643_v50 = vor.u32 %v641_v43, %v640_v41  ;;  %v860_v55 = vld [vmem:[#allocation2 + $0x18] sm:$0xf]  ;;  %v411_v28 = vld [vmem:[%s4805_s7 + $0x74] sm:$0xf] }
  0x65   : > { %v1210_v38 = vrot.slane %v1208_v44, 1  ;;  %v1215_v53 = vrot.slane %v1213_v45, 1  ;;  %v906_v56 = vld [vmem:[#allocation2 + $0x18] sm:$0xe]  ;;  %755 = vst [vmem:[#allocation2 + $0x24] sm:$0xf] %v754_v48 }
  0x66   : > { %759 = vst [vmem:[#allocation2 + $0x2c] sm:$0x1] %v758_v49  ;;  %v1363_v57 = vsel %vm1321_vm7, %v1361_v47, %v1362_v46  ;;  %v646_v54 = vshrl.u32 %v409_v11, 16  ;;  %v830_v58 = vld [vmem:[#allocation2 + $0xa8] sm:$0xf]  ;;  %v644_v63 = vrot.slane %v640_v41, 4 }
  0x67   : > { %v1211_v60 = vor.u32 %v1210_v38, %v1206_v0  ;;  %1396 = vrot.lane.b32.xlu0 %v1363_v57, %s4688_s8  ;;  %v861_v62 = vld [vmem:[#allocation2 + $0x1c] sm:$0xf]  ;;  %v649_v6 = vshll.u32 %v409_v11, 16  ;;  %v831_v7 = vsel %vm4822_vm8, %v643_v50, %v830_v58  ;;  %v4488_v8 = vld [vmem:[#allocation2 + $0x20] ss:$0 sps:$4 sm:$0x11]  }
  0x68   : > { %v5031_v61 = vcombine.low %v860_v55, %v861_v62  ;;  %v4010_v9 = vcombine.low %v906_v56, %v861_v62  ;;  %v648_v13 = vrot.slane %v646_v54, 7  ;;  %832 = vst [vmem:[#allocation2 + $0xa8] sm:$0xf] %v831_v7  ;;  %v318_v14 = vsel %vm4777_vm3, 0, %v317_v51  ;;  %v834_v16 = vld [vmem:[#allocation2 + $0xb0] sm:$0x1] }
  0x69   : > { %v1216_v15 = vsel %vm1048_vm10, %v1211_v60, %v1215_v53  ;;  %319 = vst [vmem:[#allocation2 + $0xb4] sm:$0x1] %v318_v14  ;;  %v374_v17 = vsel %vm4785_vm5, 0, %v373_v52  ;;  %v655_v18 = vshrl.u32 %v410_v59, 16  ;;  %v658_v19 = vshll.u32 %v410_v59, 16 }
  0x6a   : > { %1267 = vrot.lane.b32.xlu1 %v1216_v15, %s4689_s9  ;;  %v1074_v20 = vshrl.u32 %v5031_v61, 16  ;;  %v1076_v34 = vshll.u32 %v5031_v61, 16  ;;  %v1081_v22 = vshll.u32 %v4488_v8, 16  ;;  %v1328_v23 = vrot.slane %v4010_v9, 1  ;;  %v863_v4 = vld [vmem:[#allocation2 + $0x28] sm:$0xf] }
  0x6b   : > { %375 = vst [vmem:[#allocation2 + $0xbc] sm:$0x1] %v374_v17  ;;  %v1329_v24 = vrot.slane %v4488_v8, 1  ;;  %v651_v26 = vor.u32 %v649_v6, %v648_v13  ;;  %v653_v27 = vrot.slane %v648_v13, 4  ;;  %v5042_v30 = vrot.slane %v655_v18, 7 }
  0x6c   : > { %v1078_v31 = vrot.slane %v1076_v34, 1  ;;  %v1083_v32 = vrot.slane %v1081_v22, 1  ;;  %v862_v33 = vld [vmem:[#allocation2 + $0x24] sm:$0xf]  ;;  %v284_v11 = vld [vmem:[#allocation2 + $0x30] sm:$0x1] }
  0x6d   : > { %v1330_v35 = vsel %vm1321_vm7, %v1328_v23, %v1329_v24  ;;  %v5045_v37 = vcombine.low %v862_v33, %v863_v4  ;;  %v4491_v39 = vld [vmem:[#allocation2 + $0x2c] ss:$0 sps:$4 sm:$0x11]   ;;  %v652_v41 = vsel %vm4828_vm9, %v644_v63, %v651_v26  ;;  %v835_v43 = vsel %vm4777_vm3, %v653_v27, %v834_v16  ;;  %v907_v0 = vld [vmem:[#allocation2 + $0x24] sm:$0xe] }
  0x6e   : > { %v1079_v44 = vor.u32 %v1078_v31, %v1074_v20  ;;  %1374 = vrot.lane.b32.xlu0 %v1330_v35, %s4688_s8  ;;  %833 = vst.msk [vmem:[#allocation2 + $0xac] sm:$0xf] %vm260_vm0, %v652_v41  ;;  %836 = vst [vmem:[#allocation2 + $0xb0] sm:$0x1] %v835_v43  ;;  %v4011_v45 = vcombine.low %v907_v0, %v863_v4  ;;  %v660_v46 = vor.u32 %v658_v19, %v5042_v30  ;;  %v340_v47 = vld [vmem:[#allocation2 + $0x38] sm:$0x1] }
  0x6f   : > { %v1086_v48 = vshrl.u32 %v5045_v37, 16  ;;  %v1088_v49 = vshll.u32 %v5045_v37, 16  ;;  %v1093_v50 = vshll.u32 %v4491_v39, 16  ;;  %v388_v51 = vld [vmem:[%s4805_s7 + $0x18] sm:$0xf]  ;;  %v663_v38 = vshrl.u32 %v411_v28, 16 }
  0x70   : > { %v1084_v52 = vsel %vm1048_vm10, %v1079_v44, %v1083_v32  ;;  %v666_v53 = vshll.u32 %v411_v28, 16  ;;  %v389_v55 = vld [vmem:[%s4805_s7 + $0x1c] sm:$0xf]  ;;  %v884_v58 = vld [vmem:[#allocation2 + $0xa8] sm:$0xf]  ;;  %v1332_v59 = vrot.slane %v4491_v39, 1 }
  0x71   : > { %v287_v56 = vld [vmem:[#allocation2 + $0x3c] sm:$0x1]  ;;  %1245 = vrot.lane.b32.xlu1 %v1084_v52, %s4689_s9  ;;  %v1090_v57 = vrot.slane %v1088_v49, 1  ;;  %v1095_v54 = vrot.slane %v1093_v50, 1  ;;  %v661_v60 = vrot.slane %v5042_v30, 4  ;;  %v1331_v63 = vrot.slane %v4011_v45, 1 }
  0x72   : > { %v837_v62 = vld [vmem:[#allocation2 + $0xb4] sm:$0xf]  ;;  %v918_v6 = vld [vmem:[#allocation2 + $0xa8] sm:$0xe]  ;;  %v665_v7 = vrot.slane %v663_v38, 7  ;;  %v285_v9 = vsel %vm4777_vm3, 0, %v284_v11 }
  0x73   : > { %v838_v8 = vsel %vm4822_vm8, %v660_v46, %v837_v62  ;;  %v343_v13 = vld [vmem:[#allocation2 + $0x44] sm:$0x1]  ;;  %v1091_v14 = vor.u32 %v1090_v57, %v1086_v48  ;;  %v841_v15 = vld [vmem:[#allocation2 + $0xbc] sm:$0x1]  ;;  %286 = vst [vmem:[#allocation2 + $0x30] sm:$0x1] %v285_v9  ;;  %v1333_v41 = vsel %vm1321_vm7, %v1331_v63, %v1332_v59 }
  0x74   : > { %839 = vst [vmem:[#allocation2 + $0xb4] sm:$0xf] %v838_v8  ;;  %v341_v16 = vsel %vm4785_vm5, 0, %v340_v47  ;;  %v468_v17 = vshrl.u32 %v388_v51, 16  ;;  %v471_v18 = vshll.u32 %v388_v51, 16  ;;  %v668_v19 = vor.u32 %v666_v53, %v665_v7 }
  0x75   : > { %v670_v20 = vrot.slane %v665_v7, 4  ;;  %342 = vst [vmem:[#allocation2 + $0x38] sm:$0x1] %v341_v16  ;;  %v476_v34 = vshrl.u32 %v389_v55, 16  ;;  %v479_v22 = vshll.u32 %v389_v55, 16  ;;  %v1096_v24 = vsel %vm1048_vm10, %v1091_v14, %v1095_v54 }
  0x76   : > { %v390_v23 = vld [vmem:[%s4805_s7 + $0x20] sm:$0xf]  ;;  %v1713_v4 = vld [vmem:[#allocation2 + $0xc] sm:$0xf]  ;;  %v470_v27 = vrot.slane %v468_v17, 7  ;;  %v288_v28 = vsel %vm4777_vm3, 0, %v287_v56  ;;  %1247 = vrot.lane.b32.xlu1 %v1096_v24, %s4689_s9  ;;  %v669_v33 = vsel %vm4828_vm9, %v661_v60, %v668_v19 }
  0x77   : > { %v885_v26 = vld [vmem:[#allocation2 + $0xac] sm:$0xf]  ;;  %v4493_v31 = vld [vmem:[#allocation2 + $0xb0] ss:$0 sps:$4 sm:$0x11]   ;;  %v842_v35 = vsel %vm4777_vm3, %v670_v20, %v841_v15  ;;  %v478_v0 = vrot.slane %v476_v34, 7 }
  0x78   : > { %v5072_v30 = vcombine.low %v884_v58, %v885_v26  ;;  %v4022_v32 = vcombine.low %v918_v6, %v885_v26  ;;  %289 = vst [vmem:[#allocation2 + $0x3c] sm:$0x1] %v288_v28  ;;  %v5078_v39 = vld [vmem:[#allocation2 + $0x10] sm:$0xf]  ;;  %840 = vst.msk [vmem:[#allocation2 + $0xb8] sm:$0xf] %vm260_vm0, %v669_v33  ;;  %v473_v47 = vor.u32 %v471_v18, %v470_v27 }
  0x79   : > { %843 = vst [vmem:[#allocation2 + $0xbc] sm:$0x1] %v842_v35  ;;  %v474_v43 = vrot.slane %v470_v27, 4  ;;  %v344_v44 = vsel %vm4785_vm5, 0, %v343_v13  ;;  %v1225_v11 = vshll.u32 %v4493_v31, 16  ;;  %v481_v48 = vor.u32 %v479_v22, %v478_v0 }
  0x7a   : > { %v1218_v45 = vshrl.u32 %v5072_v30, 16  ;;  %v1220_v46 = vshll.u32 %v5072_v30, 16  ;;  %345 = vst [vmem:[#allocation2 + $0x44] sm:$0x1] %v344_v44  ;;  %v483_v49 = vrot.slane %v478_v0, 4  ;;  %v485_v51 = vshrl.u32 %v390_v23, 16  ;;  %1376 = vrot.lane.b32.xlu1 %v1333_v41, %s4688_s8 }
  0x7b   : > { %v391_v50 = vld [vmem:[%s4805_s7 + $0x24] sm:$0xf]  ;;  %v5088_v52 = vcombine.low %v1713_v4, %v5078_v39  ;;  %v5090_v38 = vld [vmem:[#allocation2 + $0x14] ss:$0 sps:$4 sm:$0x11]   ;;  %v1227_v56 = vrot.slane %v1225_v11, 1  ;;  %v482_v59 = vsel %vm4828_vm9, %v474_v43, %v481_v48 }
  0x7c   : > { %v5092_v53 = vld [vmem:[#allocation2 + $0xc] sm:$0xe]  ;;  %v1222_v55 = vrot.slane %v1220_v46, 1  ;;  %v1364_v57 = vrot.slane %v4022_v32, 1  ;;  %v1365_v54 = vrot.slane %v4493_v31, 1  ;;  %v487_v63 = vrot.slane %v485_v51, 7 }
  0x7d   : > { %v886_v58 = vld [vmem:[#allocation2 + $0xb4] sm:$0xf]  ;;  %v760_v60 = vld [vmem:[#allocation2 + $0x30] sm:$0xf]  ;;  %v764_v62 = vld [vmem:[#allocation2 + $0x38] sm:$0x1]  ;;  %v4073_v19 = vcombine.low %v5092_v53, %v5078_v39 }
  0x7e   : > { %v488_v6 = vshll.u32 %v390_v23, 16  ;;  %v1223_v7 = vor.u32 %v1222_v55, %v1218_v45  ;;  %v919_v8 = vld [vmem:[#allocation2 + $0xb4] sm:$0xe]  ;;  %v761_v9 = vsel %vm4822_vm8, %v473_v47, %v760_v60  ;;  %763 = vst.msk [vmem:[#allocation2 + $0x34] sm:$0xf] %vm260_vm0, %v482_v59  ;;  %v765_v13 = vsel %vm4777_vm3, %v483_v49, %v764_v62 }
  0x7f   : > { %v493_v14 = vshrl.u32 %v391_v50, 16  ;;  %762 = vst [vmem:[#allocation2 + $0x30] sm:$0xf] %v761_v9  ;;  %766 = vst [vmem:[#allocation2 + $0x38] sm:$0x1] %v765_v13  ;;  %v491_v16 = vrot.slane %v487_v63, 4  ;;  %v1366_v23 = vsel %vm1321_vm7, %v1364_v57, %v1365_v54 }
  0x80   : > { %v490_v15 = vor.u32 %v488_v6, %v487_v63  ;;  %v496_v17 = vshll.u32 %v391_v50, 16  ;;  %v767_v18 = vld [vmem:[#allocation2 + $0x3c] sm:$0xf]  ;;  %v1715_v20 = vld [vmem:[#allocation2 + $0x18] sm:$0xf]  ;;  %v1228_v22 = vsel %vm1048_vm10, %v1223_v7, %v1227_v56  ;;  %v1908_v26 = vshll.u32 %v5088_v52, 16 }
  0x81   : > { %v5104_v34 = vld [vmem:[#allocation2 + $0x1c] sm:$0xf]  ;;  %v887_v4 = vld [vmem:[#allocation2 + $0xb8] sm:$0xf]  ;;  %v495_v24 = vrot.slane %v493_v14, 7  ;;  %1269 = vrot.lane.b32.xlu0 %v1228_v22, %s4689_s9  ;;  %v1913_v35 = vshll.u32 %v5090_v38, 16 }
  0x82   : > { %v5110_v27 = vcombine.low %v886_v58, %v887_v4  ;;  %v4496_v28 = vld [vmem:[#allocation2 + $0xbc] ss:$0 sps:$4 sm:$0x11]   ;;  %v4023_v31 = vcombine.low %v919_v8, %v887_v4  ;;  %v768_v32 = vsel %vm4822_vm8, %v490_v15, %v767_v18  ;;  %v771_v33 = vld [vmem:[#allocation2 + $0x44] sm:$0x1]  ;;  %v1906_v43 = vshrl.u32 %v5088_v52, 16 }
  0x83   : > { %v498_v39 = vor.u32 %v496_v17, %v495_v24  ;;  %v500_v41 = vrot.slane %v495_v24, 4  ;;  %769 = vst [vmem:[#allocation2 + $0x3c] sm:$0xf] %v768_v32  ;;  %v1910_v0 = vrot.slane %v1908_v26, 1  ;;  %v1237_v46 = vshll.u32 %v4496_v28, 16 }
  0x84   : > { %v1230_v44 = vshrl.u32 %v5110_v27, 16  ;;  %v1232_v45 = vshll.u32 %v5110_v27, 16  ;;  %v1367_v11 = vrot.slane %v4023_v31, 1  ;;  %v1368_v47 = vrot.slane %v4496_v28, 1  ;;  %v1762_v51 = vld [vmem:[#allocation2 + $0x18] sm:$0xe] }
  0x85   : > { %v499_v48 = vsel %vm4828_vm9, %v491_v16, %v498_v39  ;;  %v772_v49 = vsel %vm4777_vm3, %v500_v41, %v771_v33  ;;  %v5123_v50 = vcombine.low %v1715_v20, %v5104_v34  ;;  %1398 = vrot.lane.b32.xlu0 %v1366_v23, %s4688_s8  ;;  %v1239_v55 = vrot.slane %v1237_v46, 1  ;;  %v865_v56 = vld [vmem:[#allocation2 + $0x34] sm:$0xf]  ;;  %v5127_v54 = vld [vmem:[#allocation2 + $0x20] ss:$0 sps:$4 sm:$0x11]  }
  0x86   : > { %v1234_v53 = vrot.slane %v1232_v45, 1  ;;  %770 = vst.msk [vmem:[#allocation2 + $0x40] sm:$0xf] %vm260_vm0, %v499_v48  ;;  %773 = vst [vmem:[#allocation2 + $0x44] sm:$0x1] %v772_v49  ;;  %v1915_v57 = vrot.slane %v1913_v35, 1  ;;  %v1369_v59 = vsel %vm1321_vm7, %v1367_v11, %v1368_v47  ;;  %v1911_v63 = vor.u32 %v1910_v0, %v1906_v43 }
  0x87   : > { %v1717_v58 = vld [vmem:[#allocation2 + $0x24] sm:$0xf]  ;;  %v864_v60 = vld [vmem:[#allocation2 + $0x30] sm:$0xf]  ;;  %v290_v13 = vld [vmem:[#allocation2 + $0x48] sm:$0x1]  ;;  %v4074_v18 = vcombine.low %v1762_v51, %v5104_v34 }
  0x88   : > { %v908_v62 = vld [vmem:[#allocation2 + $0x30] sm:$0xe]  ;;  %v1235_v6 = vor.u32 %v1234_v53, %v1230_v44  ;;  %v5130_v7 = vcombine.low %v864_v60, %v865_v56  ;;  %v4499_v8 = vld [vmem:[#allocation2 + $0x38] ss:$0 sps:$4 sm:$0x11]   ;;  %v2177_v15 = vrot.slane %v4073_v19, 1  ;;  %v1916_v32 = vsel %vm1048_vm10, %v1911_v63, %v1915_v57 }
  0x89   : > { %v4012_v9 = vcombine.low %v908_v62, %v865_v56  ;;  %v5132_v14 = vld [vmem:[#allocation2 + $0x28] sm:$0xf]  ;;  %v2178_v16 = vrot.slane %v5090_v38, 1  ;;  %v1920_v17 = vshll.u32 %v5123_v50, 16  ;;  %v346_v20 = vld [vmem:[#allocation2 + $0x50] sm:$0x1]  ;;  %1400 = vrot.lane.b32.xlu0 %v1369_v59, %s4688_s8 }
  0x8a   : > { %v1240_v22 = vsel %vm1048_vm10, %v1235_v6, %v1239_v55  ;;  %v1098_v23 = vshrl.u32 %v5130_v7, 16  ;;  %v1100_v4 = vshll.u32 %v5130_v7, 16  ;;  %v1105_v24 = vshll.u32 %v4499_v8, 16  ;;  %v392_v26 = vld [vmem:[%s4805_s7 + $0x28] sm:$0xf] }
  0x8b   : > { %v393_v28 = vld [vmem:[%s4805_s7 + $0x2c] sm:$0xf]  ;;  %1271 = vrot.lane.b32.xlu1 %v1240_v22, %s4689_s9  ;;  %v1334_v19 = vrot.slane %v4012_v9, 1  ;;  %v1335_v38 = vrot.slane %v4499_v8, 1  ;;  %v866_v31 = vld [vmem:[#allocation2 + $0x3c] sm:$0xf]  ;;  %v5146_v33 = vcombine.low %v1717_v58, %v5132_v14  ;;  %v2179_v45 = vsel %vm1321_vm7, %v2177_v15, %v2178_v16 }
  0x8c   : > { %v909_v34 = vld [vmem:[#allocation2 + $0x3c] sm:$0xe]  ;;  %v1102_v35 = vrot.slane %v1100_v4, 1  ;;  %v1107_v39 = vrot.slane %v1105_v24, 1  ;;  %v1918_v41 = vshrl.u32 %v5123_v50, 16  ;;  %v1925_v43 = vshll.u32 %v5127_v54, 16 }
  0x8d   : > { %6276 = vst [vmem:[#allocation7_spill] sm:$0xff] %v5146_v33  ;;  %v1336_v0 = vsel %vm1321_vm7, %v1334_v19, %v1335_v38  ;;  %v867_v44 = vld [vmem:[#allocation2 + $0x40] sm:$0xf]  ;;  %v291_v46 = vsel %vm4777_vm3, 0, %v290_v13  ;;  %v347_v11 = vsel %vm4785_vm5, 0, %v346_v20  ;;  %v1922_v53 = vrot.slane %v1920_v17, 1 }
  0x8e   : > { %v1103_v47 = vor.u32 %v1102_v35, %v1098_v23  ;;  %1378 = vrot.lane.b32.xlu0 %v1336_v0, %s4688_s8  ;;  %v5157_v48 = vcombine.low %v866_v31, %v867_v44  ;;  %v4502_v49 = vld [vmem:[#allocation2 + $0x44] ss:$0 sps:$4 sm:$0x11]   ;;  %v4013_v51 = vcombine.low %v909_v34, %v867_v44  ;;  %292 = vst [vmem:[#allocation2 + $0x48] sm:$0x1] %v291_v46  ;;  %v2180_v56 = vrot.slane %v4074_v18, 1 }
  0x8f   : > { %348 = vst [vmem:[#allocation2 + $0x50] sm:$0x1] %v347_v11  ;;  %v293_v55 = vld [vmem:[#allocation2 + $0x54] sm:$0x1]  ;;  %v502_v57 = vshrl.u32 %v392_v26, 16  ;;  %v505_v58 = vshll.u32 %v392_v26, 16 }
  0x90   : > { %v510_v59 = vshrl.u32 %v393_v28, 16  ;;  %v1108_v60 = vsel %vm1048_vm10, %v1103_v47, %v1107_v39  ;;  %v1110_v62 = vshrl.u32 %v5157_v48, 16  ;;  %v1112_v63 = vshll.u32 %v5157_v48, 16  ;;  %v349_v8 = vld [vmem:[#allocation2 + $0x5c] sm:$0x1] }
  0x91   : > { %v1117_v6 = vshll.u32 %v4502_v49, 16  ;;  %1249 = vrot.lane.b32.xlu1 %v1108_v60, %s4689_s9  ;;  %v1337_v9 = vrot.slane %v4013_v51, 1  ;;  %v2181_v13 = vrot.slane %v5127_v54, 1  ;;  %v504_v15 = vrot.slane %v502_v57, 7  ;;  %v394_v17 = vld [vmem:[%s4805_s7 + $0x30] sm:$0xf] }
  0x92   : > { %v512_v16 = vrot.slane %v510_v59, 7  ;;  %v1114_v18 = vrot.slane %v1112_v63, 1  ;;  %2097 = vrot.lane.b32.xlu0 %v1916_v32, %s4689_s9  ;;  %v513_v22 = vshll.u32 %v393_v28, 16  ;;  %v294_v23 = vsel %vm4777_vm3, 0, %v293_v55  ;;  %v395_v4 = vld [vmem:[%s4805_s7 + $0x34] sm:$0xf] }
  0x93   : > { %v1119_v20 = vrot.slane %v1117_v6, 1  ;;  %v1338_v24 = vrot.slane %v4502_v49, 1  ;;  %v507_v26 = vor.u32 %v505_v58, %v504_v15  ;;  %v508_v19 = vrot.slane %v504_v15, 4  ;;  %295 = vst [vmem:[#allocation2 + $0x54] sm:$0x1] %v294_v23 }
  0x94   : > { %v517_v38 = vrot.slane %v512_v16, 4  ;;  %v1115_v31 = vor.u32 %v1114_v18, %v1110_v62  ;;  %v515_v34 = vor.u32 %v513_v22, %v512_v16  ;;  %v350_v35 = vsel %vm4785_vm5, 0, %v349_v8  ;;  %v5179_v51 = vld [vmem:[#allocation2 + $0x2c] ss:$0 sps:$4 sm:$0x11]  }
  0x95   : > { %v519_v39 = vshrl.u32 %v394_v17, 16  ;;  %v774_v0 = vld [vmem:[#allocation2 + $0x48] sm:$0xf]  ;;  %351 = vst [vmem:[#allocation2 + $0x5c] sm:$0x1] %v350_v35  ;;  %v522_v32 = vshll.u32 %v394_v17, 16  ;;  %v2182_v55 = vsel %vm1321_vm7, %v2180_v56, %v2181_v13  ;;  %v1339_v59 = vsel %vm1321_vm7, %v1337_v9, %v1338_v24 }
  0x96   : > { %v778_v44 = vld [vmem:[#allocation2 + $0x50] sm:$0x1]  ;;  %v527_v28 = vshrl.u32 %v395_v4, 16  ;;  %v1120_v46 = vsel %vm1048_vm10, %v1115_v31, %v1119_v20  ;;  %2225 = vrot.lane.b32.xlu0 %v2179_v45, %s4688_s8  ;;  %v516_v11 = vsel %vm4828_vm9, %v508_v19, %v515_v34  ;;  %v775_v47 = vsel %vm4822_vm8, %v507_v26, %v774_v0  ;;  %v2625_v6 = vld [vmem:[#allocation2 + $0x18] sm:$0xf] }
  0x97   : > { %v779_v49 = vsel %vm4777_vm3, %v517_v38, %v778_v44  ;;  %1251 = vrot.lane.b32.xlu1 %v1120_v46, %s4689_s9  ;;  %776 = vst [vmem:[#allocation2 + $0x48] sm:$0xf] %v775_v47  ;;  %777 = vst.msk [vmem:[#allocation2 + $0x4c] sm:$0xf] %vm260_vm0, %v516_v11  ;;  %v521_v45 = vrot.slane %v519_v39, 7  ;;  %v530_v58 = vshll.u32 %v395_v4, 16  ;;  %v1923_v60 = vor.u32 %v1922_v53, %v1918_v41 }
  0x98   : > { %780 = vst [vmem:[#allocation2 + $0x50] sm:$0x1] %v779_v49  ;;  %v529_v57 = vrot.slane %v527_v28, 7  ;;  %v1927_v62 = vrot.slane %v1925_v43, 1  ;;  %v1932_v63 = vshll.u32 %v5146_v33, 16  ;;  %v1930_v23 = vshrl.u32 %v5146_v33, 16 }
  0x99   : > { %v5190_v8 = vld [vmem:[#allocation2 + $0x1c] sm:$0xf]  ;;  %v524_v56 = vor.u32 %v522_v32, %v521_v45  ;;  %v525_v13 = vrot.slane %v521_v45, 4  ;;  %v1763_v43 = vld [vmem:[#allocation2 + $0x24] sm:$0xe]  ;;  %v1937_v24 = vshll.u32 %v5179_v51, 16 }
  0x9a   : > { %v532_v15 = vor.u32 %v530_v58, %v529_v57  ;;  %v534_v16 = vrot.slane %v529_v57, 4  ;;  %2227 = vrot.lane.b32.xlu0 %v2182_v55, %s4688_s8  ;;  %v781_v17 = vld [vmem:[#allocation2 + $0x54] sm:$0xf]  ;;  %v1719_v53 = vld [vmem:[#allocation2 + $0x30] sm:$0xf]  ;;  %v5201_v18 = vcombine.low %v2625_v6, %v5190_v8  ;;  %v1928_v20 = vsel %vm1048_vm10, %v1923_v60, %v1927_v62 }
  0x9b   : > { %1380 = vrot.lane.b32.xlu1 %v1339_v59, %s4688_s8  ;;  %v782_v54 = vsel %vm4822_vm8, %v524_v56, %v781_v17  ;;  %v5198_v9 = vld [vmem:[#allocation2 + $0x34] sm:$0xf]  ;;  %v1934_v4 = vrot.slane %v1932_v63, 1  ;;  %v4075_v31 = vcombine.low %v1763_v43, %v5132_v14  ;;  %v1939_v28 = vrot.slane %v1937_v24, 1  ;;  %v1721_v45 = vld [vmem:[#allocation2 + $0x3c] sm:$0xf] }
  0x9c   : > { %v533_v41 = vsel %vm4828_vm9, %v525_v13, %v532_v15  ;;  %6277 = vst [vmem:[#allocation8_spill] sm:$0xff] %v5201_v18  ;;  %783 = vst [vmem:[#allocation2 + $0x54] sm:$0xf] %v782_v54  ;;  %v785_v22 = vld [vmem:[#allocation2 + $0x5c] sm:$0x1]  ;;  %v5211_v34 = vcombine.low %v1719_v53, %v5198_v9  ;;  %v2820_v11 = vshll.u32 %v5201_v18, 16 }
  0x9d   : > { %784 = vst.msk [vmem:[#allocation2 + $0x58] sm:$0xf] %vm260_vm0, %v533_v41  ;;  %v786_v26 = vsel %vm4777_vm3, %v534_v16, %v785_v22  ;;  %v1935_v32 = vor.u32 %v1934_v4, %v1930_v23  ;;  %v5216_v46 = vld [vmem:[#allocation2 + $0x20] ss:$0 sps:$4 sm:$0x11]   ;;  %v2183_v59 = vrot.slane %v4075_v31, 1 }
  0x9e   : > { %v868_v19 = vld [vmem:[#allocation2 + $0x48] sm:$0xf]  ;;  %v869_v38 = vld [vmem:[#allocation2 + $0x4c] sm:$0xf]  ;;  %787 = vst [vmem:[#allocation2 + $0x5c] sm:$0x1] %v786_v26 }
  0x9f   : > { %6278 = vst [vmem:[#allocation9_spill] sm:$0xff] %v5211_v34  ;;  %2099 = vrot.lane.b32.xlu1 %v1928_v20, %s4689_s9  ;;  %v5214_v35 = vcombine.low %v868_v19, %v869_v38  ;;  %v4511_v39 = vld [vmem:[#allocation2 + $0x50] ss:$0 sps:$4 sm:$0x11]   ;;  %v910_v0 = vld [vmem:[#allocation2 + $0x48] sm:$0xe]  ;;  %v1940_v23 = vsel %vm1048_vm10, %v1935_v32, %v1939_v28 }
  0xa0   : > { %v4014_v44 = vcombine.low %v910_v0, %v869_v38  ;;  %v1129_v49 = vshll.u32 %v4511_v39, 16  ;;  %v1341_v55 = vrot.slane %v4511_v39, 1  ;;  %v5221_v57 = vld [vmem:[#allocation2 + $0x40] sm:$0xf]  ;;  %v2184_v60 = vrot.slane %v5179_v51, 1 }
  0xa1   : > { %6279 = vst [vmem:[#allocation10_spill] sm:$0xff] %v5214_v35  ;;  %v1122_v47 = vshrl.u32 %v5214_v35, 16  ;;  %v1124_v14 = vshll.u32 %v5214_v35, 16  ;;  %v5224_v62 = vld [vmem:[#allocation2 + $0x38] ss:$0 sps:$4 sm:$0x11]   ;;  %v5239_v31 = vcombine.low %v1721_v45, %v5221_v57 }
  0xa2   : > { %v1340_v58 = vrot.slane %v4014_v44, 1  ;;  %v1944_v63 = vshll.u32 %v5211_v34, 16  ;;  %v1131_v56 = vrot.slane %v1129_v49, 1  ;;  %v2627_v16 = vld [vmem:[#allocation2 + $0x24] sm:$0xf]  ;;  %v2818_v53 = vshrl.u32 %v5201_v18, 16 }
  0xa3   : > { %v1126_v6 = vrot.slane %v1124_v14, 1  ;;  %v870_v13 = vld [vmem:[#allocation2 + $0x54] sm:$0xf]  ;;  %v5227_v17 = vld [vmem:[#allocation2 + $0x28] sm:$0xf]  ;;  %v2825_v51 = vshll.u32 %v5216_v46, 16  ;;  %v2185_v44 = vsel %vm1321_vm7, %v2183_v59, %v2184_v60 }
  0xa4   : > { %v871_v15 = vld [vmem:[#allocation2 + $0x58] sm:$0xf]  ;;  %v1342_v41 = vsel %vm1321_vm7, %v1340_v58, %v1341_v55  ;;  %v911_v43 = vld [vmem:[#allocation2 + $0x54] sm:$0xe]  ;;  %v2822_v4 = vrot.slane %v2820_v11, 1  ;;  %6281 = vst [vmem:[#allocation12_spill] sm:$0xff] %v5239_v31  ;;  %v5247_v49 = vcombine.low %v2627_v16, %v5227_v17 }
  0xa5   : > { %v5230_v54 = vcombine.low %v870_v13, %v871_v15  ;;  %v1127_v20 = vor.u32 %v1126_v6, %v1122_v47  ;;  %1382 = vrot.lane.b32.xlu0 %v1342_v41, %s4688_s8  ;;  %v4514_v22 = vld [vmem:[#allocation2 + $0x5c] ss:$0 sps:$4 sm:$0x11]   ;;  %v4015_v19 = vcombine.low %v911_v43, %v871_v15  ;;  %v2673_v38 = vld [vmem:[#allocation2 + $0x18] sm:$0xe]  ;;  %v1942_v47 = vshrl.u32 %v5211_v34, 16 }
  0xa6   : > { %v1141_v0 = vshll.u32 %v4514_v22, 16  ;;  %v1764_v14 = vld [vmem:[#allocation2 + $0x30] sm:$0xe]  ;;  %v1946_v28 = vrot.slane %v1944_v63, 1  ;;  %v1949_v11 = vshll.u32 %v5224_v62, 16  ;;  %6282 = vst [vmem:[#allocation13_spill] sm:$0xff] %v5247_v49  ;;  %v2823_v58 = vor.u32 %v2822_v4, %v2818_v53 }
  0xa7   : > { %6280 = vst [vmem:[#allocation11_spill] sm:$0xff] %v5230_v54  ;;  %v1134_v24 = vshrl.u32 %v5230_v54, 16  ;;  %v1136_v26 = vshll.u32 %v5230_v54, 16  ;;  %v1132_v39 = vsel %vm1048_vm10, %v1127_v20, %v1131_v56  ;;  %v5249_v55 = vld [vmem:[#allocation2 + $0x44] ss:$0 sps:$4 sm:$0x11]   ;;  %v4140_v59 = vcombine.low %v2673_v38, %v5190_v8 }
  0xa8   : > { %1253 = vrot.lane.b32.xlu1 %v1132_v39, %s4689_s9  ;;  %v1143_v45 = vrot.slane %v1141_v0, 1  ;;  %v2827_v6 = vrot.slane %v2825_v51, 1  ;;  %v2629_v60 = vld [vmem:[#allocation2 + $0x30] sm:$0xf]  ;;  %v5253_v56 = vld [vmem:[#allocation2 + $0x34] sm:$0xf]  ;;  %v4076_v16 = vcombine.low %v1764_v14, %v5198_v9 }
  0xa9   : > { %v1138_v32 = vrot.slane %v1136_v26, 1  ;;  %2101 = vrot.lane.b32.xlu0 %v1940_v23, %s4689_s9  ;;  %v1343_v15 = vrot.slane %v4015_v19, 1  ;;  %v1344_v63 = vrot.slane %v4514_v22, 1  ;;  %v1956_v41 = vshll.u32 %v5239_v31, 16  ;;  %v1723_v51 = vld [vmem:[#allocation2 + $0x48] sm:$0xf] }
  0xaa   : > { %v5257_v43 = vld [vmem:[#allocation2 + $0x2c] ss:$0 sps:$4 sm:$0x11]   ;;  %v1947_v26 = vor.u32 %v1946_v28, %v1942_v47  ;;  %v1951_v23 = vrot.slane %v1949_v11, 1  ;;  %v2832_v53 = vshll.u32 %v5247_v49, 16  ;;  %v2828_v22 = vsel %vm1048_vm10, %v2823_v58, %v2827_v6  ;;  %v5280_v6 = vpop.permute.xlu0 %1370 }
  0xab   : > { %v1139_v13 = vor.u32 %v1138_v32, %v1134_v24  ;;  %v5261_v8 = vld [vmem:[#allocation2 + $0x4c] sm:$0xf]  ;;  %v3089_v4 = vrot.slane %v4140_v59, 1  ;;  %v3090_v9 = vrot.slane %v5216_v46, 1  ;;  %v2674_v24 = vld [vmem:[#allocation2 + $0x24] sm:$0xe]  ;;  %v5268_v19 = vcombine.low %v2629_v60, %v5253_v56 }
  0xac   : > { %v1345_v38 = vsel %vm1321_vm7, %v1343_v15, %v1344_v63  ;;  %v1954_v39 = vshrl.u32 %v5239_v31, 16  ;;  %v1958_v0 = vrot.slane %v1956_v41, 1  ;;  %v1961_v47 = vshll.u32 %v5249_v55, 16  ;;  %v1765_v14 = vld [vmem:[#allocation2 + $0x3c] sm:$0xe] }
  0xad   : > { %v1144_v20 = vsel %vm1048_vm10, %v1139_v13, %v1143_v45  ;;  %2229 = vrot.lane.b32.xlu0 %v2185_v44, %s4688_s8  ;;  %6283 = vst [vmem:[#allocation14_spill] sm:$0xff] %v5268_v19  ;;  %v2186_v32 = vrot.slane %v4076_v16, 1  ;;  %v2187_v44 = vrot.slane %v5224_v62, 1  ;;  %v5275_v28 = vcombine.low %v1723_v51, %v5261_v8  ;;  %v5285_v60 = vld [vmem:[#allocation2 + $0x50] ss:$0 sps:$4 sm:$0x11]  }
  0xae   : > { %1255 = vrot.lane.b32.xlu1 %v1144_v20, %s4689_s9  ;;  %v2830_v46 = vshrl.u32 %v5247_v49, 16  ;;  %v2834_v11 = vrot.slane %v2832_v53, 1  ;;  %v2837_v45 = vshll.u32 %v5257_v43, 16  ;;  %v4141_v58 = vcombine.low %v2674_v24, %v5227_v17  ;;  %v5287_v62 = vld [vmem:[#allocation2 + $0x38] ss:$0 sps:$4 sm:$0x11]  }
  0xaf   : > { %6284 = vst [vmem:[#allocation15_spill] sm:$0xff] %v5275_v28  ;;  %v4077_v59 = vcombine.low %v1765_v14, %v5221_v57  ;;  %v2844_v13 = vshll.u32 %v5268_v19, 16  ;;  %v1952_v15 = vsel %vm1048_vm10, %v1947_v26, %v1951_v23  ;;  %v3091_v63 = vsel %vm1321_vm7, %v3089_v4, %v3090_v9  ;;  %v2631_v16 = vld [vmem:[#allocation2 + $0x3c] sm:$0xf]  ;;  %v5292_v20 = vld [vmem:[#allocation2 + $0x40] sm:$0xf] }
  0xb0   : > { %v1959_v41 = vor.u32 %v1958_v0, %v1954_v39  ;;  %v1963_v17 = vrot.slane %v1961_v47, 1  ;;  %v2188_v53 = vsel %vm1321_vm7, %v2186_v32, %v2187_v44  ;;  %v1968_v51 = vshll.u32 %v5275_v28, 16  ;;  %v1725_v57 = vld [vmem:[#allocation2 + $0x54] sm:$0xf]  ;;  %v2675_v47 = vld [vmem:[#allocation2 + $0x30] sm:$0xe]  ;;  %v5311_v44 = vpop.permute.xlu0 %1390 }
  0xb1   : > { %3009 = vrot.lane.b32.xlu0 %v2828_v22, %s4689_s9  ;;  %v5296_v22 = vld [vmem:[#allocation2 + $0x58] sm:$0xf]  ;;  %v2835_v24 = vor.u32 %v2834_v11, %v2830_v46  ;;  %v3092_v14 = vrot.slane %v4141_v58, 1  ;;  %v3093_v49 = vrot.slane %v5257_v43, 1  ;;  %v2189_v26 = vrot.slane %v4077_v59, 1 }
  0xb2   : > { %1384 = vrot.lane.b32.xlu1 %v1345_v38, %s4688_s8  ;;  %v2839_v38 = vrot.slane %v2837_v45, 1  ;;  %v2842_v23 = vshrl.u32 %v5268_v19, 16  ;;  %v2846_v4 = vrot.slane %v2844_v13, 1  ;;  %v2849_v9 = vshll.u32 %v5287_v62, 16  ;;  %v1727_v59 = vld [vmem:[#allocation2 + $0x60] sm:$0xf] }
  0xb3   : > { %v1964_v39 = vsel %vm1048_vm10, %v1959_v41, %v1963_v17  ;;  %v2190_v0 = vrot.slane %v5249_v55, 1  ;;  %v5306_v32 = vcombine.low %v2631_v16, %v5292_v20  ;;  %v5309_v43 = vcombine.low %v1725_v57, %v5296_v22  ;;  %v5315_v58 = vld [vmem:[#allocation2 + $0x44] ss:$0 sps:$4 sm:$0x11]   ;;  %v5319_v55 = vpop.permute.xlu1 %1386  ;;  %v1766_v41 = vld [vmem:[#allocation2 + $0x48] sm:$0xe] }
  0xb4   : > { %v1966_v46 = vshrl.u32 %v5275_v28, 16  ;;  %v1970_v11 = vrot.slane %v1968_v51, 1  ;;  %v1973_v45 = vshll.u32 %v5285_v60, 16  ;;  %v5317_v13 = vld [vmem:[#allocation2 + $0x64] sm:$0xf]  ;;  %v4142_v17 = vcombine.low %v2675_v47, %v5253_v56  ;;  %v5339_v47 = vpop.permute.xlu0 %1392 }
  0xb5   : > { %3137 = vrot.lane.b32.xlu0 %v3091_v63, %s4688_s8  ;;  %6285 = vst [vmem:[#allocation16_spill] sm:$0xff] %v5306_v32  ;;  %6286 = vst [vmem:[#allocation17_spill] sm:$0xff] %v5309_v43  ;;  %v2851_v63 = vrot.slane %v2849_v9, 1  ;;  %v5324_v16 = vld [vmem:[#allocation2 + $0x5c] ss:$0 sps:$4 sm:$0x11]   ;;  %v2840_v51 = vsel %vm1048_vm10, %v2835_v24, %v2839_v38  ;;  %v2191_v57 = vsel %vm1321_vm7, %v2189_v26, %v2190_v0 }
  0xb6   : > { %2103 = vrot.lane.b32.xlu1 %v1952_v15, %s4689_s9  ;;  %v2847_v15 = vor.u32 %v2846_v4, %v2842_v23  ;;  %v2856_v28 = vshll.u32 %v5306_v32, 16  ;;  %v1980_v19 = vshll.u32 %v5309_v43, 16  ;;  %v3094_v31 = vsel %vm1321_vm7, %v3092_v14, %v3093_v49  ;;  %v2633_v23 = vld [vmem:[#allocation2 + $0x48] sm:$0xf]  ;;  %v5334_v4 = vld [vmem:[#allocation2 + $0x4c] sm:$0xf] }
  0xb7   : > { %v1971_v56 = vor.u32 %v1970_v11, %v1966_v46  ;;  %v4078_v9 = vcombine.low %v1766_v41, %v5261_v8  ;;  %v3096_v24 = vrot.slane %v5287_v62, 1  ;;  %v2861_v38 = vshll.u32 %v5315_v58, 16  ;;  %v2676_v26 = vld [vmem:[#allocation2 + $0x3c] sm:$0xe]  ;;  %v1767_v0 = vld [vmem:[#allocation2 + $0x54] sm:$0xe]  ;;  %v5352_v34 = vpop.permute.xlu1 %1388 }
  0xb8   : > { %v2852_v49 = vsel %vm1048_vm10, %v2847_v15, %v2851_v63  ;;  %v3095_v14 = vrot.slane %v4142_v17, 1  ;;  %v1978_v46 = vshrl.u32 %v5309_v43, 16  ;;  %v5346_v8 = vld [vmem:[#allocation2 + $0x68] ss:$0 sps:$4 sm:$0x11]   ;;  %v2858_v62 = vrot.slane %v2856_v28, 1 }
  0xb9   : > { %2105 = vrot.lane.b32.xlu0 %v1964_v39, %s4689_s9  ;;  %v5332_v39 = vcombine.low %v1727_v59, %v5317_v13  ;;  %v1982_v11 = vrot.slane %v1980_v19, 1  ;;  %v1985_v59 = vshll.u32 %v5324_v16, 16  ;;  %v5350_v41 = vcombine.low %v2633_v23, %v5334_v4  ;;  %v5356_v63 = vld [vmem:[#allocation2 + $0x50] ss:$0 sps:$4 sm:$0x11]  }
  0xba   : > { %2231 = vrot.lane.b32.xlu1 %v2188_v53, %s4688_s8  ;;  %v1975_v53 = vrot.slane %v1973_v45, 1  ;;  %v2854_v45 = vshrl.u32 %v5306_v32, 16  ;;  %v2192_v17 = vrot.slane %v4078_v9, 1  ;;  %v3099_v32 = vrot.slane %v5315_v58, 1  ;;  %v1768_v19 = vld [vmem:[#allocation2 + $0x60] sm:$0xe] }
  0xbb   : > { %6287 = vst [vmem:[#allocation18_spill] sm:$0xff] %v5332_v39  ;;  %v1992_v15 = vshll.u32 %v5332_v39, 16  ;;  %v4079_v28 = vcombine.low %v1767_v0, %v5296_v22  ;;  %v3097_v43 = vsel %vm1321_vm7, %v3095_v14, %v3096_v24  ;;  %v1729_v18 = vld [vmem:[#allocation2 + $0x6c] sm:$0xf]  ;;  %v5365_v54 = vld [vmem:[#allocation2 + $0x70] sm:$0xf] }
  0xbc   : > { %v1976_v23 = vsel %vm1048_vm10, %v1971_v56, %v1975_v53  ;;  %v2859_v9 = vor.u32 %v2858_v62, %v2854_v45  ;;  %v1987_v33 = vrot.slane %v1985_v59, 1  ;;  %v2868_v58 = vshll.u32 %v5350_v41, 16  ;;  %v2635_v22 = vld [vmem:[#allocation2 + $0x54] sm:$0xf]  ;;  %v5368_v0 = vld [vmem:[#allocation2 + $0x58] sm:$0xf]  ;;  %v1242_v45 = vpop.permute.xlu1 %1241 }
  0xbd   : > { %2233 = vrot.lane.b32.xlu0 %v2191_v57, %s4688_s8  ;;  %v2863_v57 = vrot.slane %v2861_v38, 1  ;;  %v1983_v38 = vor.u32 %v1982_v11, %v1978_v46  ;;  %v1990_v53 = vshrl.u32 %v5332_v39, 16  ;;  %v1994_v56 = vrot.slane %v1992_v15, 1  ;;  %v5386_v15 = vld [vmem:[#allocation2 + $0x5c] ss:$0 sps:$4 sm:$0x11]  }
  0xbe   : > { %3011 = vrot.lane.b32.xlu1 %v2840_v51, %s4689_s9  ;;  %v2193_v51 = vrot.slane %v5285_v60, 1  ;;  %v4143_v60 = vcombine.low %v2676_v26, %v5292_v20  ;;  %v1997_v24 = vshll.u32 %v5346_v8, 16  ;;  %v2873_v20 = vshll.u32 %v5356_v63, 16 }
  0xbf   : > { %v2195_v26 = vrot.slane %v4079_v28, 1  ;;  %v5377_v14 = vcombine.low %v1729_v18, %v5365_v54  ;;  %vm1402_vm11 = vcmask 23552   ;;  %v4080_v11 = vcombine.low %v1768_v19, %v5317_v13 }
  0xc0   : > { %v2194_v46 = vsel %vm1321_vm7, %v2192_v17, %v2193_v51  ;;  %v3098_v62 = vrot.slane %v4143_v60, 1  ;;  %v5384_v59 = vcombine.low %v2635_v22, %v5368_v0  ;;  %v1988_v18 = vsel %vm1048_vm10, %v1983_v38, %v1987_v33  ;;  %v5394_v60 = vld [vmem:[#allocation2 + $0x74] ss:$0 sps:$4 sm:$0x11]  }
  0xc1   : > { %3013 = vrot.lane.b32.xlu0 %v2852_v49, %s4689_s9  ;;  %v2196_v49 = vrot.slane %v5324_v16, 1  ;;  %v2864_v16 = vsel %vm1048_vm10, %v2859_v9, %v2863_v57  ;;  %v2866_v28 = vshrl.u32 %v5350_v41, 16  ;;  %v2870_v39 = vrot.slane %v2868_v58, 1 }
  0xc2   : > { %3139 = vrot.lane.b32.xlu1 %v3094_v31, %s4688_s8  ;;  %v5370_v31 = vpop.permute.xlu0 %1394  ;;  %v1995_v51 = vor.u32 %v1994_v56, %v1990_v53  ;;  %v1999_v17 = vrot.slane %v1997_v24, 1  ;;  %v1404_v13 = vsel %vm1402_vm11, %v4891_v5, %v1242_v45  ;;  %v2004_v22 = vshll.u32 %v5377_v14, 16  ;;  %v2678_v56 = vld [vmem:[#allocation2 + $0x54] sm:$0xe]  ;;  %v1769_v24 = vld [vmem:[#allocation2 + $0x6c] sm:$0xe] }
  0xc3   : > { %v2197_v19 = vsel %vm1321_vm7, %v2195_v26, %v2196_v49  ;;  %vm1435_vm12 = vcmask 48128   ;;  %vm1475_vm13 = vcmask 72704   ;;  %v2198_v33 = vrot.slane %v4080_v11, 1 }
  0xc4   : > { %v2199_v57 = vrot.slane %v5346_v8, 1  ;;  %v2880_v38 = vshll.u32 %v5384_v59, 16  ;;  %v2871_v5 = vor.u32 %v2870_v39, %v2866_v28  ;;  %v3102_v58 = vrot.slane %v5356_v63, 1  ;;  %v1731_v8 = vld [vmem:[#allocation2 + $0x78] sm:$0xf] }
  0xc5   : > { %3141 = vrot.lane.b32.xlu0 %v3097_v43, %s4688_s8  ;;  %v2875_v43 = vrot.slane %v2873_v20, 1  ;;  %v2885_v53 = vshll.u32 %v5386_v15, 16  ;;  %v1437_v20 = vsel %vm1435_vm12, %v1404_v13, %v5280_v6  ;;  %v3100_v49 = vsel %vm1321_vm7, %v3098_v62, %v3099_v32 }
  0xc6   : > { %2107 = vrot.lane.b32.xlu1 %v1976_v23, %s4689_s9  ;;  %v2677_v23 = vld [vmem:[#allocation2 + $0x48] sm:$0xe]  ;;  %v1258_v35 = vpop.permute.xlu0 %1257  ;;  %v5408_v45 = vsel %vm1048_vm10, %v1995_v51, %v1999_v17  ;;  %4301 = vmatprep.mubr.msk.bf16.mxu0 %vm1475_vm13, %v1437_v20  ;;  %v2002_v63 = vshrl.u32 %v5377_v14, 16  ;;  %v2006_v11 = vrot.slane %v2004_v22, 1  ;;  %v2009_v6 = vshll.u32 %v5394_v60, 16 }
  0xc7   : > { %v4144_v9 = vcombine.low %v2677_v23, %v5334_v4  ;;  %v2637_v4 = vld [vmem:[#allocation2 + $0x60] sm:$0xf]  ;;  %v1420_v39 = vsel %vm1402_vm11, %v4894_v10, %v1258_v35  ;;  %vm1508_vm14 = vcmask 1043456   ;;  %v2878_v62 = vshrl.u32 %v5384_v59, 16 }
  0xc8   : > { %v2882_v28 = vrot.slane %v2880_v38, 1  ;;  %v4563_v10 = vld [vmem:[%s6250_s1] sm:$0x1f]   ;;  %vm1509_vm15 = vcmask 1044480   ;;  %v2876_v35 = vsel %vm1048_vm10, %v2871_v5, %v2875_v43  ;;  %v5434_v17 = vsel %vm1321_vm7, %v2198_v33, %v2199_v57 }
  0xc9   : > { %2109 = vrot.lane.b32.xlu0 %v1988_v18, %s4689_s9  ;;  %v5417_v18 = vld [vmem:[#allocation2 + $0x7c] sm:$0xf]  ;;  %v3101_v32 = vrot.slane %v4144_v9, 1  ;;  %v5422_v23 = vpop.permute.xlu1 %1372  ;;  %v4145_v13 = vcombine.low %v2678_v56, %v5368_v0  ;;  %v5438_v22 = vld [vmem:[#allocation2 + $0x80] ss:$0 sps:$4 sm:$0x11]   ;;  %v2007_v43 = vor.u32 %v2006_v11, %v2002_v63 }
  0xca   : > { %2235 = vrot.lane.b32.xlu1 %v2194_v46, %s4688_s8  ;;  %v1260_v26 = vpop.permute.xlu0 %1259  ;;  %v5410_v46 = vld [vmem:[#allocation2 + $0x64] sm:$0xf]  ;;  %v4690_v9 = vmov 65535   ;;  %v2011_v5 = vrot.slane %v2009_v6, 1  ;;  %v5443_v20 = vcombine.low %v1731_v8, %v5417_v18  ;;  %v3105_v0 = vrot.slane %v5386_v15, 1 }
  0xcb   : > { %v5429_v51 = vcombine.low %v2637_v4, %v5410_v46  ;;  %v1510_v38 = vsel %vm1508_vm14, 4294967295, %v4690_v9  ;;  %v1770_v56 = vld [vmem:[#allocation2 + $0x78] sm:$0xe]  ;;  %v1422_v4 = vsel %vm1402_vm11, %v4915_v40, %v1260_v26  ;;  %v2883_v63 = vor.u32 %v2882_v28, %v2878_v62  ;;  %v5466_v62 = vld [vmem:[#allocation2 + $0x70] sm:$0xf] }
  0xcc   : > { %v5447_v33 = vsel %vm1509_vm15, %v1510_v38, 0  ;;  %v2202_v11 = vrot.slane %v5394_v60, 1  ;;  %v2021_v9 = vshll.u32 %v5438_v22, 16  ;;  %v2679_v38 = vld [vmem:[#allocation2 + $0x60] sm:$0xe]  ;;  %v2014_v26 = vshrl.u32 %v5443_v20, 16 }
  0xcd   : > { %2237 = vrot.lane.b32.xlu0 %v2197_v19, %s4688_s8  ;;  %v4081_v19 = vcombine.low %v1769_v24, %v5365_v54  ;;  %v2887_v54 = vrot.slane %v2885_v53, 1  ;;  %v1513_v24 = vand.u32 %v4563_v10, %v5447_v33  ;;  %v1264_v8 = vpop.permute.xlu1 %1263  ;;  %v2892_v6 = vshll.u32 %v5429_v51, 16 }
  0xce   : > { %3015 = vrot.lane.b32.xlu1 %v2864_v16, %s4689_s9  ;;  %v1453_v16 = vsel %vm1435_vm12, %v1420_v39, %v5319_v55  ;;  %v5445_v55 = vld [vmem:[#allocation2 + $0x68] ss:$0 sps:$4 sm:$0x11]   ;;  %v1262_v57 = vpop.permute.xlu0 %1261  ;;  %v3103_v39 = vsel %vm1321_vm7, %v3101_v32, %v3102_v58  ;;  %v3104_v53 = vrot.slane %v4145_v13, 1  ;;  %v2012_v58 = vsel %vm1048_vm10, %v2007_v43, %v2011_v5  ;;  %v2639_v32 = vld [vmem:[#allocation2 + $0x6c] sm:$0xf] }
  0xcf   : > { %4317 = vmatprep.mubr.msk.bf16.mxu1 %vm1475_vm13, %v1453_v16  ;;  %v5458_v16 = vld [vmem:[#allocation2 + $0x88] sm:$0xf]  ;;  %4401 = vmatprep.subr.bf16.mxu1 %v1513_v24  ;;  %v1424_v40 = vsel %vm1402_vm11, %v4931_v2, %v1262_v57  ;;  %v2016_v60 = vshll.u32 %v5443_v20, 16  ;;  %v1455_v28 = vsel %vm1435_vm12, %v1422_v4, %v5352_v34  ;;  %v2897_v2 = vshll.u32 %v5445_v55, 16 }
  0xd0   : > { %4299 = vmatprep.subr.bf16.mxu0 %v1513_v24  ;;  %4402 = vmatpush3.bf16.msra.mxu1 %v1513_v24  ;;  %v4082_v10 = vcombine.low %v1770_v56, %v5417_v18  ;;  %v5475_v13 = vld [vmem:[#allocation2 + $0x74] ss:$0 sps:$4 sm:$0x11]   ;;  %v1457_v5 = vsel %vm1435_vm12, %v1424_v40, %v5311_v44  ;;  %v2890_v34 = vshrl.u32 %v5429_v51, 16  ;;  %v2894_v57 = vrot.slane %v2892_v6, 1 }
  0xd1   : > { %3017 = vrot.lane.b32.xlu0 %v2876_v35, %s4689_s9  ;;  %v2201_v35 = vrot.slane %v4081_v19, 1  ;;  %4300 = vmatpush3.bf16.msra.mxu0 %v1513_v24  ;;  %v1244_v43 = vpop.permute.xlu1 %1243  ;;  %v2023_v4 = vrot.slane %v2021_v9, 1  ;;  %v5487_v18 = vcombine.low %v2639_v32, %v5466_v62  ;;  %v5489_v56 = vld [vmem:[#allocation2 + $0x8c] ss:$0 sps:$4 sm:$0x11]   ;;  %vm3804_vm1 = vcmask 519168  }
  0xd2   : > { %3143 = vrot.lane.b32.xlu1 %v3100_v49, %s4688_s8  ;;  %v1733_v49 = vld [vmem:[#allocation2 + $0x84] sm:$0xf]  ;;  %v1406_v24 = vsel %vm1402_vm11, %v4969_v21, %v1244_v43  ;;  %v1266_v44 = vpop.permute.xlu0 %1265  ;;  %v1735_v21 = vld [vmem:[#allocation2 + $0x90] sm:$0xf]  ;;  %v5497_v9 = vld [vmem:[#allocation2 + $0x94] sm:$0xf] }
  0xd3   : > { %v5478_v19 = vcombine.low %v1733_v49, %v5458_v16  ;;  %4318 = vmatmul.mubr.msk.bf16.vlgmr.msra.gmra.mxu1 %vm1475_vm13, %v1455_v28  ;;  %v2888_v49 = vsel %vm1048_vm10, %v2883_v63, %v2887_v54  ;;  %v2203_v6 = vsel %vm1321_vm7, %v2201_v35, %v2202_v11  ;;  %v2204_v40 = vrot.slane %v4082_v10, 1  ;;  %v2641_v10 = vld [vmem:[#allocation2 + $0x78] sm:$0xf]  ;;  %v5516_v43 = vld [vmem:[#allocation2 + $0x7c] sm:$0xf] }
  0xd4   : > { %4321 = vmatprep.mubr.msk.bf16.mxu1 %vm1475_vm13, %v1457_v5  ;;  %v2909_v54 = vshll.u32 %v5475_v13, 16  ;;  %v2895_v11 = vor.u32 %v2894_v57, %v2890_v34  ;;  %v3108_v35 = vrot.slane %v5445_v55, 1  ;;  %v1428_v32 = vsel %vm1402_vm11, %v4942_v25, %v1266_v44  ;;  %v1771_v34 = vld [vmem:[#allocation2 + $0x84] sm:$0xe] }
  0xd5   : > { %3145 = vrot.lane.b32.xlu0 %v3103_v39, %s4688_s8  ;;  %v1439_v39 = vsel %vm1435_vm12, %v1406_v24, %v5422_v23  ;;  %v2899_v23 = vrot.slane %v2897_v2, 1  ;;  %v2028_v63 = vshll.u32 %v5478_v19, 16  ;;  %v2904_v28 = vshll.u32 %v5487_v18, 16  ;;  %v5522_v57 = vld [vmem:[#allocation2 + $0x98] ss:$0 sps:$4 sm:$0x11]  }
  0xd6   : > { %2111 = vrot.lane.b32.xlu1 %v5408_v45, %s4689_s9  ;;  %v4146_v45 = vcombine.low %v2679_v38, %v5410_v46  ;;  %v2018_v46 = vrot.slane %v2016_v60, 1  ;;  %v2205_v38 = vrot.slane %v5438_v22, 1  ;;  %4302 = vmatmul.mubr.msk.bf16.vlgmr.msra.gmra.mxu0 %vm1475_vm13, %v1439_v39  ;;  %v2680_v60 = vld [vmem:[#allocation2 + $0x6c] sm:$0xe]  ;;  %v5514_v2 = vcombine.low %v1735_v21, %v5497_v9 }
  0xd7   : > { %v3106_v55 = vsel %vm1321_vm7, %v3104_v53, %v3105_v0  ;;  %v2902_v25 = vshrl.u32 %v5487_v18, 16  ;;  %v1461_v15 = vsel %vm1435_vm12, %v1428_v32, %v5370_v31  ;;  %v2900_v0 = vsel %vm1048_vm10, %v2895_v11, %v2899_v23  ;;  %v5543_v23 = vld [vmem:[#allocation2 + $0x80] ss:$0 sps:$4 sm:$0x11]   ;;  %v2681_v11 = vld [vmem:[#allocation2 + $0x78] sm:$0xe] }
  0xd8   : > { %v3107_v22 = vrot.slane %v4146_v45, 1  ;;  %v2019_v5 = vor.u32 %v2018_v46, %v2014_v26  ;;  %v2030_v45 = vrot.slane %v2028_v63, 1  ;;  %v4147_v53 = vcombine.low %v2680_v60, %v5466_v62  ;;  %v2643_v60 = vld [vmem:[#allocation2 + $0x84] sm:$0xf] }
  0xd9   : > { %2113 = vrot.lane.b32.xlu0 %v2012_v58, %s4689_s9  ;;  %v2033_v58 = vshll.u32 %v5489_v56, 16  ;;  %v5534_v26 = vcombine.low %v2641_v10, %v5516_v43  ;;  %v2906_v39 = vrot.slane %v2904_v28, 1  ;;  %v1397_v46 = vpop.permute.xlu0 %1396  ;;  %v4083_v31 = vcombine.low %v1771_v34, %v5458_v16  ;;  %v1737_v10 = vld [vmem:[#allocation2 + $0x9c] sm:$0xf] }
  0xda   : > { %2239 = vrot.lane.b32.xlu1 %v5434_v17, %s4688_s8  ;;  %v1426_v17 = vsel %vm1402_vm11, %v4935_v12, %v1264_v8  ;;  %v5526_v12 = vrot.slane %v2909_v54, 1  ;;  %v2026_v8 = vshrl.u32 %v5478_v19, 16  ;;  %v2045_v21 = vshll.u32 %v5522_v57, 16  ;;  %v1772_v54 = vld [vmem:[#allocation2 + $0x90] sm:$0xe] }
  0xdb   : > { %v1459_v24 = vsel %vm1435_vm12, %v1426_v17, %v5339_v47  ;;  %v2035_v44 = vrot.slane %v2033_v58, 1  ;;  %v2024_v47 = vsel %vm1048_vm10, %v2019_v5, %v2023_v4  ;;  %v2206_v32 = vsel %vm1321_vm7, %v2204_v40, %v2205_v38  ;;  %v5552_v58 = vld [vmem:[#allocation2 + $0x88] sm:$0xf]  ;;  %v5556_v5 = vld [vmem:[#allocation2 + $0xa0] sm:$0xf] }
  0xdc   : > { %4322 = vmatmul.mubr.msk.bf16.gmra.mxu1 %vm1475_vm13, %v1459_v24  ;;  %v1268_v62 = vpop.permute.xlu1 %1267  ;;  %v2031_v63 = vor.u32 %v2030_v45, %v2026_v8  ;;  %v3109_v16 = vsel %vm1321_vm7, %v3107_v22, %v3108_v35  ;;  %v3110_v28 = vrot.slane %v4147_v53, 1  ;;  %v2916_v17 = vshll.u32 %v5534_v26, 16  ;;  %v5560_v22 = vld [vmem:[#allocation2 + $0x8c] ss:$0 sps:$4 sm:$0x11]  }
  0xdd   : > { %2241 = vrot.lane.b32.xlu0 %v2203_v6, %s4688_s8  ;;  %v2040_v6 = vshll.u32 %v5514_v2, 16  ;;  %4325 = vmatprep.mubr.msk.bf16.mxu1 %vm1475_vm13, %v1461_v15  ;;  %v2907_v34 = vor.u32 %v2906_v39, %v2902_v25  ;;  %v4084_v4 = vcombine.low %v1772_v54, %v5497_v9  ;;  %v2207_v8 = vrot.slane %v4083_v31, 1 }
  0xde   : > { %3019 = vrot.lane.b32.xlu1 %v2888_v49, %s4689_s9  ;;  %v3111_v49 = vrot.slane %v5475_v13, 1  ;;  %v2208_v45 = vrot.slane %v5489_v56, 1  ;;  %v2047_v38 = vrot.slane %v2045_v21, 1  ;;  %v4148_v40 = vcombine.low %v2681_v11, %v5516_v43  ;;  %v376_v13 = vld [vmem:[#allocation2 + $0xc8] sm:$0x1] }
  0xdf   : > { %v2042_v15 = vrot.slane %v2040_v6, 1  ;;  %v2036_v35 = vsel %vm1048_vm10, %v2031_v63, %v2035_v44  ;;  %v1430_v25 = vsel %vm1402_vm11, %v5014_v29, %v1268_v62  ;;  %v2921_v9 = vshll.u32 %v5543_v23, 16  ;;  %v5579_v62 = vld [vmem:[#allocation2 + $0xa4] ss:$0 sps:$4 sm:$0x11]  }
  0xe0   : > { %v1375_v56 = vpop.permute.xlu0 %1374  ;;  %v2914_v53 = vshrl.u32 %v5534_v26, 16  ;;  %v2918_v43 = vrot.slane %v2916_v17, 1  ;;  %v1463_v24 = vsel %vm1435_vm12, %v1430_v25, %v1397_v46  ;;  %v5574_v6 = vcombine.low %v1737_v10, %v5556_v5  ;;  %v2645_v10 = vld [vmem:[#allocation2 + $0x90] sm:$0xf] }
  0xe1   : > { %3021 = vrot.lane.b32.xlu0 %v2900_v0, %s4689_s9  ;;  %v5569_v0 = vcombine.low %v2643_v60, %v5552_v58  ;;  %v2210_v44 = vrot.slane %v4084_v4, 1  ;;  %v2211_v21 = vrot.slane %v5522_v57, 1  ;;  %v3113_v54 = vrot.slane %v4148_v40, 1  ;;  %v2682_v57 = vld [vmem:[#allocation2 + $0x84] sm:$0xe] }
  0xe2   : > { %3147 = vrot.lane.b32.xlu1 %v3106_v55, %s4688_s8  ;;  %v2038_v55 = vshrl.u32 %v5514_v2, 16  ;;  %v2933_v46 = vshll.u32 %v5560_v22, 16  ;;  %v2912_v11 = vsel %vm1048_vm10, %v2907_v34, %v5526_v12  ;;  %v2209_v60 = vsel %vm1321_vm7, %v2207_v8, %v2208_v45  ;;  %v1773_v4 = vld [vmem:[#allocation2 + $0x9c] sm:$0xe]  ;;  %v1739_v8 = vld [vmem:[#allocation2 + $0xa8] sm:$0xf] }
  0xe3   : > { %v1246_v39 = vpop.permute.xlu1 %1245  ;;  %v2923_v17 = vrot.slane %v2921_v9, 1  ;;  %v3112_v12 = vsel %vm1321_vm7, %v3110_v28, %v3111_v49  ;;  %v320_v45 = vld [vmem:[#allocation2 + $0xc0] sm:$0x1]  ;;  %v5601_v40 = vsel %vm1321_vm7, %v2210_v44, %v2211_v21  ;;  %v2926_v25 = vshrl.u32 %v5569_v0, 16  ;;  %v412_v49 = vld [vmem:[%s4805_s7 + $0x78] sm:$0xf] }
  0xe4   : > { %v2043_v31 = vor.u32 %v2042_v15, %v2038_v55  ;;  %v1408_v29 = vsel %vm1402_vm11, %v5031_v61, %v1246_v39  ;;  %4326 = vmatmul.mubr.msk.bf16.gmra.mxu1 %vm1475_vm13, %v1463_v24  ;;  %v2928_v61 = vshll.u32 %v5569_v0, 16  ;;  %v5593_v55 = vld [vmem:[#allocation2 + $0x94] sm:$0xf]  ;;  %v2057_v15 = vshll.u32 %v5579_v62, 16 }
  0xe5   : > { %3149 = vrot.lane.b32.xlu0 %v3109_v16, %s4688_s8  ;;  %v1441_v63 = vsel %vm1435_vm12, %v1408_v29, %v1375_v56  ;;  %v2919_v16 = vor.u32 %v2918_v43, %v2914_v53  ;;  %v5605_v9 = vrot.slane %v2933_v46, 1  ;;  %v3117_v56 = vrot.slane %v5560_v22, 1  ;;  %v5612_v53 = vld [vmem:[#allocation2 + $0xac] sm:$0xf]  ;;  %v413_v29 = vld [vmem:[%s4805_s7 + $0x7c] sm:$0xf] }
  0xe6   : > { %2115 = vrot.lane.b32.xlu1 %v2024_v47, %s4689_s9  ;;  %v3114_v47 = vrot.slane %v5543_v23, 1  ;;  %v2052_v23 = vshll.u32 %v5574_v6, 16  ;;  %4305 = vmatprep.mubr.msk.bf16.mxu0 %vm1475_vm13, %v1441_v63  ;;  %v2930_v28 = vrot.slane %v2928_v61, 1  ;;  %v5615_v43 = vcombine.low %v2645_v10, %v5593_v55  ;;  %v5619_v44 = vld [vmem:[#allocation2 + $0xb0] ss:$0 sps:$4 sm:$0x11]  }
  0xe7   : > { %v2924_v24 = vsel %vm1048_vm10, %v2919_v16, %v2923_v17  ;;  %v321_v21 = vsel %vm4777_vm3, 0, %v320_v45  ;;  %v2059_v46 = vrot.slane %v2057_v15, 1  ;;  %v5636_v16 = vld [vmem:[#allocation2 + $0x98] ss:$0 sps:$4 sm:$0x11]   ;;  %v675_v17 = vshll.u32 %v412_v49, 16 }
  0xe8   : > { %v1248_v34 = vpop.permute.xlu1 %1247  ;;  %v2054_v39 = vrot.slane %v2052_v23, 1  ;;  %322 = vst [vmem:[#allocation2 + $0xc0] sm:$0x1] %v321_v21  ;;  %v680_v10 = vshrl.u32 %v413_v29, 16  ;;  %s4247_s7 = sshll.u32 %s4677_s18, 11  ;;  %s6204_s18 = scalar_lea.sflag [#allocation5], %s237_s26 }
  0xe9   : > { %2117 = vrot.lane.b32.xlu0 %v2036_v35, %s4689_s9  ;;  %v3115_v35 = vsel %vm1321_vm7, %v3113_v54, %v3114_v47  ;;  %v4594_v54 = vld [vmem:[%s6250_s1 + $0x8] sm:$0x1f]   ;;  %v1410_v47 = vsel %vm1402_vm11, %v5045_v37, %v1248_v34  ;;  %v2940_v37 = vshll.u32 %v5615_v43, 16  ;;  %v683_v34 = vshll.u32 %v413_v29, 16  ;;  %v5654_v29 = vld [vmem:[#allocation2 + $0xa0] sm:$0xf]  ;;  %s6194_s11 = scalar_lea.hbm %s6253_s4, %s4247_s7 }
  0xea   : > { %2243 = vrot.lane.b32.xlu1 %v2206_v32, %s4688_s8  ;;  %v2048_v32 = vsel %vm1048_vm10, %v2043_v31, %v2047_v38  ;;  %v2050_v38 = vshrl.u32 %v5574_v6, 16  ;;  %v4149_v31 = vcombine.low %v2682_v57, %v5552_v58  ;;  %v672_v58 = vshrl.u32 %v412_v49, 16  ;;  %v5644_v49 = vld [vmem:[#allocation2 + $0x90] sm:$0xe] }
  0xeb   : > { %v4085_v57 = vcombine.low %v1773_v4, %v5556_v5  ;;  %v2214_v5 = vrot.slane %v5579_v62, 1  ;;  %v1741_v4 = vld [vmem:[#allocation2 + $0xb4] sm:$0xf]  ;;  %v2945_v62 = vshll.u32 %v5636_v16, 16 }
  0xec   : > { %v1377_v63 = vpop.permute.xlu1 %1376  ;;  %v674_v23 = vrot.slane %v672_v58, 7  ;;  %v2055_v15 = vor.u32 %v2054_v39, %v2050_v38  ;;  %v3116_v45 = vrot.slane %v4149_v31, 1  ;;  %v2069_v39 = vshll.u32 %v5619_v44, 16  ;;  %v2647_v31 = vld [vmem:[#allocation2 + $0x9c] sm:$0xf] }
  0xed   : > { %2245 = vrot.lane.b32.xlu0 %v2209_v60, %s4688_s8  ;;  %v1443_v61 = vsel %vm1435_vm12, %v1410_v47, %v1377_v63  ;;  %v5634_v60 = vcombine.low %v1739_v8, %v5612_v53  ;;  %v2362_v8 = vand.u32 %v4594_v54, %v5447_v33  ;;  %v682_v47 = vrot.slane %v680_v10, 7 }
  0xee   : > { %3023 = vrot.lane.b32.xlu1 %v2912_v11, %s4689_s9  ;;  %v377_v11 = vsel %vm4785_vm5, 0, %v376_v13  ;;  %4306 = vmatmul.mubr.msk.bf16.gmra.mxu0 %vm1475_vm13, %v1443_v61  ;;  %v2931_v13 = vor.u32 %v2930_v28, %v2926_v25  ;;  %v678_v21 = vrot.slane %v674_v23, 4  ;;  %v2938_v25 = vshrl.u32 %v5615_v43, 16 }
  0xef   : > { %378 = vst [vmem:[#allocation2 + $0xc8] sm:$0x1] %v377_v11  ;;  %v2213_v11 = vrot.slane %v4085_v57, 1  ;;  %v2064_v38 = vshll.u32 %v5634_v60, 16  ;;  %4333 = vmatprep.subr.bf16.mxu1 %v2362_v8  ;;  %v2942_v28 = vrot.slane %v2940_v37, 1  ;;  %v685_v54 = vor.u32 %v683_v34, %v682_v47 }
  0xf0   : > { %v687_v58 = vrot.slane %v682_v47, 4  ;;  %v2060_v61 = vsel %vm1048_vm10, %v2055_v15, %v2059_v46  ;;  %4334 = vmatpush3.bf16.msra.mxu1 %v2362_v8  ;;  %v379_v47 = vld [vmem:[#allocation2 + $0xd4] sm:$0x1]  ;;  %v4150_v8 = vcombine.low %v5644_v49, %v5593_v55  ;;  %v5682_v55 = vld [vmem:[#allocation2 + $0xac] sm:$0xf]  ;;  %v3118_v1 = vsel %vm1321_vm7, %v3116_v45, %v3117_v56 }
  0xf1   : > { %3025 = vrot.lane.b32.xlu0 %v2924_v24, %s4689_s9  ;;  %v677_v24 = vor.u32 %v675_v17, %v674_v23  ;;  %v2062_v17 = vshrl.u32 %v5634_v60, 16  ;;  %v686_v37 = vsel %vm4828_vm9, %v678_v21, %v685_v54  ;;  %v2066_v46 = vrot.slane %v2064_v38, 1  ;;  %v2649_v38 = vld [vmem:[#allocation2 + $0xa8] sm:$0xf] }
  0xf2   : > { %3151 = vrot.lane.b32.xlu1 %v3112_v12, %s4688_s8  ;;  %v5646_v12 = vld [vmem:[#allocation2 + $0xb8] sm:$0xf]  ;;  %847 = vst.msk [vmem:[#allocation2 + $0xc4] sm:$0xf] %vm260_vm0, %v686_v37  ;;  %v5680_v21 = vcombine.low %v2647_v31, %v5654_v29  ;;  %v380_v31 = vsel %vm4785_vm5, 0, %v379_v47  ;;  %v5705_v3 = vcombine.low %v2649_v38, %v5682_v55  ;;  %v3119_v45 = vrot.slane %v4150_v8, 1 }
  0xf3   : > { %v1270_v63 = vpop.permute.xlu0 %1269  ;;  %v5661_v23 = vcombine.low %v1741_v4, %v5646_v12  ;;  %v1774_v4 = vld [vmem:[#allocation2 + $0xa8] sm:$0xe]  ;;  %v5690_v54 = vld [vmem:[#allocation2 + $0xbc] ss:$0 sps:$4 sm:$0x11]   ;;  %v2067_v22 = vor.u32 %v2066_v46, %v2062_v17  ;;  %vm1676_vm0 = vcmask 523264  }
  0xf4   : > { %v1432_v57 = vsel %vm1402_vm11, %v5072_v30, %v1270_v63  ;;  %v4608_v30 = vld [vmem:[%s6250_s1 + $0x10] sm:$0x1f]   ;;  %v2947_v63 = vrot.slane %v2945_v62, 1  ;;  %v2936_v62 = vsel %vm1048_vm10, %v2931_v13, %v5605_v9  ;;  %381 = vst [vmem:[#allocation2 + $0xd4] sm:$0x1] %v380_v31  ;;  %v2217_v13 = vrot.slane %v5619_v44, 1 }
  0xf5   : > { %3153 = vrot.lane.b32.xlu0 %v3115_v35, %s4688_s8  ;;  %v323_v35 = vld [vmem:[#allocation2 + $0xcc] sm:$0x1]  ;;  %v3274_v9 = vand.u32 %v4608_v30, %v5447_v33  ;;  %v2952_v33 = vshll.u32 %v5680_v21, 16  ;;  %v5720_v30 = vld [vmem:[#allocation2 + $0xb0] ss:$0 sps:$4 sm:$0x11]  }
  0xf6   : > { %2119 = vrot.lane.b32.xlu1 %v2048_v32, %s4689_s9  ;;  %v844_v32 = vld [vmem:[#allocation2 + $0xc0] sm:$0xf]  ;;  %v848_v34 = vld [vmem:[#allocation2 + $0xc8] sm:$0x1]  ;;  %v324_v49 = vsel %vm4777_vm3, 0, %v323_v35  ;;  %v2964_v46 = vshll.u32 %v5705_v3, 16 }
  0xf7   : > { %v845_v10 = vsel %vm4822_vm8, %v677_v24, %v844_v32  ;;  %v1399_v15 = vpop.permute.xlu0 %1398  ;;  %v849_v36 = vsel %vm4777_vm3, %v687_v58, %v848_v34  ;;  %v2943_v24 = vor.u32 %v2942_v28, %v2938_v25  ;;  %v2076_v25 = vshll.u32 %v5661_v23, 16  ;;  %325 = vst [vmem:[#allocation2 + $0xcc] sm:$0x1] %v324_v49  ;;  %v5699_v58 = vld [vmem:[#allocation2 + $0xa4] ss:$0 sps:$4 sm:$0x11]   ;;  %4367 = vmatprep.subr.bf16.mxu0 %v3274_v9 }
  0xf8   : > { %846 = vst [vmem:[#allocation2 + $0xc0] sm:$0xf] %v845_v10  ;;  %v1465_v42 = vsel %vm1435_vm12, %v1432_v57, %v1399_v15  ;;  %850 = vst [vmem:[#allocation2 + $0xc8] sm:$0x1] %v849_v36  ;;  %v4086_v28 = vcombine.low %v1774_v4, %v5612_v53  ;;  %v2081_v57 = vshll.u32 %v5690_v54, 16  ;;  %v2957_v10 = vshll.u32 %v5699_v58, 16  ;;  %4368 = vmatpush3.bf16.msra.mxu0 %v3274_v9 }
  0xf9   : > { %2121 = vrot.lane.b32.xlu0 %v2060_v61, %s4689_s9  ;;  %4329 = vmatprep.mubr.msk.bf16.mxu1 %vm1475_vm13, %v1465_v42  ;;  %v3120_v61 = vrot.slane %v5636_v16, 1  ;;  %v2948_v53 = vsel %vm1048_vm10, %v2943_v24, %v2947_v63  ;;  %v2078_v16 = vrot.slane %v2076_v25, 1  ;;  %v2684_v32 = vld [vmem:[#allocation2 + $0x9c] sm:$0xe]  ;;  %v1775_v35 = vld [vmem:[#allocation2 + $0xb4] sm:$0xe] }
  0xfa   : > { %2247 = vrot.lane.b32.xlu1 %v5601_v40, %s4688_s8  ;;  %v2215_v40 = vsel %vm1321_vm7, %v2213_v11, %v2214_v5  ;;  %v2071_v5 = vrot.slane %v2069_v39, 1  ;;  %v2074_v39 = vshrl.u32 %v5661_v23, 16  ;;  %v2216_v37 = vrot.slane %v4086_v28, 1  ;;  %v5717_v47 = vld [vmem:[#allocation2 + $0xc4] sm:$0xf] }
  0xfb   : > { %v1401_v11 = vpop.permute.xlu0 %1400  ;;  %v2950_v63 = vshrl.u32 %v5680_v21, 16  ;;  %v2954_v4 = vrot.slane %v2952_v33, 1  ;;  %v4087_v8 = vcombine.low %v1775_v35, %v5646_v12  ;;  %v3121_v36 = vsel %vm1321_vm7, %v3119_v45, %v3120_v61  ;;  %v2685_v31 = vld [vmem:[#allocation2 + $0xa8] sm:$0xe]  ;;  %v5734_v9 = vld [vmem:[#allocation2 + $0xc4] sm:$0xf] }
  0xfc   : > { %v2072_v15 = vsel %vm1048_vm10, %v2067_v22, %v2071_v5  ;;  %v2079_v42 = vor.u32 %v2078_v16, %v2074_v39  ;;  %v2083_v24 = vrot.slane %v2081_v57, 1  ;;  %v2220_v25 = vrot.slane %v5690_v54, 1  ;;  %v5746_v33 = vld [vmem:[#allocation2 + $0xb8] sm:$0xf] }
  0xfd   : > { %2249 = vrot.lane.b32.xlu0 %v2215_v40, %s4688_s8  ;;  %v1272_v56 = vpop.permute.xlu1 %1271  ;;  %v4151_v40 = vcombine.low %v2684_v32, %v5654_v29  ;;  %v2966_v61 = vrot.slane %v2964_v46, 1  ;;  %v2969_v22 = vshll.u32 %v5720_v30, 16  ;;  %v2218_v29 = vsel %vm1321_vm7, %v2216_v37, %v2217_v13 }
  0xfe   : > { %3027 = vrot.lane.b32.xlu1 %v2936_v62, %s4689_s9  ;;  %v1434_v44 = vsel %vm1402_vm11, %v5110_v27, %v1272_v56  ;;  %v2959_v62 = vrot.slane %v2957_v10, 1  ;;  %v2955_v54 = vor.u32 %v2954_v4, %v2950_v63  ;;  %v3123_v57 = vrot.slane %v5699_v58, 1 }
  0xff   : > { %v1467_v17 = vsel %vm1435_vm12, %v1434_v44, %v1401_v11  ;;  %v1743_v34 = vld [vmem:[#allocation2 + $0xc0] sm:$0xf]  ;;  %v2962_v11 = vshrl.u32 %v5705_v3, 16  ;;  %v5744_v45 = vld [vmem:[#allocation2 + $0xc8] ss:$0 sps:$4 sm:$0x11]  }
 0x100   : > { %4330 = vmatmul.mubr.msk.bf16.gmra.mxu1 %vm1475_vm13, %v1467_v17  ;;  %v1379_v27 = vpop.permute.xlu0 %1378  ;;  %v5730_v38 = vcombine.low %v1743_v34, %v5717_v47  ;;  %v2653_v28 = vld [vmem:[#allocation2 + $0xc0] sm:$0xf]  ;;  %v3122_v16 = vrot.slane %v4151_v40, 1  ;;  %v2971_v37 = vrot.slane %v2969_v22, 1  ;;  %v4152_v17 = vcombine.low %v2685_v31, %v5682_v55  ;;  %v2655_v22 = vld [vmem:[#allocation2 + $0xcc] sm:$0xf] }
 0x101   : > { %3029 = vrot.lane.b32.xlu0 %v2948_v53, %s4689_s9  ;;  %v2219_v53 = vrot.slane %v4087_v8, 1  ;;  %v5754_v13 = vcombine.low %v2653_v28, %v5734_v9  ;;  %v2967_v35 = vor.u32 %v2966_v61, %v2962_v11  ;;  %v1776_v58 = vld [vmem:[#allocation2 + $0xc0] sm:$0xe]  ;;  %v5769_v4 = vld [vmem:[#allocation2 + $0xc8] ss:$0 sps:$4 sm:$0x11]  }
 0x102   : > { %3155 = vrot.lane.b32.xlu1 %v3118_v1, %s4688_s8  ;;  %v2651_v1 = vld [vmem:[#allocation2 + $0xb4] sm:$0xf]  ;;  %v2088_v39 = vshll.u32 %v5730_v38, 16  ;;  %v2086_v63 = vshrl.u32 %v5730_v38, 16  ;;  %v4088_v28 = vcombine.low %v1776_v58, %v5717_v47  ;;  %v2993_v61 = vshll.u32 %v5769_v4, 16 }
 0x103   : > { %v1250_v49 = vpop.permute.xlu1 %1249  ;;  %v5759_v10 = vcombine.low %v2651_v1, %v5746_v33  ;;  %v2988_v8 = vshll.u32 %v5754_v13, 16 }
 0x104   : > { %v1412_v12 = vsel %vm1402_vm11, %v5130_v7, %v1250_v49  ;;  %v2098_v5 = vpop.permute.xlu0 %2097  ;;  %v2084_v7 = vsel %vm1048_vm10, %v2079_v42, %v2083_v24  ;;  %v2090_v55 = vrot.slane %v2088_v39, 1  ;;  %v2972_v42 = vsel %vm1048_vm10, %v2967_v35, %v2971_v37 }
 0x105   : > { %3157 = vrot.lane.b32.xlu0 %v3121_v36, %s4688_s8  ;;  %v1445_v56 = vsel %vm1435_vm12, %v1412_v12, %v1379_v27  ;;  %v2258_v44 = vsel %vm1402_vm11, %v5088_v52, %v2098_v5  ;;  %v2960_v52 = vsel %vm1048_vm10, %v2955_v54, %v2959_v62  ;;  %v2093_v27 = vshll.u32 %v5744_v45, 16  ;;  %v5775_v62 = vld [vmem:[#allocation2 + $0xbc] ss:$0 sps:$4 sm:$0x11]  }
 0x106   : > { %2123 = vrot.lane.b32.xlu1 %v2072_v15, %s4689_s9  ;;  %4309 = vmatprep.mubr.msk.bf16.mxu0 %vm1475_vm13, %v1445_v56  ;;  %v2221_v15 = vsel %vm1321_vm7, %v2219_v53, %v2220_v25  ;;  %v3124_v36 = vsel %vm1321_vm7, %v3122_v16, %v3123_v57  ;;  %v3125_v24 = vrot.slane %v4152_v17, 1  ;;  %v3126_v49 = vrot.slane %v5720_v30, 1  ;;  %v2687_v53 = vld [vmem:[#allocation2 + $0xc0] sm:$0xe] }
 0x107   : > { %v2976_v40 = vshll.u32 %v5759_v10, 16  ;;  %v2095_v1 = vrot.slane %v2093_v27, 1  ;;  %v2986_v12 = vshrl.u32 %v5754_v13, 16  ;;  %v2091_v30 = vor.u32 %v2090_v55, %v2086_v63  ;;  %v4606_v63 = vld [vmem:[#allocation2 + $0xd4] ss:$0 sps:$4 sm:$0x11]  }
 0x108   : > { %v2226_v32 = vpop.permute.xlu0 %2225  ;;  %v2990_v11 = vrot.slane %v2988_v8, 1  ;;  %v3127_v54 = vsel %vm1321_vm7, %v3125_v24, %v3126_v49  ;;  %v2974_v56 = vshrl.u32 %v5759_v10, 16  ;;  %v2981_v47 = vshll.u32 %v5775_v62, 16 }
 0x109   : > { %v1252_v34 = vpop.permute.xlu1 %1251  ;;  %2125 = vrot.lane.b32.xlu0 %v2084_v7, %s4689_s9  ;;  %v2290_v46 = vsel %vm1435_vm12, %v2258_v44, %v2226_v32  ;;  %v2222_v44 = vrot.slane %v4088_v28, 1  ;;  %v2223_v39 = vrot.slane %v5744_v45, 1  ;;  %v2978_v16 = vrot.slane %v2976_v40, 1 }
 0x10a   : > { %2251 = vrot.lane.b32.xlu1 %v2218_v29, %s4688_s8  ;;  %4335 = vmatprep.mubr.msk.bf16.mxu1 %vm1475_vm13, %v2290_v46  ;;  %v1414_v25 = vsel %vm1402_vm11, %v5157_v48, %v1252_v34  ;;  %v5786_v29 = vld [vmem:[#allocation2 + $0xd0] sm:$0xf]  ;;  %v2096_v32 = vsel %vm1048_vm10, %v2091_v30, %v2095_v1  ;;  %v2991_v37 = vor.u32 %v2990_v11, %v2986_v12  ;;  %v2995_v17 = vrot.slane %v2993_v61, 1 }
 0x10b   : > { %v5796_v57 = vcombine.low %v2655_v22, %v5786_v29  ;;  %v4154_v27 = vcombine.low %v2687_v53, %v5734_v9  ;;  %v2983_v45 = vrot.slane %v2981_v47, 1  ;;  %v2224_v58 = vsel %vm1321_vm7, %v2222_v44, %v2223_v39  ;;  %v6288_v1 = vld [vmem:[#allocation10_spill] sm:$0xff] }
 0x10c   : > { %v2228_v48 = vpop.permute.xlu0 %2227  ;;  %v3132_v9 = vrot.slane %v5769_v4, 1  ;;  %v3129_v24 = vrot.slane %v5775_v62, 1  ;;  %v6289_v62 = vld [vmem:[#allocation7_spill] sm:$0xff]  ;;  %v3135_v39 = vrot.slane %v4606_v63, 1 }
 0x10d   : > { %v1381_v31 = vpop.permute.xlu1 %1380  ;;  %2253 = vrot.lane.b32.xlu0 %v2221_v15, %s4688_s8  ;;  %v2979_v15 = vor.u32 %v2978_v16, %v2974_v56  ;;  %v3000_v55 = vshll.u32 %v5796_v57, 16  ;;  %v2998_v40 = vshrl.u32 %v5796_v57, 16  ;;  %v6290_v16 = vld [vmem:[#allocation11_spill] sm:$0xff] }
 0x10e   : > { %3031 = vrot.lane.b32.xlu1 %v2960_v52, %s4689_s9  ;;  %v1447_v5 = vsel %vm1435_vm12, %v1414_v25, %v1381_v31  ;;  %v2686_v52 = vld [vmem:[#allocation2 + $0xb4] sm:$0xe]  ;;  %v3005_v31 = vshll.u32 %v4606_v63, 16 }
 0x10f   : > { %4310 = vmatmul.mubr.msk.bf16.gmra.mxu0 %vm1475_vm13, %v1447_v5  ;;  %v4153_v46 = vcombine.low %v2686_v52, %v5746_v33  ;;  %v2984_v49 = vsel %vm1048_vm10, %v2979_v15, %v2983_v45  ;;  %v3002_v25 = vrot.slane %v3000_v55, 1  ;;  %v2688_v5 = vld [vmem:[#allocation2 + $0xcc] sm:$0xe] }
 0x111   : > { %v2100_v7 = vpop.permute.xlu1 %2099  ;;  %3033 = vrot.lane.b32.xlu0 %v2972_v42, %s4689_s9  ;;  %v3128_v42 = vrot.slane %v4153_v46, 1  ;;  %v3003_v22 = vor.u32 %v3002_v25, %v2998_v40 }
 0x112   : > { %3159 = vrot.lane.b32.xlu1 %v3124_v36, %s4688_s8  ;;  %v2260_v35 = vsel %vm1402_vm11, %v5123_v50, %v2100_v7  ;;  %v2996_v50 = vsel %vm1048_vm10, %v2991_v37, %v2995_v17  ;;  %v3131_v36 = vrot.slane %v4154_v27, 1 }
 0x113   : > { %v2292_v34 = vsel %vm1435_vm12, %v2260_v35, %v2228_v48  ;;  %v3130_v61 = vsel %vm1321_vm7, %v3128_v42, %v3129_v24  ;;  %v3007_v48 = vrot.slane %v3005_v31, 1 }
 0x114   : > { %4336 = vmatmul.mubr.msk.bf16.vlgmr.msra.gmra.mxu1 %vm1475_vm13, %v2292_v34  ;;  %v3133_v4 = vsel %vm1321_vm7, %v3131_v36, %v3132_v9 }
 0x115   : > { %3161 = vrot.lane.b32.xlu0 %v3127_v54, %s4688_s8  ;;  %v4155_v54 = vcombine.low %v2688_v5, %v5786_v29  ;;  %v3008_v7 = vsel %vm1048_vm10, %v3003_v22, %v3007_v48  ;;  %v6291_v29 = vld [vmem:[#allocation8_spill] sm:$0xff]  ;;  %v6297_v48 = vld [vmem:[#allocation17_spill] sm:$0xff] }
 0x116   : > { %2127 = vrot.lane.b32.xlu1 %v2096_v32, %s4689_s9 }
 0x117   : > { %v1383_v8 = vpop.permute.xlu0 %1382  ;;  %v3134_v44 = vrot.slane %v4155_v54, 1 }
 0x119   : > { %3037 = vrot.lane.b32.xlu0 %v2996_v50, %s4689_s9  ;;  %v3136_v34 = vsel %vm1321_vm7, %v3134_v44, %v3135_v39 }
 0x11a   : > { %2255 = vrot.lane.b32.xlu1 %v2224_v58, %s4688_s8  ;;  %v1254_v33 = vpop.permute.xlu1 %1253  ;;  %v6292_v58 = vld [vmem:[#allocation9_spill] sm:$0xff] }
 0x11b   : > { %v1416_v28 = vsel %vm1402_vm11, %v6288_v1, %v1254_v33  ;;  %v2102_v12 = vpop.permute.xlu0 %2101  ;;  %v6294_v33 = vld [vmem:[#allocation13_spill] sm:$0xff]  ;;  %v6295_v1 = vld [vmem:[#allocation14_spill] sm:$0xff] }
 0x11c   : > { %v1449_v30 = vsel %vm1435_vm12, %v1416_v28, %v1383_v8  ;;  %v2262_v11 = vsel %vm1402_vm11, %v6289_v62, %v2102_v12  ;;  %v6293_v8 = vld [vmem:[#allocation12_spill] sm:$0xff] }
 0x11d   : > { %4313 = vmatprep.mubr.msk.bf16.mxu0 %vm1475_vm13, %v1449_v30  ;;  %3165 = vrot.lane.b32.xlu0 %v3133_v4, %s4688_s8  ;;  %v6296_v30 = vld [vmem:[#allocation15_spill] sm:$0xff] }
 0x11e   : > { %3035 = vrot.lane.b32.xlu1 %v2984_v49, %s4689_s9 }
 0x11f   : > { %v2230_v47 = vpop.permute.xlu0 %2229 }
 0x120   : > { %v1256_v56 = vpop.permute.xlu1 %1255  ;;  %v2294_v53 = vsel %vm1435_vm12, %v2262_v11, %v2230_v47 }
 0x121   : > { %4339 = vmatprep.mubr.msk.bf16.mxu1 %vm1475_vm13, %v2294_v53  ;;  %v1418_v32 = vsel %vm1402_vm11, %v6290_v16, %v1256_v56 }
 0x122   : > { %3163 = vrot.lane.b32.xlu1 %v3130_v61, %s4688_s8 }
 0x123   : > { %v3010_v37 = vpop.permute.xlu0 %3009 }
 0x124   : > { %v1385_v35 = vpop.permute.xlu1 %1384  ;;  %v3170_v52 = vsel %vm1402_vm11, %v6291_v29, %v3010_v37 }
 0x125   : > { %v1451_v17 = vsel %vm1435_vm12, %v1418_v32, %v1385_v35 }
 0x126   : > { %3039 = vrot.lane.b32.xlu1 %v3008_v7, %s4689_s9  ;;  %4314 = vmatmul.mubr.msk.bf16.gmra.mxu0 %vm1475_vm13, %v1451_v17  ;;  %v6298_v7 = vld [vmem:[#allocation16_spill] sm:$0xff] }
 0x127   : > { %v3138_v45 = vpop.permute.xlu0 %3137 }
 0x128   : > { %v2104_v27 = vpop.permute.xlu1 %2103  ;;  %v3202_v46 = vsel %vm1435_vm12, %v3170_v52, %v3138_v45  ;;  %v6299_v52 = vld [vmem:[#allocation18_spill] sm:$0xff] }
 0x129   : > { %4369 = vmatprep.mubr.msk.bf16.mxu0 %vm1475_vm13, %v3202_v46  ;;  %v2264_v15 = vsel %vm1402_vm11, %v6292_v58, %v2104_v27 }
 0x12a   : > { %3167 = vrot.lane.b32.xlu1 %v3136_v34, %s4688_s8  ;;  %s3852_s8 = sshll.u32 %s6022_s6, 4  ;;  %s6196_s8 = int_to_ptr.vmem [resolvable:$true] %s3852_s8 }
 0x12b   : > { %v2106_v63 = vpop.permute.xlu0 %2105  ;;  %s4609_s12 = scalar_lea.vmem %s6196_s8, 2048  ;;  %p4616_p1 = scmp.lt.s32.totalorder %s6196_s8, %s4614_s14 }
 0x12c   : > { %v2232_v50 = vpop.permute.xlu1 %2231  ;;  %v2266_v36 = vsel %vm1402_vm11, %v6293_v8, %v2106_v63  ;;  %p4610_p12 = scmp.ne.s32.totalorder %s6196_s8, %s4609_s12  ;;  %p4617_p2 = scmp.lt.s32.totalorder %s4615_s21, %s4609_s12 }
 0x12d   : > { %v2296_v55 = vsel %vm1435_vm12, %v2264_v15, %v2232_v50 }
 0x12e   : > { %4340 = vmatmul.mubr.msk.bf16.gmra.mxu1 %vm1475_vm13, %v2296_v55  ;;  %p4611_p13 = pnand %p4610_p12, %p4759_p4  ;;  %p4618_p3 = por %p4617_p2, %p4616_p1 }
 0x12f   : > { %v2234_v42 = vpop.permute.xlu0 %2233 }
 0x130   : > { %v3012_v9 = vpop.permute.xlu1 %3011  ;;  %v2298_v24 = vsel %vm1435_vm12, %v2266_v36, %v2234_v42  ;;  %p4612_p0 = pneg %p4611_p13 }
 0x131   : > { %4343 = vmatprep.mubr.msk.bf16.mxu1 %vm1475_vm13, %v2298_v24  ;;  %v3172_v49 = vsel %vm1402_vm11, %v6294_v33, %v3012_v9 }
 0x132   : > { %p4619_p5 = pnand %p4618_p3, %p4612_p0 }
 0x133   : > { %v3014_v25 = vpop.permute.xlu0 %3013 }
 0x134   : > { %v3140_v40 = vpop.permute.xlu1 %3139  ;;  %v3174_v28 = vsel %vm1402_vm11, %v6295_v1, %v3014_v25 }
 0x135   : > { %v3204_v31 = vsel %vm1435_vm12, %v3172_v49, %v3140_v40 }
 0x136   : > { %4370 = vmatmul.mubr.msk.bf16.vlgmr.msra.gmra.mxu0 %vm1475_vm13, %v3204_v31 }
 0x137   : > { %v3142_v4 = vpop.permute.xlu0 %3141 }
 0x138   : > { %v2108_v12 = vpop.permute.xlu1 %2107  ;;  %v3206_v5 = vsel %vm1435_vm12, %v3174_v28, %v3142_v4 }
 0x139   : > { %4373 = vmatprep.mubr.msk.bf16.mxu0 %vm1475_vm13, %v3206_v5  ;;  %v2268_v62 = vsel %vm1402_vm11, %v6296_v30, %v2108_v12 }
 0x13b   : > { %v2110_v61 = vpop.permute.xlu0 %2109 }
 0x13c   : > { %v2236_v11 = vpop.permute.xlu1 %2235  ;;  %v2270_v54 = vsel %vm1402_vm11, %v6297_v48, %v2110_v61 }
 0x13d   : > { %v2300_v22 = vsel %vm1435_vm12, %v2268_v62, %v2236_v11 }
 0x13e   : > { %4344 = vmatmul.mubr.msk.bf16.gmra.mxu1 %vm1475_vm13, %v2300_v22 }
 0x13f   : > { %v2238_v47 = vpop.permute.xlu0 %2237 }
 0x140   : > { %v3016_v56 = vpop.permute.xlu1 %3015  ;;  %v2302_v53 = vsel %vm1435_vm12, %v2270_v54, %v2238_v47 }
 0x141   : > { %4347 = vmatprep.mubr.msk.bf16.mxu1 %vm1475_vm13, %v2302_v53  ;;  %v3176_v44 = vsel %vm1402_vm11, %v6298_v7, %v3016_v56 }
 0x143   : > { %v3018_v16 = vpop.permute.xlu0 %3017 }
 0x144   : > { %v3144_v39 = vpop.permute.xlu1 %3143  ;;  %v3178_v35 = vsel %vm1402_vm11, %v5350_v41, %v3018_v16 }
 0x145   : > { %v3208_v32 = vsel %vm1435_vm12, %v3176_v44, %v3144_v39 }
 0x146   : > { %4374 = vmatmul.mubr.msk.bf16.gmra.mxu0 %vm1475_vm13, %v3208_v32 }
 0x147   : > { %v3146_v17 = vpop.permute.xlu0 %3145 }
 0x148   : > { %v2112_v37 = vpop.permute.xlu1 %2111  ;;  %v3210_v29 = vsel %vm1435_vm12, %v3178_v35, %v3146_v17 }
 0x149   : > { %4377 = vmatprep.mubr.msk.bf16.mxu0 %vm1475_vm13, %v3210_v29  ;;  %v2272_v34 = vsel %vm1402_vm11, %v6299_v52, %v2112_v37 }
 0x14b   : > { %v2114_v45 = vpop.permute.xlu0 %2113 }
 0x14c   : > { %v2240_v27 = vpop.permute.xlu1 %2239  ;;  %v2274_v58 = vsel %vm1402_vm11, %v5377_v14, %v2114_v45 }
 0x14d   : > { %v2304_v46 = vsel %vm1435_vm12, %v2272_v34, %v2240_v27 }
 0x14e   : > { %4348 = vmatmul.mubr.msk.bf16.gmra.mxu1 %vm1475_vm13, %v2304_v46 }
 0x14f   : > { %v2242_v41 = vpop.permute.xlu0 %2241 }
 0x150   : > { %v3020_v15 = vpop.permute.xlu1 %3019  ;;  %v2306_v50 = vsel %vm1435_vm12, %v2274_v58, %v2242_v41 }
 0x151   : > { %4351 = vmatprep.mubr.msk.bf16.mxu1 %vm1475_vm13, %v2306_v50  ;;  %v3180_v63 = vsel %vm1402_vm11, %v5384_v59, %v3020_v15 }
 0x153   : > { %v3022_v8 = vpop.permute.xlu0 %3021 }
 0x154   : > { %v3148_v55 = vpop.permute.xlu1 %3147  ;;  %v3182_v9 = vsel %vm1402_vm11, %v5429_v51, %v3022_v8 }
 0x155   : > { %v3212_v36 = vsel %vm1435_vm12, %v3180_v63, %v3148_v55 }
 0x156   : > { %4378 = vmatmul.mubr.msk.bf16.gmra.mxu0 %vm1475_vm13, %v3212_v36 }
 0x157   : > { %v3150_v14 = vpop.permute.xlu0 %3149 }
 0x158   : > { %v2116_v42 = vpop.permute.xlu1 %2115  ;;  %v3214_v24 = vsel %vm1435_vm12, %v3182_v9, %v3150_v14 }
 0x159   : > { %4381 = vmatprep.mubr.msk.bf16.mxu0 %vm1475_vm13, %v3214_v24  ;;  %v2276_v33 = vsel %vm1402_vm11, %v5443_v20, %v2116_v42 }
 0x15b   : > { %v2118_v59 = vpop.permute.xlu0 %2117 }
 0x15c   : > { %v2244_v49 = vpop.permute.xlu1 %2243  ;;  %v2278_v25 = vsel %vm1402_vm11, %v5478_v19, %v2118_v59 }
 0x15d   : > { %v2308_v40 = vsel %vm1435_vm12, %v2276_v33, %v2244_v49 }
 0x15e   : > { %4352 = vmatmul.mubr.msk.bf16.gmra.mxu1 %vm1475_vm13, %v2308_v40 }
 0x15f   : > { %v2246_v51 = vpop.permute.xlu0 %2245 }
 0x160   : > { %v3024_v31 = vpop.permute.xlu1 %3023  ;;  %v2310_v1 = vsel %vm1435_vm12, %v2278_v25, %v2246_v51 }
 0x161   : > { %4355 = vmatprep.mubr.msk.bf16.mxu1 %vm1475_vm13, %v2310_v1  ;;  %v3184_v28 = vsel %vm1402_vm11, %v5487_v18, %v3024_v31 }
 0x163   : > { %v3026_v20 = vpop.permute.xlu0 %3025 }
 0x164   : > { %v3152_v12 = vpop.permute.xlu1 %3151  ;;  %v3186_v5 = vsel %vm1402_vm11, %v5534_v26, %v3026_v20 }
 0x165   : > { %v3216_v4 = vsel %vm1435_vm12, %v3184_v28, %v3152_v12 }
 0x166   : > { %4382 = vmatmul.mubr.msk.bf16.gmra.mxu0 %vm1475_vm13, %v3216_v4 }
 0x167   : > { %v3154_v19 = vpop.permute.xlu0 %3153 }
 0x168   : > { %v2120_v30 = vpop.permute.xlu1 %2119  ;;  %v3218_v62 = vsel %vm1435_vm12, %v3186_v5, %v3154_v19 }
 0x169   : > { %4385 = vmatprep.mubr.msk.bf16.mxu0 %vm1475_vm13, %v3218_v62  ;;  %v2280_v11 = vsel %vm1402_vm11, %v5514_v2, %v2120_v30 }
 0x16b   : > { %v2122_v18 = vpop.permute.xlu0 %2121 }
 0x16c   : > { %v2248_v61 = vpop.permute.xlu1 %2247  ;;  %v2282_v48 = vsel %vm1402_vm11, %v5574_v6, %v2122_v18 }
 0x16d   : > { %v2312_v22 = vsel %vm1435_vm12, %v2280_v11, %v2248_v61 }
 0x16e   : > { %4356 = vmatmul.mubr.msk.bf16.gmra.mxu1 %vm1475_vm13, %v2312_v22 }
 0x16f   : > { %v2250_v26 = vpop.permute.xlu0 %2249 }
 0x170   : > { %v3028_v54 = vpop.permute.xlu1 %3027  ;;  %v2314_v56 = vsel %vm1435_vm12, %v2282_v48, %v2250_v26 }
 0x171   : > { %4359 = vmatprep.mubr.msk.bf16.mxu1 %vm1475_vm13, %v2314_v56  ;;  %v3188_v47 = vsel %vm1402_vm11, %v5569_v0, %v3028_v54 }
 0x173   : > { %v3030_v2 = vpop.permute.xlu0 %3029 }
 0x174   : > { %v3156_v53 = vpop.permute.xlu1 %3155  ;;  %v3190_v44 = vsel %vm1402_vm11, %v5615_v43, %v3030_v2 }
 0x175   : > { %v3220_v7 = vsel %vm1435_vm12, %v3188_v47, %v3156_v53 }
 0x176   : > { %4386 = vmatmul.mubr.msk.bf16.gmra.mxu0 %vm1475_vm13, %v3220_v7 }
 0x177   : > { %v3158_v6 = vpop.permute.xlu0 %3157 }
 0x178   : > { %v2124_v39 = vpop.permute.xlu1 %2123  ;;  %v3222_v16 = vsel %vm1435_vm12, %v3190_v44, %v3158_v6 }
 0x179   : > { %4389 = vmatprep.mubr.msk.bf16.mxu0 %vm1475_vm13, %v3222_v16  ;;  %v2284_v32 = vsel %vm1402_vm11, %v5634_v60, %v2124_v39 }
 0x17b   : > { %v2126_v0 = vpop.permute.xlu0 %2125 }
 0x17c   : > { %v2252_v35 = vpop.permute.xlu1 %2251  ;;  %v2286_v17 = vsel %vm1402_vm11, %v5661_v23, %v2126_v0 }
 0x17d   : > { %v2316_v37 = vsel %vm1435_vm12, %v2284_v32, %v2252_v35 }
 0x17e   : > { %4360 = vmatmul.mubr.msk.bf16.gmra.mxu1 %vm1475_vm13, %v2316_v37 }
 0x17f   : > { %v2254_v43 = vpop.permute.xlu0 %2253 }
 0x180   : > { %v3032_v29 = vpop.permute.xlu1 %3031  ;;  %v2318_v52 = vsel %vm1435_vm12, %v2286_v17, %v2254_v43 }
 0x181   : > { %4363 = vmatprep.mubr.msk.bf16.mxu1 %vm1475_vm13, %v2318_v52  ;;  %v3192_v34 = vsel %vm1402_vm11, %v5680_v21, %v3032_v29 }
 0x183   : > { %v3034_v60 = vpop.permute.xlu0 %3033 }
 0x184   : > { %v3160_v27 = vpop.permute.xlu1 %3159  ;;  %v3194_v46 = vsel %vm1402_vm11, %v5705_v3, %v3034_v60 }
 0x185   : > { %v3224_v45 = vsel %vm1435_vm12, %v3192_v34, %v3160_v27 }
 0x186   : > { %4390 = vmatmul.mubr.msk.bf16.gmra.mxu0 %vm1475_vm13, %v3224_v45 }
 0x187   : > { %v3162_v23 = vpop.permute.xlu0 %3161 }
 0x188   : > { %v2128_v58 = vpop.permute.xlu1 %2127  ;;  %v3226_v15 = vsel %vm1435_vm12, %v3194_v46, %v3162_v23 }
 0x189   : > { %4393 = vmatprep.mubr.msk.bf16.mxu0 %vm1475_vm13, %v3226_v15  ;;  %v2288_v41 = vsel %vm1402_vm11, %v5730_v38, %v2128_v58 }
 0x18b   : > { %v3038_v21 = vpop.permute.xlu0 %3037 }
 0x18c   : > { %v2256_v50 = vpop.permute.xlu1 %2255  ;;  %v3198_v8 = vsel %vm1402_vm11, %v5754_v13, %v3038_v21 }
 0x18d   : > { %v2320_v63 = vsel %vm1435_vm12, %v2288_v41, %v2256_v50 }
 0x18e   : > { %4364 = vmatmul.mubr.msk.bf16.gmra.mxu1 %vm1475_vm13, %v2320_v63 }
 0x18f   : > { %v3166_v3 = vpop.permute.xlu0 %3165 }
 0x190   : > { %v3036_v55 = vpop.permute.xlu1 %3035  ;;  %v3230_v42 = vsel %vm1435_vm12, %v3198_v8, %v3166_v3 }
 0x191   : > { %v3196_v36 = vsel %vm1402_vm11, %v5759_v10, %v3036_v55 }
 0x193   : > { %v4319_v24 = vpop.f32.mrf.mxu1 }
 0x194   : > { %v3164_v9 = vpop.permute.xlu1 %3163  ;;  %1695 = vst.msk [vmem:[#allocation3 + $0x90] sm:$0xff] %vm1676_vm0, %v4319_v24 }
 0x195   : > { %v3228_v14 = vsel %vm1435_vm12, %v3196_v36, %v3164_v9  ;;  %v1613_v13 = vpop.f32.mrf.mxu1 }
 0x196   : > { %4394 = vmatmul.mubr.msk.bf16.gmra.mxu0 %vm1475_vm13, %v3228_v14  ;;  %v4303_v33 = vpop.f32.mrf.mxu0  ;;  %1693 = vst.msk [vmem:[#allocation3 + $0x80] sm:$0xff] %vm1676_vm0, %v1613_v13 }
 0x197   : > { %4397 = vmatprep.mubr.msk.bf16.mxu0 %vm1475_vm13, %v3230_v42  ;;  %1679 = vst.msk [vmem:[#allocation3 + $0x10] sm:$0xff] %vm1676_vm0, %v4303_v33  ;;  %v4320_v40 = vpop.f32.mrf.mxu1 }
 0x198   : > { %v3040_v38 = vpop.permute.xlu1 %3039  ;;  %v1549_v10 = vpop.f32.mrf.mxu0  ;;  %1696 = vst.msk [vmem:[#allocation3 + $0x98] sm:$0xff] %vm1676_vm0, %v4320_v40 }
 0x199   : > { %v3200_v49 = vsel %vm1402_vm11, %v5796_v57, %v3040_v38  ;;  %1677 = vst.msk [vmem:[#allocation3] sm:$0xff] %vm1676_vm0, %v1549_v10  ;;  %v1616_v51 = vpop.f32.mrf.mxu1 }
 0x19a   : > { %v4304_v31 = vpop.f32.mrf.mxu0  ;;  %1694 = vst.msk [vmem:[#allocation3 + $0x88] sm:$0xff] %vm1676_vm0, %v1616_v51 }
 0x19b   : > { %1680 = vst.msk [vmem:[#allocation3 + $0x18] sm:$0xff] %vm1676_vm0, %v4304_v31 }
 0x19c   : > { %v3168_v59 = vpop.permute.xlu1 %3167  ;;  %v1552_v1 = vpop.f32.mrf.mxu0 }
 0x19d   : > { %v3232_v25 = vsel %vm1435_vm12, %v3200_v49, %v3168_v59  ;;  %v4323_v28 = vpop.f32.mrf.mxu1  ;;  %1678 = vst.msk [vmem:[#allocation3 + $0x8] sm:$0xff] %vm1676_vm0, %v1552_v1 }
 0x19e   : > { %4398 = vmatmul.mubr.msk.bf16.gmra.mxu0 %vm1475_vm13, %v3232_v25  ;;  %1699 = vst.msk [vmem:[#allocation3 + $0xb0] sm:$0xff] %vm1676_vm0, %v4323_v28  ;;  %v2527_v7 = vld [vmem:[#allocation3 + $0x10] sm:$0xff]  ;;  %v6000_v25 = vld [vmem:[%s6251_s2] ss:$0 sm:$0xff] }
 0x19f   : > { %v1629_v57 = vpop.f32.mrf.mxu1  ;;  %v6007_v28 = vld [vmem:[%s6252_s3] ss:$0 sm:$0xff] }
 0x1a0   : > { %1697 = vst.msk [vmem:[#allocation3 + $0xa0] sm:$0xff] %vm1676_vm0, %v1629_v57  ;;  %v2525_v16 = vld [vmem:[#allocation3] sm:$0xff] }
 0x1a1   : > { %v4324_v12 = vpop.f32.mrf.mxu1 }
 0x1a2   : > { %1700 = vst.msk [vmem:[#allocation3 + $0xb8] sm:$0xff] %vm1676_vm0, %v4324_v12  ;;  %v2528_v0 = vld [vmem:[#allocation3 + $0x18] sm:$0xff] }
 0x1a3   : > { %v1632_v20 = vpop.f32.mrf.mxu1 }
 0x1a4   : > { %1698 = vst.msk [vmem:[#allocation3 + $0xa8] sm:$0xff] %vm1676_vm0, %v1632_v20  ;;  %v2526_v29 = vld [vmem:[#allocation3 + $0x8] sm:$0xff] }
 0x1a5   : > { %v4327_v4 = vpop.f32.mrf.mxu1 }
 0x1a6   : > { %1703 = vst.msk [vmem:[#allocation3 + $0xd0] sm:$0xff] %vm1676_vm0, %v4327_v4 }
 0x1a7   : > { %v1645_v5 = vpop.f32.mrf.mxu1 }
 0x1a8   : > { %1701 = vst.msk [vmem:[#allocation3 + $0xc0] sm:$0xff] %vm1676_vm0, %v1645_v5 }
 0x1a9   : > { %v4328_v30 = vpop.f32.mrf.mxu1 }
 0x1aa   : > { %1704 = vst.msk [vmem:[#allocation3 + $0xd8] sm:$0xff] %vm1676_vm0, %v4328_v30 }
 0x1ab   : > { %v1648_v19 = vpop.f32.mrf.mxu1 }
 0x1ac   : > { %1702 = vst.msk [vmem:[#allocation3 + $0xc8] sm:$0xff] %vm1676_vm0, %v1648_v19 }
 0x1ae   : > { %v4307_v62 = vpop.f32.mrf.mxu0 }
 0x1af   : > { %1683 = vst.msk [vmem:[#allocation3 + $0x30] sm:$0xff] %vm1676_vm0, %v4307_v62 }
 0x1b0   : > { %v1565_v11 = vpop.f32.mrf.mxu0 }
 0x1b1   : > { %1681 = vst.msk [vmem:[#allocation3 + $0x20] sm:$0xff] %vm1676_vm0, %v1565_v11 }
 0x1b2   : > { %v4308_v61 = vpop.f32.mrf.mxu0 }
 0x1b3   : > { %1684 = vst.msk [vmem:[#allocation3 + $0x38] sm:$0xff] %vm1676_vm0, %v4308_v61 }
 0x1b4   : > { %v1568_v18 = vpop.f32.mrf.mxu0 }
 0x1b5   : > { %1682 = vst.msk [vmem:[#allocation3 + $0x28] sm:$0xff] %vm1676_vm0, %v1568_v18 }
 0x1b6   : > { %v2531_v46 = vld [vmem:[#allocation3 + $0x30] sm:$0xff] }
 0x1b8   : > { %v2529_v15 = vld [vmem:[#allocation3 + $0x20] sm:$0xff] }
 0x1ba   : > { %v2532_v21 = vld [vmem:[#allocation3 + $0x38] sm:$0xff] }
 0x1bc   : > { %v2530_v8 = vld [vmem:[#allocation3 + $0x28] sm:$0xff] }
 0x1c0   : > { %v4331_v22 = vpop.f32.mrf.mxu1 }
 0x1c1   : > { %1707 = vst.msk [vmem:[#allocation3 + $0xf0] sm:$0xff] %vm1676_vm0, %v4331_v22 }
 0x1c2   : > { %v1661_v48 = vpop.f32.mrf.mxu1 }
 0x1c3   : > { %1705 = vst.msk [vmem:[#allocation3 + $0xe0] sm:$0xff] %vm1676_vm0, %v1661_v48 }
 0x1c4   : > { %v4332_v54 = vpop.f32.mrf.mxu1 }
 0x1c5   : > { %1708 = vst.msk [vmem:[#allocation3 + $0xf8] sm:$0xff] %vm1676_vm0, %v4332_v54 }
 0x1c6   : > { %v1664_v26 = vpop.f32.mrf.mxu1 }
 0x1c7   : > { %1706 = vst.msk [vmem:[#allocation3 + $0xe8] sm:$0xff] %vm1676_vm0, %v1664_v26 }
 0x1cf   : > { %v4311_v56 = vpop.f32.mrf.mxu0 }
 0x1d0   : > { %1687 = vst.msk [vmem:[#allocation3 + $0x50] sm:$0xff] %vm1676_vm0, %v4311_v56 }
 0x1d1   : > { %v1581_v47 = vpop.f32.mrf.mxu0 }
 0x1d2   : > { %1685 = vst.msk [vmem:[#allocation3 + $0x40] sm:$0xff] %vm1676_vm0, %v1581_v47 }
 0x1d3   : > { %v4312_v53 = vpop.f32.mrf.mxu0 }
 0x1d4   : > { %1688 = vst.msk [vmem:[#allocation3 + $0x58] sm:$0xff] %vm1676_vm0, %v4312_v53  ;;  %v4337_v2 = vpop.f32.mrf.mxu1 }
 0x1d5   : > { %v1584_v44 = vpop.f32.mrf.mxu0  ;;  %v2559_v39 = vadd.f32 %v4337_v2, %v2527_v7 }
 0x1d6   : > { %1686 = vst.msk [vmem:[#allocation3 + $0x48] sm:$0xff] %vm1676_vm0, %v1584_v44  ;;  %v2398_v6 = vpop.f32.mrf.mxu1 }
 0x1d7   : > { %2591 = vst.msk [vmem:[#allocation3 + $0x10] sm:$0xff] %vm1676_vm0, %v2559_v39  ;;  %v2557_v32 = vadd.f32 %v2525_v16, %v2398_v6  ;;  %v2535_v51 = vld [vmem:[#allocation3 + $0x50] sm:$0xff] }
 0x1d8   : > { %v4338_v35 = vpop.f32.mrf.mxu1 }
 0x1d9   : > { %2589 = vst.msk [vmem:[#allocation3] sm:$0xff] %vm1676_vm0, %v2557_v32  ;;  %v2560_v37 = vadd.f32 %v4338_v35, %v2528_v0  ;;  %v2533_v20 = vld [vmem:[#allocation3 + $0x40] sm:$0xff] }
 0x1da   : > { %v2401_v17 = vpop.f32.mrf.mxu1 }
 0x1db   : > { %2592 = vst.msk [vmem:[#allocation3 + $0x18] sm:$0xff] %vm1676_vm0, %v2560_v37  ;;  %v2558_v43 = vadd.f32 %v2526_v29, %v2401_v17  ;;  %v2536_v62 = vld [vmem:[#allocation3 + $0x58] sm:$0xff] }
 0x1dd   : > { %2590 = vst.msk [vmem:[#allocation3 + $0x8] sm:$0xff] %vm1676_vm0, %v2558_v43  ;;  %v2534_v54 = vld [vmem:[#allocation3 + $0x48] sm:$0xff] }
 0x1de   : > { %v3439_v9 = vld [vmem:[#allocation3 + $0x10] sm:$0xff] }
 0x1e0   : > { %v3437_v38 = vld [vmem:[#allocation3] sm:$0xff] }
 0x1e2   : > { %v3440_v13 = vld [vmem:[#allocation3 + $0x18] sm:$0xff] }
 0x1e4   : > { %v3438_v59 = vld [vmem:[#allocation3 + $0x8] sm:$0xff] }
 0x1e6   : > { %v4315_v52 = vpop.f32.mrf.mxu0 }
 0x1e7   : > { %1691 = vst.msk [vmem:[#allocation3 + $0x70] sm:$0xff] %vm1676_vm0, %v4315_v52 }
 0x1e8   : > { %v1597_v34 = vpop.f32.mrf.mxu0 }
 0x1e9   : > { %1689 = vst.msk [vmem:[#allocation3 + $0x60] sm:$0xff] %vm1676_vm0, %v1597_v34 }
 0x1ea   : > { %v4316_v27 = vpop.f32.mrf.mxu0 }
 0x1eb   : > { %1692 = vst.msk [vmem:[#allocation3 + $0x78] sm:$0xff] %vm1676_vm0, %v4316_v27 }
 0x1ec   : > { %v1600_v60 = vpop.f32.mrf.mxu0 }
 0x1ed   : > { %1690 = vst.msk [vmem:[#allocation3 + $0x68] sm:$0xff] %vm1676_vm0, %v1600_v60 }
 0x1ee   : > { %v4341_v45 = vpop.f32.mrf.mxu1 }
 0x1ef   : > { %v2563_v58 = vadd.f32 %v4341_v45, %v2531_v46 }
 0x1f0   : > { %v2414_v23 = vpop.f32.mrf.mxu1 }
 0x1f1   : > { %2595 = vst.msk [vmem:[#allocation3 + $0x30] sm:$0xff] %vm1676_vm0, %v2563_v58  ;;  %v2561_v41 = vadd.f32 %v2529_v15, %v2414_v23 }
 0x1f2   : > { %v4342_v50 = vpop.f32.mrf.mxu1 }
 0x1f3   : > { %2593 = vst.msk [vmem:[#allocation3 + $0x20] sm:$0xff] %vm1676_vm0, %v2561_v41  ;;  %v2564_v63 = vadd.f32 %v4342_v50, %v2532_v21  ;;  %v2539_v21 = vld [vmem:[#allocation3 + $0x70] sm:$0xff] }
 0x1f4   : > { %v2417_v55 = vpop.f32.mrf.mxu1 }
 0x1f5   : > { %2596 = vst.msk [vmem:[#allocation3 + $0x38] sm:$0xff] %vm1676_vm0, %v2564_v63  ;;  %v2562_v3 = vadd.f32 %v2530_v8, %v2417_v55  ;;  %v2537_v8 = vld [vmem:[#allocation3 + $0x60] sm:$0xff] }
 0x1f6   : > { %v4371_v36 = vpop.f32.mrf.mxu0 }
 0x1f7   : > { %2594 = vst.msk [vmem:[#allocation3 + $0x28] sm:$0xff] %vm1676_vm0, %v2562_v3  ;;  %v3471_v42 = vadd.f32 %v4371_v36, %v3439_v9 }
 0x1f8   : > { %v3310_v14 = vpop.f32.mrf.mxu0  ;;  %v3443_v32 = vld [vmem:[#allocation3 + $0x30] sm:$0xff] }
 0x1f9   : > { %3503 = vst.msk [vmem:[#allocation3 + $0x10] sm:$0xff] %vm1676_vm0, %v3471_v42  ;;  %v3469_v24 = vadd.f32 %v3437_v38, %v3310_v14  ;;  %v2540_v38 = vld [vmem:[#allocation3 + $0x78] sm:$0xff] }
 0x1fa   : > { %v4372_v33 = vpop.f32.mrf.mxu0  ;;  %v3441_v37 = vld [vmem:[#allocation3 + $0x20] sm:$0xff] }
 0x1fb   : > { %3501 = vst.msk [vmem:[#allocation3] sm:$0xff] %vm1676_vm0, %v3469_v24  ;;  %v3472_v10 = vadd.f32 %v4372_v33, %v3440_v13 }
 0x1fc   : > { %v3313_v49 = vpop.f32.mrf.mxu0  ;;  %v3444_v27 = vld [vmem:[#allocation3 + $0x38] sm:$0xff] }
 0x1fd   : > { %3504 = vst.msk [vmem:[#allocation3 + $0x18] sm:$0xff] %vm1676_vm0, %v3472_v10  ;;  %v3470_v40 = vadd.f32 %v3438_v59, %v3313_v49  ;;  %v2538_v59 = vld [vmem:[#allocation3 + $0x68] sm:$0xff] }
 0x1fe   : > { %v4345_v31 = vpop.f32.mrf.mxu1  ;;  %v3442_v23 = vld [vmem:[#allocation3 + $0x28] sm:$0xff] }
 0x1ff   : > { %3502 = vst.msk [vmem:[#allocation3 + $0x8] sm:$0xff] %vm1676_vm0, %v3470_v40  ;;  %v2567_v1 = vadd.f32 %v4345_v31, %v2535_v51 }
 0x200   : > { %v3535_v57 = vld [vmem:[#allocation3 + $0x10] sm:$0xff]  ;;  %v2430_v12 = vpop.f32.mrf.mxu1 }
 0x201   : > { %v3573_v4 = vmul.f32 %v6000_v25, %v3535_v57  ;;  %2599 = vst.msk [vmem:[#allocation3 + $0x50] sm:$0xff] %vm1676_vm0, %v2567_v1  ;;  %v2565_v5 = vadd.f32 %v2533_v20, %v2430_v12 }
 0x202   : > { %v3533_v30 = vld [vmem:[#allocation3] sm:$0xff]  ;;  %v4346_v19 = vpop.f32.mrf.mxu1 }
 0x203   : > { %v3611_v11 = vadd.f32 %v6007_v28, %v3573_v4  ;;  %v3571_v61 = vmul.f32 %v6000_v25, %v3533_v30  ;;  %2597 = vst.msk [vmem:[#allocation3 + $0x40] sm:$0xff] %vm1676_vm0, %v2565_v5  ;;  %v2568_v18 = vadd.f32 %v4346_v19, %v2536_v62 }
 0x204   : > { %v3536_v22 = vld [vmem:[#allocation3 + $0x18] sm:$0xff]  ;;  %v2433_v48 = vpop.f32.mrf.mxu1 }
 0x205   : > { %v3643_v26 = vmax.f32 %v3611_v11, 0.0  ;;  %v3609_v56 = vadd.f32 %v6007_v28, %v3571_v61  ;;  %v3574_v47 = vmul.f32 %v6000_v25, %v3536_v22  ;;  %2600 = vst.msk [vmem:[#allocation3 + $0x58] sm:$0xff] %vm1676_vm0, %v2568_v18  ;;  %v2566_v53 = vadd.f32 %v2534_v54, %v2433_v48 }
 0x206   : > { %v3534_v2 = vld [vmem:[#allocation3 + $0x8] sm:$0xff]  ;;  %v4375_v7 = vpop.f32.mrf.mxu0 }
 0x207   : > { %v4217_v44 = vpack.c.bf16 %v3643_v26, %v3643_v26  ;;  %v3641_v39 = vmax.f32 %v3609_v56, 0.0  ;;  %v3612_v6 = vadd.f32 %v6007_v28, %v3574_v47  ;;  %v3572_v16 = vmul.f32 %v6000_v25, %v3534_v2  ;;  %2598 = vst.msk [vmem:[#allocation3 + $0x48] sm:$0xff] %vm1676_vm0, %v2566_v53 }
 0x208   : > { %v3475_v35 = vadd.f32 %v4375_v7, %v3443_v32  ;;  %v3326_v0 = vpop.f32.mrf.mxu0  ;;  %v3447_v20 = vld [vmem:[#allocation3 + $0x50] sm:$0xff] }
 0x209   : > { %3807 = vst.msk [vmem:[%s6022_s6 + $0x8] sm:$0xf] %vm3804_vm1, %v4217_v44  ;;  %v4215_v17 = vpack.c.bf16 %v3641_v39, %v3641_v39  ;;  %v3644_v29 = vmax.f32 %v3612_v6, 0.0  ;;  %v3610_v43 = vadd.f32 %v6007_v28, %v3572_v16  ;;  %v3473_v52 = vadd.f32 %v3441_v37, %v3326_v0  ;;  %v2543_v32 = vld [vmem:[#allocation3 + $0x90] sm:$0xff] }
 0x20a   : > { %3507 = vst.msk [vmem:[#allocation3 + $0x30] sm:$0xff] %vm1676_vm0, %v3475_v35  ;;  %v4376_v34 = vpop.f32.mrf.mxu0  ;;  %v3445_v61 = vld [vmem:[#allocation3 + $0x40] sm:$0xff] }
 0x20b   : > { %3805 = vst.msk [vmem:[%s6022_s6] sm:$0xf] %vm3804_vm1, %v4215_v17  ;;  %v4218_v60 = vpack.c.bf16 %v3644_v29, %v3644_v29  ;;  %v3642_v45 = vmax.f32 %v3610_v43, 0.0  ;;  %v3476_v46 = vadd.f32 %v4376_v34, %v3444_v27  ;;  %v2541_v17 = vld [vmem:[#allocation3 + $0x80] sm:$0xff]  ;;  %v2544_v27 = vld [vmem:[#allocation3 + $0x98] sm:$0xff] }
 0x20c   : > { %3505 = vst.msk [vmem:[#allocation3 + $0x20] sm:$0xff] %vm1676_vm0, %v3473_v52  ;;  %v3329_v58 = vpop.f32.mrf.mxu0  ;;  %v3448_v56 = vld [vmem:[#allocation3 + $0x58] sm:$0xff] }
 0x20d   : > { %3808 = vst.msk [vmem:[%s6022_s6 + $0xc] sm:$0xf] %vm3804_vm1, %v4218_v60  ;;  %v4216_v15 = vpack.c.bf16 %v3642_v45, %v3642_v45  ;;  %v3474_v41 = vadd.f32 %v3442_v23, %v3329_v58 }
 0x20e   : > { %3508 = vst.msk [vmem:[#allocation3 + $0x38] sm:$0xff] %vm1676_vm0, %v3476_v46  ;;  %v4349_v50 = vpop.f32.mrf.mxu1  ;;  %v3446_v44 = vld [vmem:[#allocation3 + $0x48] sm:$0xff] }
 0x20f   : > { %3806 = vst.msk [vmem:[%s6022_s6 + $0x4] sm:$0xf] %vm3804_vm1, %v4216_v15  ;;  %v2571_v63 = vadd.f32 %v4349_v50, %v2539_v21  ;;  %v2542_v15 = vld [vmem:[#allocation3 + $0x88] sm:$0xff] }
 0x210   : > { %3506 = vst.msk [vmem:[#allocation3 + $0x28] sm:$0xff] %vm1676_vm0, %v3474_v41  ;;  %v2446_v55 = vpop.f32.mrf.mxu1 }
 0x211   : > { %v3539_v3 = vld [vmem:[#allocation3 + $0x30] sm:$0xff]  ;;  %2603 = vst.msk [vmem:[#allocation3 + $0x70] sm:$0xff] %vm1676_vm0, %v2571_v63  ;;  %v2569_v36 = vadd.f32 %v2537_v8, %v2446_v55 }
 0x212   : > { %v3577_v9 = vmul.f32 %v6000_v25, %v3539_v3  ;;  %v4350_v14 = vpop.f32.mrf.mxu1 }
 0x213   : > { %v3537_v42 = vld [vmem:[#allocation3 + $0x20] sm:$0xff]  ;;  %2601 = vst.msk [vmem:[#allocation3 + $0x60] sm:$0xff] %vm1676_vm0, %v2569_v36  ;;  %v2572_v33 = vadd.f32 %v4350_v14, %v2540_v38 }
 0x214   : > { %v3575_v24 = vmul.f32 %v6000_v25, %v3537_v42  ;;  %v3615_v13 = vadd.f32 %v6007_v28, %v3577_v9  ;;  %v2449_v49 = vpop.f32.mrf.mxu1 }
 0x215   : > { %v3540_v10 = vld [vmem:[#allocation3 + $0x38] sm:$0xff]  ;;  %2604 = vst.msk [vmem:[#allocation3 + $0x78] sm:$0xff] %vm1676_vm0, %v2572_v33  ;;  %v2570_v51 = vadd.f32 %v2538_v59, %v2449_v49 }
 0x216   : > { %v3613_v40 = vadd.f32 %v6007_v28, %v3575_v24  ;;  %v3578_v31 = vmul.f32 %v6000_v25, %v3540_v10  ;;  %v3647_v1 = vmax.f32 %v3615_v13, 0.0  ;;  %v4379_v12 = vpop.f32.mrf.mxu0 }
 0x217   : > { %v3538_v57 = vld [vmem:[#allocation3 + $0x28] sm:$0xff]  ;;  %2602 = vst.msk [vmem:[#allocation3 + $0x68] sm:$0xff] %vm1676_vm0, %v2570_v51  ;;  %v3479_v19 = vadd.f32 %v4379_v12, %v3447_v20 }
 0x218   : > { %v3645_v4 = vmax.f32 %v3613_v40, 0.0  ;;  %v3616_v5 = vadd.f32 %v6007_v28, %v3578_v31  ;;  %v3576_v30 = vmul.f32 %v6000_v25, %v3538_v57  ;;  %v4221_v62 = vpack.c.bf16 %v3647_v1, %v3647_v1  ;;  %v3342_v11 = vpop.f32.mrf.mxu0  ;;  %v3451_v14 = vld [vmem:[#allocation3 + $0x70] sm:$0xff] }
 0x219   : > { %3511 = vst.msk [vmem:[#allocation3 + $0x50] sm:$0xff] %vm1676_vm0, %v3479_v19  ;;  %v3477_v54 = vadd.f32 %v3445_v61, %v3342_v11  ;;  %v2547_v19 = vld [vmem:[#allocation3 + $0xb0] sm:$0xff]  ;;  %v2545_v61 = vld [vmem:[#allocation3 + $0xa0] sm:$0xff] }
 0x21a   : > { %v4219_v18 = vpack.c.bf16 %v3645_v4, %v3645_v4  ;;  %v3648_v22 = vmax.f32 %v3616_v5, 0.0  ;;  %v3614_v48 = vadd.f32 %v6007_v28, %v3576_v30  ;;  %3811 = vst.msk [vmem:[%s6022_s6 + $0x18] sm:$0xf] %vm3804_vm1, %v4221_v62  ;;  %v4380_v26 = vpop.f32.mrf.mxu0  ;;  %v3449_v33 = vld [vmem:[#allocation3 + $0x60] sm:$0xff] }
 0x21b   : > { %3509 = vst.msk [vmem:[#allocation3 + $0x40] sm:$0xff] %vm1676_vm0, %v3477_v54  ;;  %v3480_v2 = vadd.f32 %v4380_v26, %v3448_v56  ;;  %v2548_v56 = vld [vmem:[#allocation3 + $0xb8] sm:$0xff] }
 0x21c   : > { %3809 = vst.msk [vmem:[%s6022_s6 + $0x10] sm:$0xf] %vm3804_vm1, %v4219_v18  ;;  %v4222_v47 = vpack.c.bf16 %v3648_v22, %v3648_v22  ;;  %v3646_v53 = vmax.f32 %v3614_v48, 0.0  ;;  %v3345_v7 = vpop.f32.mrf.mxu0  ;;  %v3452_v31 = vld [vmem:[#allocation3 + $0x78] sm:$0xff] }
 0x21d   : > { %3512 = vst.msk [vmem:[#allocation3 + $0x58] sm:$0xff] %vm1676_vm0, %v3480_v2  ;;  %v3478_v6 = vadd.f32 %v3446_v44, %v3345_v7 }
 0x21e   : > { %3812 = vst.msk [vmem:[%s6022_s6 + $0x1c] sm:$0xf] %vm3804_vm1, %v4222_v47  ;;  %v4220_v39 = vpack.c.bf16 %v3646_v53, %v3646_v53  ;;  %v4353_v16 = vpop.f32.mrf.mxu1  ;;  %v3450_v20 = vld [vmem:[#allocation3 + $0x68] sm:$0xff] }
 0x21f   : > { %3510 = vst.msk [vmem:[#allocation3 + $0x48] sm:$0xff] %vm1676_vm0, %v3478_v6  ;;  %v2575_v35 = vadd.f32 %v4353_v16, %v2543_v32 }
 0x220   : > { %3810 = vst.msk [vmem:[%s6022_s6 + $0x14] sm:$0xf] %vm3804_vm1, %v4220_v39  ;;  %v3543_v0 = vld [vmem:[#allocation3 + $0x50] sm:$0xff]  ;;  %v2462_v37 = vpop.f32.mrf.mxu1  ;;  %v2546_v39 = vld [vmem:[#allocation3 + $0xa8] sm:$0xff] }
 0x221   : > { %v3581_v29 = vmul.f32 %v6000_v25, %v3543_v0  ;;  %2607 = vst.msk [vmem:[#allocation3 + $0x90] sm:$0xff] %vm1676_vm0, %v2575_v35  ;;  %v2573_v43 = vadd.f32 %v2541_v17, %v2462_v37 }
 0x222   : > { %v3541_v52 = vld [vmem:[#allocation3 + $0x40] sm:$0xff]  ;;  %v4354_v34 = vpop.f32.mrf.mxu1 }
 0x223   : > { %v3619_v60 = vadd.f32 %v6007_v28, %v3581_v29  ;;  %v3579_v45 = vmul.f32 %v6000_v25, %v3541_v52  ;;  %2605 = vst.msk [vmem:[#allocation3 + $0x80] sm:$0xff] %vm1676_vm0, %v2573_v43  ;;  %v2576_v46 = vadd.f32 %v4354_v34, %v2544_v27 }
 0x224   : > { %v3544_v58 = vld [vmem:[#allocation3 + $0x58] sm:$0xff]  ;;  %v2465_v23 = vpop.f32.mrf.mxu1 }
 0x225   : > { %v3651_v41 = vmax.f32 %v3619_v60, 0.0  ;;  %v3617_v50 = vadd.f32 %v6007_v28, %v3579_v45  ;;  %v3582_v21 = vmul.f32 %v6000_v25, %v3544_v58  ;;  %2608 = vst.msk [vmem:[#allocation3 + $0x98] sm:$0xff] %vm1676_vm0, %v2576_v46  ;;  %v2574_v63 = vadd.f32 %v2542_v15, %v2465_v23 }
 0x226   : > { %v3542_v55 = vld [vmem:[#allocation3 + $0x48] sm:$0xff]  ;;  %v4383_v8 = vpop.f32.mrf.mxu0 }
 0x227   : > { %v4225_v3 = vpack.c.bf16 %v3651_v41, %v3651_v41  ;;  %v3649_v36 = vmax.f32 %v3617_v50, 0.0  ;;  %v3620_v9 = vadd.f32 %v6007_v28, %v3582_v21  ;;  %v3580_v42 = vmul.f32 %v6000_v25, %v3542_v55  ;;  %2606 = vst.msk [vmem:[#allocation3 + $0x88] sm:$0xff] %vm1676_vm0, %v2574_v63 }
 0x228   : > { %v3483_v38 = vadd.f32 %v4383_v8, %v3451_v14  ;;  %v3358_v24 = vpop.f32.mrf.mxu0  ;;  %v3455_v17 = vld [vmem:[#allocation3 + $0x90] sm:$0xff] }
 0x229   : > { %3815 = vst.msk [vmem:[%s6022_s6 + $0x28] sm:$0xf] %vm3804_vm1, %v4225_v3  ;;  %v4223_v13 = vpack.c.bf16 %v3649_v36, %v3649_v36  ;;  %v3652_v10 = vmax.f32 %v3620_v9, 0.0  ;;  %v3618_v49 = vadd.f32 %v6007_v28, %v3580_v42  ;;  %v3481_v59 = vadd.f32 %v3449_v33, %v3358_v24  ;;  %v2551_v14 = vld [vmem:[#allocation3 + $0xd0] sm:$0xff] }
 0x22a   : > { %3515 = vst.msk [vmem:[#allocation3 + $0x70] sm:$0xff] %vm1676_vm0, %v3483_v38  ;;  %v4384_v40 = vpop.f32.mrf.mxu0  ;;  %v3453_v45 = vld [vmem:[#allocation3 + $0x80] sm:$0xff] }
 0x22b   : > { %3813 = vst.msk [vmem:[%s6022_s6 + $0x20] sm:$0xf] %vm3804_vm1, %v4223_v13  ;;  %v4226_v51 = vpack.c.bf16 %v3652_v10, %v3652_v10  ;;  %v3650_v1 = vmax.f32 %v3618_v49, 0.0  ;;  %v3484_v57 = vadd.f32 %v4384_v40, %v3452_v31  ;;  %v2549_v13 = vld [vmem:[#allocation3 + $0xc0] sm:$0xff]  ;;  %v2552_v31 = vld [vmem:[#allocation3 + $0xd8] sm:$0xff] }
 0x22c   : > { %3513 = vst.msk [vmem:[#allocation3 + $0x60] sm:$0xff] %vm1676_vm0, %v3481_v59  ;;  %v3361_v12 = vpop.f32.mrf.mxu0  ;;  %v3456_v50 = vld [vmem:[#allocation3 + $0x98] sm:$0xff] }
 0x22d   : > { %3816 = vst.msk [vmem:[%s6022_s6 + $0x2c] sm:$0xf] %vm3804_vm1, %v4226_v51  ;;  %v4224_v4 = vpack.c.bf16 %v3650_v1, %v3650_v1  ;;  %v3482_v5 = vadd.f32 %v3450_v20, %v3361_v12 }
 0x22e   : > { %3516 = vst.msk [vmem:[#allocation3 + $0x78] sm:$0xff] %vm1676_vm0, %v3484_v57  ;;  %v4357_v30 = vpop.f32.mrf.mxu1  ;;  %v3454_v3 = vld [vmem:[#allocation3 + $0x88] sm:$0xff] }
 0x22f   : > { %3814 = vst.msk [vmem:[%s6022_s6 + $0x24] sm:$0xf] %vm3804_vm1, %v4224_v4  ;;  %v2579_v62 = vadd.f32 %v4357_v30, %v2547_v19  ;;  %v2550_v4 = vld [vmem:[#allocation3 + $0xc8] sm:$0xff] }
 0x230   : > { %3514 = vst.msk [vmem:[#allocation3 + $0x68] sm:$0xff] %vm1676_vm0, %v3482_v5  ;;  %v2478_v11 = vpop.f32.mrf.mxu1 }
 0x231   : > { %v3547_v18 = vld [vmem:[#allocation3 + $0x70] sm:$0xff]  ;;  %2611 = vst.msk [vmem:[#allocation3 + $0xb0] sm:$0xff] %vm1676_vm0, %v2579_v62  ;;  %v2577_v22 = vadd.f32 %v2545_v61, %v2478_v11 }
 0x232   : > { %v3585_v48 = vmul.f32 %v6000_v25, %v3547_v18  ;;  %v4358_v26 = vpop.f32.mrf.mxu1 }
 0x233   : > { %v3545_v54 = vld [vmem:[#allocation3 + $0x60] sm:$0xff]  ;;  %2609 = vst.msk [vmem:[#allocation3 + $0xa0] sm:$0xff] %vm1676_vm0, %v2577_v22  ;;  %v2580_v53 = vadd.f32 %v4358_v26, %v2548_v56 }
 0x234   : > { %v3583_v47 = vmul.f32 %v6000_v25, %v3545_v54  ;;  %v3623_v2 = vadd.f32 %v6007_v28, %v3585_v48  ;;  %v2481_v44 = vpop.f32.mrf.mxu1 }
 0x235   : > { %v3548_v7 = vld [vmem:[#allocation3 + $0x78] sm:$0xff]  ;;  %2612 = vst.msk [vmem:[#allocation3 + $0xb8] sm:$0xff] %vm1676_vm0, %v2580_v53  ;;  %v2578_v32 = vadd.f32 %v2546_v39, %v2481_v44 }
 0x236   : > { %v3621_v6 = vadd.f32 %v6007_v28, %v3583_v47  ;;  %v3586_v16 = vmul.f32 %v6000_v25, %v3548_v7  ;;  %v3655_v35 = vmax.f32 %v3623_v2, 0.0  ;;  %v4387_v37 = vpop.f32.mrf.mxu0 }
 0x237   : > { %v3546_v0 = vld [vmem:[#allocation3 + $0x68] sm:$0xff]  ;;  %2610 = vst.msk [vmem:[#allocation3 + $0xa8] sm:$0xff] %vm1676_vm0, %v2578_v32  ;;  %v3487_v34 = vadd.f32 %v4387_v37, %v3455_v17 }
 0x238   : > { %v3653_v29 = vmax.f32 %v3621_v6, 0.0  ;;  %v3624_v43 = vadd.f32 %v6007_v28, %v3586_v16  ;;  %v3584_v52 = vmul.f32 %v6000_v25, %v3546_v0  ;;  %v4229_v27 = vpack.c.bf16 %v3655_v35, %v3655_v35  ;;  %v3374_v60 = vpop.f32.mrf.mxu0  ;;  %v3459_v26 = vld [vmem:[#allocation3 + $0xb0] sm:$0xff] }
 0x239   : > { %3519 = vst.msk [vmem:[#allocation3 + $0x90] sm:$0xff] %vm1676_vm0, %v3487_v34  ;;  %v3485_v15 = vadd.f32 %v3453_v45, %v3374_v60  ;;  %v2555_v34 = vld [vmem:[#allocation3 + $0xf0] sm:$0xff]  ;;  %v2553_v45 = vld [vmem:[#allocation3 + $0xe0] sm:$0xff] }
 0x23a   : > { %v4227_v46 = vpack.c.bf16 %v3653_v29, %v3653_v29  ;;  %v3656_v58 = vmax.f32 %v3624_v43, 0.0  ;;  %v3622_v23 = vadd.f32 %v6007_v28, %v3584_v52  ;;  %3819 = vst.msk [vmem:[%s6022_s6 + $0x38] sm:$0xf] %vm3804_vm1, %v4229_v27  ;;  %v4388_v41 = vpop.f32.mrf.mxu0  ;;  %v3457_v53 = vld [vmem:[#allocation3 + $0xa0] sm:$0xff] }
 0x23b   : > { %3517 = vst.msk [vmem:[#allocation3 + $0x80] sm:$0xff] %vm1676_vm0, %v3485_v15  ;;  %v3488_v55 = vadd.f32 %v4388_v41, %v3456_v50  ;;  %v2556_v50 = vld [vmem:[#allocation3 + $0xf8] sm:$0xff] }
 0x23c   : > { %3817 = vst.msk [vmem:[%s6022_s6 + $0x30] sm:$0xf] %vm3804_vm1, %v4227_v46  ;;  %v4230_v21 = vpack.c.bf16 %v3656_v58, %v3656_v58  ;;  %v3654_v63 = vmax.f32 %v3622_v23, 0.0  ;;  %v3377_v8 = vpop.f32.mrf.mxu0  ;;  %v3460_v16 = vld [vmem:[#allocation3 + $0xb8] sm:$0xff] }
 0x23d   : > { %3520 = vst.msk [vmem:[#allocation3 + $0x98] sm:$0xff] %vm1676_vm0, %v3488_v55  ;;  %v3486_v9 = vadd.f32 %v3454_v3, %v3377_v8 }
 0x23e   : > { %3820 = vst.msk [vmem:[%s6022_s6 + $0x3c] sm:$0xf] %vm3804_vm1, %v4230_v21  ;;  %v4228_v36 = vpack.c.bf16 %v3654_v63, %v3654_v63  ;;  %v4361_v42 = vpop.f32.mrf.mxu1  ;;  %v3458_v17 = vld [vmem:[#allocation3 + $0xa8] sm:$0xff] }
 0x23f   : > { %3518 = vst.msk [vmem:[#allocation3 + $0x88] sm:$0xff] %vm1676_vm0, %v3486_v9  ;;  %v2583_v38 = vadd.f32 %v4361_v42, %v2551_v14 }
 0x240   : > { %3818 = vst.msk [vmem:[%s6022_s6 + $0x34] sm:$0xf] %vm3804_vm1, %v4228_v36  ;;  %v3551_v24 = vld [vmem:[#allocation3 + $0x90] sm:$0xff]  ;;  %v2494_v33 = vpop.f32.mrf.mxu1  ;;  %v2554_v36 = vld [vmem:[#allocation3 + $0xe8] sm:$0xff] }
 0x241   : > { %v3589_v10 = vmul.f32 %v6000_v25, %v3551_v24  ;;  %2615 = vst.msk [vmem:[#allocation3 + $0xd0] sm:$0xff] %vm1676_vm0, %v2583_v38  ;;  %v2581_v49 = vadd.f32 %v2549_v13, %v2494_v33 }
 0x242   : > { %v3549_v59 = vld [vmem:[#allocation3 + $0x80] sm:$0xff]  ;;  %v4362_v40 = vpop.f32.mrf.mxu1 }
 0x243   : > { %v3627_v51 = vadd.f32 %v6007_v28, %v3589_v10  ;;  %v3587_v1 = vmul.f32 %v6000_v25, %v3549_v59  ;;  %2613 = vst.msk [vmem:[#allocation3 + $0xc0] sm:$0xff] %vm1676_vm0, %v2581_v49  ;;  %v2584_v57 = vadd.f32 %v4362_v40, %v2552_v31 }
 0x244   : > { %v3552_v12 = vld [vmem:[#allocation3 + $0x98] sm:$0xff]  ;;  %v2497_v20 = vpop.f32.mrf.mxu1 }
 0x245   : > { %v3659_v5 = vmax.f32 %v3627_v51, 0.0  ;;  %v3625_v30 = vadd.f32 %v6007_v28, %v3587_v1  ;;  %v3590_v19 = vmul.f32 %v6000_v25, %v3552_v12  ;;  %2616 = vst.msk [vmem:[#allocation3 + $0xd8] sm:$0xff] %vm1676_vm0, %v2584_v57  ;;  %v2582_v62 = vadd.f32 %v2550_v4, %v2497_v20 }
 0x246   : > { %v3550_v11 = vld [vmem:[#allocation3 + $0x88] sm:$0xff]  ;;  %v4391_v61 = vpop.f32.mrf.mxu0 }
 0x247   : > { %v4233_v18 = vpack.c.bf16 %v3659_v5, %v3659_v5  ;;  %v3657_v22 = vmax.f32 %v3625_v30, 0.0  ;;  %v3628_v48 = vadd.f32 %v6007_v28, %v3590_v19  ;;  %v3588_v54 = vmul.f32 %v6000_v25, %v3550_v11  ;;  %2614 = vst.msk [vmem:[#allocation3 + $0xc8] sm:$0xff] %vm1676_vm0, %v2582_v62 }
 0x248   : > { %v3491_v56 = vadd.f32 %v4391_v61, %v3459_v26  ;;  %v3390_v47 = vpop.f32.mrf.mxu0  ;;  %v3463_v13 = vld [vmem:[#allocation3 + $0xd0] sm:$0xff] }
 0x249   : > { %3823 = vst.msk [vmem:[%s6022_s6 + $0x48] sm:$0xf] %vm3804_vm1, %v4233_v18  ;;  %v4231_v2 = vpack.c.bf16 %v3657_v22, %v3657_v22  ;;  %v3660_v7 = vmax.f32 %v3628_v48, 0.0  ;;  %v3626_v44 = vadd.f32 %v6007_v28, %v3588_v54  ;;  %v3489_v39 = vadd.f32 %v3457_v53, %v3390_v47 }
 0x24a   : > { %3523 = vst.msk [vmem:[#allocation3 + $0xb0] sm:$0xff] %vm1676_vm0, %v3491_v56  ;;  %v4392_v6 = vpop.f32.mrf.mxu0  ;;  %v3461_v1 = vld [vmem:[#allocation3 + $0xc0] sm:$0xff] }
 0x24b   : > { %3821 = vst.msk [vmem:[%s6022_s6 + $0x40] sm:$0xf] %vm3804_vm1, %v4231_v2  ;;  %v4234_v32 = vpack.c.bf16 %v3660_v7, %v3660_v7  ;;  %v3658_v35 = vmax.f32 %v3626_v44, 0.0  ;;  %v3492_v0 = vadd.f32 %v4392_v6, %v3460_v16 }
 0x24c   : > { %3521 = vst.msk [vmem:[#allocation3 + $0xa0] sm:$0xff] %vm1676_vm0, %v3489_v39  ;;  %v3393_v37 = vpop.f32.mrf.mxu0  ;;  %v3464_v30 = vld [vmem:[#allocation3 + $0xd8] sm:$0xff] }
 0x24d   : > { %3824 = vst.msk [vmem:[%s6022_s6 + $0x4c] sm:$0xf] %vm3804_vm1, %v4234_v32  ;;  %v4232_v29 = vpack.c.bf16 %v3658_v35, %v3658_v35  ;;  %v3490_v43 = vadd.f32 %v3458_v17, %v3393_v37 }
 0x24e   : > { %3524 = vst.msk [vmem:[#allocation3 + $0xb8] sm:$0xff] %vm1676_vm0, %v3492_v0  ;;  %v4365_v52 = vpop.f32.mrf.mxu1  ;;  %v3462_v18 = vld [vmem:[#allocation3 + $0xc8] sm:$0xff] }
 0x24f   : > { %3822 = vst.msk [vmem:[%s6022_s6 + $0x44] sm:$0xf] %vm3804_vm1, %v4232_v29  ;;  %v2587_v27 = vadd.f32 %v4365_v52, %v2555_v34 }
 0x250   : > { %3522 = vst.msk [vmem:[#allocation3 + $0xa8] sm:$0xff] %vm1676_vm0, %v3490_v43  ;;  %v2510_v60 = vpop.f32.mrf.mxu1 }
 0x251   : > { %v3555_v46 = vld [vmem:[#allocation3 + $0xb0] sm:$0xff]  ;;  %2619 = vst.msk [vmem:[#allocation3 + $0xf0] sm:$0xff] %vm1676_vm0, %v2587_v27  ;;  %v2585_v58 = vadd.f32 %v2553_v45, %v2510_v60 }
 0x252   : > { %v3593_v23 = vmul.f32 %v6000_v25, %v3555_v46  ;;  %v4366_v41 = vpop.f32.mrf.mxu1 }
 0x253   : > { %v3553_v15 = vld [vmem:[#allocation3 + $0xa0] sm:$0xff]  ;;  %2617 = vst.msk [vmem:[#allocation3 + $0xe0] sm:$0xff] %vm1676_vm0, %v2585_v58  ;;  %v2588_v63 = vadd.f32 %v4366_v41, %v2556_v50 }
 0x254   : > { %v3591_v21 = vmul.f32 %v6000_v25, %v3553_v15  ;;  %v3631_v55 = vadd.f32 %v6007_v28, %v3593_v23  ;;  %v2513_v3 = vpop.f32.mrf.mxu1 }
 0x255   : > { %v3556_v8 = vld [vmem:[#allocation3 + $0xb8] sm:$0xff]  ;;  %2620 = vst.msk [vmem:[#allocation3 + $0xf8] sm:$0xff] %vm1676_vm0, %v2588_v63  ;;  %v2586_v14 = vadd.f32 %v2554_v36, %v2513_v3 }
 0x256   : > { %v3629_v9 = vadd.f32 %v6007_v28, %v3591_v21  ;;  %v3594_v42 = vmul.f32 %v6000_v25, %v3556_v8  ;;  %v3663_v38 = vmax.f32 %v3631_v55, 0.0  ;;  %v4395_v33 = vpop.f32.mrf.mxu0 }
 0x257   : > { %v3554_v24 = vld [vmem:[#allocation3 + $0xa8] sm:$0xff]  ;;  %2618 = vst.msk [vmem:[#allocation3 + $0xe8] sm:$0xff] %vm1676_vm0, %v2586_v14  ;;  %v3495_v40 = vadd.f32 %v4395_v33, %v3463_v13 }
 0x258   : > { %v3661_v10 = vmax.f32 %v3629_v9, 0.0  ;;  %v3632_v49 = vadd.f32 %v6007_v28, %v3594_v42  ;;  %v3592_v59 = vmul.f32 %v6000_v25, %v3554_v24  ;;  %v4237_v31 = vpack.c.bf16 %v3663_v38, %v3663_v38  ;;  %v3406_v51 = vpop.f32.mrf.mxu0  ;;  %v3467_v26 = vld [vmem:[#allocation3 + $0xf0] sm:$0xff] }
 0x259   : > { %3527 = vst.msk [vmem:[#allocation3 + $0xd0] sm:$0xff] %vm1676_vm0, %v3495_v40  ;;  %v3493_v4 = vadd.f32 %v3461_v1, %v3406_v51 }
 0x25a   : > { %v4235_v57 = vpack.c.bf16 %v3661_v10, %v3661_v10  ;;  %v3664_v12 = vmax.f32 %v3632_v49, 0.0  ;;  %v3630_v20 = vadd.f32 %v6007_v28, %v3592_v59  ;;  %3827 = vst.msk [vmem:[%s6022_s6 + $0x58] sm:$0xf] %vm3804_vm1, %v4237_v31  ;;  %v4396_v5 = vpop.f32.mrf.mxu0  ;;  %v3465_v2 = vld [vmem:[#allocation3 + $0xe0] sm:$0xff] }
 0x25b   : > { %3525 = vst.msk [vmem:[#allocation3 + $0xc0] sm:$0xff] %vm1676_vm0, %v3493_v4  ;;  %v3496_v11 = vadd.f32 %v4396_v5, %v3464_v30 }
 0x25c   : > { %3825 = vst.msk [vmem:[%s6022_s6 + $0x50] sm:$0xf] %vm3804_vm1, %v4235_v57  ;;  %v4238_v19 = vpack.c.bf16 %v3664_v12, %v3664_v12  ;;  %v3662_v62 = vmax.f32 %v3630_v20, 0.0  ;;  %v3409_v61 = vpop.f32.mrf.mxu0  ;;  %v3468_v16 = vld [vmem:[#allocation3 + $0xf8] sm:$0xff] }
 0x25d   : > { %3528 = vst.msk [vmem:[#allocation3 + $0xd8] sm:$0xff] %vm1676_vm0, %v3496_v11  ;;  %v3494_v48 = vadd.f32 %v3462_v18, %v3409_v61 }
 0x25e   : > { %3828 = vst.msk [vmem:[%s6022_s6 + $0x5c] sm:$0xf] %vm3804_vm1, %v4238_v19  ;;  %v4236_v22 = vpack.c.bf16 %v3662_v62, %v3662_v62  ;;  %v4399_v54 = vpop.f32.mrf.mxu0  ;;  %v3466_v29 = vld [vmem:[#allocation3 + $0xe8] sm:$0xff] }
 0x25f   : > { %3526 = vst.msk [vmem:[#allocation3 + $0xc8] sm:$0xff] %vm1676_vm0, %v3494_v48  ;;  %v3499_v56 = vadd.f32 %v4399_v54, %v3467_v26 }
 0x260   : > { %3826 = vst.msk [vmem:[%s6022_s6 + $0x54] sm:$0xf] %vm3804_vm1, %v4236_v22  ;;  %v3559_v47 = vld [vmem:[#allocation3 + $0xd0] sm:$0xff]  ;;  %v3422_v53 = vpop.f32.mrf.mxu0 }
 0x261   : > { %v3597_v7 = vmul.f32 %v6000_v25, %v3559_v47  ;;  %3531 = vst.msk [vmem:[#allocation3 + $0xf0] sm:$0xff] %vm1676_vm0, %v3499_v56  ;;  %v3497_v44 = vadd.f32 %v3465_v2, %v3422_v53 }
 0x262   : > { %v3557_v39 = vld [vmem:[#allocation3 + $0xc0] sm:$0xff]  ;;  %v4400_v6 = vpop.f32.mrf.mxu0 }
 0x263   : > { %v3635_v32 = vadd.f32 %v6007_v28, %v3597_v7  ;;  %v3595_v35 = vmul.f32 %v6000_v25, %v3557_v39  ;;  %3529 = vst.msk [vmem:[#allocation3 + $0xe0] sm:$0xff] %vm1676_vm0, %v3497_v44  ;;  %v3500_v0 = vadd.f32 %v4400_v6, %v3468_v16 }
 0x264   : > { %v3560_v37 = vld [vmem:[#allocation3 + $0xd8] sm:$0xff]  ;;  %v3425_v17 = vpop.f32.mrf.mxu0 }
 0x265   : > { %v3667_v43 = vmax.f32 %v3635_v32, 0.0  ;;  %v3633_v52 = vadd.f32 %v6007_v28, %v3595_v35  ;;  %v3598_v34 = vmul.f32 %v6000_v25, %v3560_v37  ;;  %3532 = vst.msk [vmem:[#allocation3 + $0xf8] sm:$0xff] %vm1676_vm0, %v3500_v0  ;;  %v3498_v27 = vadd.f32 %v3466_v29, %v3425_v17 }
 0x266   : > { %v3558_v60 = vld [vmem:[#allocation3 + $0xc8] sm:$0xff] }
 0x267   : > { %v4241_v45 = vpack.c.bf16 %v3667_v43, %v3667_v43  ;;  %v3665_v46 = vmax.f32 %v3633_v52, 0.0  ;;  %v3636_v58 = vadd.f32 %v6007_v28, %v3598_v34  ;;  %v3596_v23 = vmul.f32 %v6000_v25, %v3558_v60  ;;  %3530 = vst.msk [vmem:[#allocation3 + $0xe8] sm:$0xff] %vm1676_vm0, %v3498_v27 }
 0x268   : > { %v3563_v15 = vld [vmem:[#allocation3 + $0xf0] sm:$0xff] }
 0x269   : > { %3831 = vst.msk [vmem:[%s6022_s6 + $0x68] sm:$0xf] %vm3804_vm1, %v4241_v45  ;;  %v4239_v41 = vpack.c.bf16 %v3665_v46, %v3665_v46  ;;  %v3668_v50 = vmax.f32 %v3636_v58, 0.0  ;;  %v3634_v21 = vadd.f32 %v6007_v28, %v3596_v23  ;;  %v3601_v63 = vmul.f32 %v6000_v25, %v3563_v15 }
 0x26a   : > { %v3561_v55 = vld [vmem:[#allocation3 + $0xe0] sm:$0xff] }
 0x26b   : > { %3829 = vst.msk [vmem:[%s6022_s6 + $0x60] sm:$0xf] %vm3804_vm1, %v4239_v41  ;;  %v4242_v8 = vpack.c.bf16 %v3668_v50, %v3668_v50  ;;  %v3666_v3 = vmax.f32 %v3634_v21, 0.0  ;;  %v3639_v36 = vadd.f32 %v6007_v28, %v3601_v63  ;;  %v3599_v9 = vmul.f32 %v6000_v25, %v3561_v55 }
 0x26c   : > { %v3564_v42 = vld [vmem:[#allocation3 + $0xf8] sm:$0xff] }
 0x26d   : > { %3832 = vst.msk [vmem:[%s6022_s6 + $0x6c] sm:$0xf] %vm3804_vm1, %v4242_v8  ;;  %v4240_v14 = vpack.c.bf16 %v3666_v3, %v3666_v3  ;;  %v3671_v38 = vmax.f32 %v3639_v36, 0.0  ;;  %v3637_v24 = vadd.f32 %v6007_v28, %v3599_v9  ;;  %v3602_v33 = vmul.f32 %v6000_v25, %v3564_v42 }
 0x26e   : > { %v3562_v13 = vld [vmem:[#allocation3 + $0xe8] sm:$0xff] }
 0x26f   : > { %3830 = vst.msk [vmem:[%s6022_s6 + $0x64] sm:$0xf] %vm3804_vm1, %v4240_v14  ;;  %v4245_v10 = vpack.c.bf16 %v3671_v38, %v3671_v38  ;;  %v3669_v49 = vmax.f32 %v3637_v24, 0.0  ;;  %v3640_v59 = vadd.f32 %v6007_v28, %v3602_v33  ;;  %v3600_v40 = vmul.f32 %v6000_v25, %v3562_v13 }
 0x271   : > { %3835 = vst.msk [vmem:[%s6022_s6 + $0x78] sm:$0xf] %vm3804_vm1, %v4245_v10  ;;  %v4243_v31 = vpack.c.bf16 %v3669_v49, %v3669_v49  ;;  %v3672_v51 = vmax.f32 %v3640_v59, 0.0  ;;  %v3638_v1 = vadd.f32 %v6007_v28, %v3600_v40 }
 0x273   : > { %3833 = vst.msk [vmem:[%s6022_s6 + $0x70] sm:$0xf] %vm3804_vm1, %v4243_v31  ;;  %v4246_v57 = vpack.c.bf16 %v3672_v51, %v3672_v51  ;;  %v3670_v12 = vmax.f32 %v3638_v1, 0.0 }
 0x275   : > { %3836 = vst.msk [vmem:[%s6022_s6 + $0x7c] sm:$0xf] %vm3804_vm1, %v4246_v57  ;;  %v4244_v25 = vpack.c.bf16 %v3670_v12, %v3670_v12 }
 0x277   : > { %3834 = vst.msk [vmem:[%s6022_s6 + $0x74] sm:$0xf] %vm3804_vm1, %v4244_v25 }
 0x278   : > { %4622 = shalt.err (!%p4619_p5)
}
 0x279   : > { %s4623_s22 = scalar_lea.hbm %s6194_s11, 2048  ;;  %s4627_s29 = scalar_lea.hbm %s6253_s4, 4096 }
 0x27a   : > { %p4624_p6 = scmp.ne.s32.totalorder %s6194_s11, %s4623_s22  ;;  %p4628_p10 = scmp.lt.s32.totalorder %s6194_s11, %s6253_s4 }
 0x27b   : > { %p4629_p11 = scmp.lt.s32.totalorder %s4627_s29, %s4623_s22 }
 0x27c   : > { %p4625_p7 = pnand %p4624_p6, %p4759_p4 }
 0x27d   : > { %p4630_p12 = por %p4629_p11, %p4628_p10 }
 0x27e   : > { %p4626_p9 = pneg %p4625_p7 }
 0x280   : > { %p4631_p13 = pnand %p4630_p12, %p4626_p9 }
 0x282   : > { %4634 = shalt.err (!%p4631_p13)
}
 0x283   : > { %s4692_s6 = smov 64   ;;  %s4693_s7 = smov 4  }
 0x284   : > { %4403 = dma.vmem_to_hbm [thread:$0]  (%p4759_p4), %s6196_s8, 2048, %s6194_s11, %s6204_s18, %s4692_s6, %s4692_s6, %s4693_s7  }
 0x285 PF: > { %p4409_p0 = scmp.ge.s32.totalorder %s4685_s20, 2  ;;  %s3867_s9 = sand.u32 1, %s4665_s15  }
 0x286   : > { %s3868_s10 = scalar_lea.sflag [#allocation5], %s3867_s9 }
 0x287   : > { %p4406_p1 = pnand %p4409_p0, %p4766_p8 }
 0x289   : > { %p4407_p2 = pneg %p4406_p1 }
 0x28b   : > { %4660 = dma.done.wait (%p4407_p2), %s3868_s10, 2048  }
 0x28c   : > { %4662 = vsyncadd (%p4407_p2), %s3868_s10, 4294965248  ;;  %s17_s20 = sadd.s32 1, %s4685_s20   ;;  %s6300_s15 = smov %s4669_s16 }
 0x28d   : > { %p14_p3 = scmp.ge.s32.totalorder %s17_s20, 4   ;;  %s6301_s16 = smov %s4673_s17 }
 0x28e   : > { %s6302_s17 = smov %s4772_s28  ;;  %s6303_s18 = smov %s4681_s19 }
 0x28f   : > { %s6304_s19 = smov %s6306_s23  ;;  %16 = sbr.rel (!%p14_p3) target bundleno = 4 (0x4), region = 92 }
 0x294   :  { %3873 = vsyncpa [#allocation5], 1 }
 0x295   :  { %3875 = vsyncpa [#allocation5 + $0x1], 1 }

</bundles_post_ra>
